<compile_context>
chip_gen: v6e
topology: v6e:2x2x1
jax: 0.10.0
libtpu: 0.0.40
codegen_flags: <defaults>
</compile_context>

<pallas_src>
import functools

import jax
import jax.numpy as jnp
import numpy as np
from jax.experimental import pallas as pl
from jax.experimental.pallas import tpu as pltpu

EPS = 1e-5
RES_NONE, RES_ID, RES_PROJ = 0, 1, 2


# --------------------------------------------------------------------------------------
# Fused Pallas kernel (whole forward; one batch block of B samples per grid step)
# --------------------------------------------------------------------------------------

def fused_stgcn_kernel(*refs, meta, n_in, n_groups, t_k, pad):
    """refs = [x] + per-block params + shift packs + [out_mid, out_last].

    Per-block params: RES_NONE / RES_ID -> (w_slab, bias);  RES_PROJ -> (w0, wt, bias).
      w_slab (bf16) = [w_eff (VCin, VCout) ; W_stack (t_k*VCout, VCout)]   (rows)
      w0     (bf16) = [w_eff | w_res_blockdiag]             (VCin, 2*VCout)
      wt     (bf16) = W_stack                               (t_k*VCout, VCout)
      bias   (f32)  = [b_eff ; b_t ; b_res]                 (3, VCout)
    Shift packs (bf16): (t_k, B*T_out, B*T_in) 0/1 selection matrices per (T_in, stride).
    meta per block: (VCin, VCout, stride, res_kind, group_idx, is_mid_output).
    """
    x_ref = refs[0]
    group_refs = refs[n_in - n_groups:n_in]
    out_mid_ref, out_last_ref = refs[n_in], refs[n_in + 1]

    h = x_ref[...]                                       # (B*T0, V*C0) f32, BN0 folded
    p = 1
    for (vcin, vcout, stride, res_kind, gidx, is_mid) in meta:
        if res_kind == RES_PROJ:
            w0 = refs[p][...]                            # (vcin, 2*vcout) bf16
            wt = refs[p + 1][...]                        # (t_k*vcout, vcout) bf16
            b_ref = refs[p + 2]
            p += 3
        else:
            slab = refs[p]
            w0 = slab[0:vcin, :]                         # (vcin, vcout) bf16
            wt = slab[vcin:vcin + t_k * vcout, :]        # (t_k*vcout, vcout) bf16
            b_ref = refs[p + 1]
            p += 2
        b_eff, b_t, b_res = b_ref[0:1, :], b_ref[1:2, :], b_ref[2:3, :]
        S_ref = group_refs[gidx]

        # ---- S-GC graph conv (A*M and bn1 folded) [+ residual 1x1 proj, shared LHS] --
        h16 = h.astype(jnp.bfloat16)
        z = jnp.dot(h16, w0, preferred_element_type=jnp.float32)
        if res_kind == RES_PROJ:
            g_pre, r_pre = z[:, :vcout], z[:, vcout:]
        else:
            g_pre, r_pre = z, None
        g16 = jnp.maximum(g_pre + b_eff, 0.0).astype(jnp.bfloat16)      # BN1 + ReLU

        # ---- temporal conv (t_k,1)/stride with zero pad; bn2 folded ------------------
        # Shifted / strided copies come from precomputed 0/1 bf16 matrices (exact).
        taps = []
        for dt in range(t_k):
            if stride == 1 and dt == pad:
                taps.append(g16)                          # identity tap: no matmul
            else:
                taps.append(jnp.dot(S_ref[dt], g16, preferred_element_type=jnp.float32)
                            .astype(jnp.bfloat16))
        if vcout % 128 == 0:
            # lane-aligned: fuse all taps into one (M, t_k*VCout) @ (t_k*VCout, VCout).
            gcat = jnp.concatenate(taps, axis=-1)
            y = jnp.dot(gcat, wt, preferred_element_type=jnp.float32) + b_t
        else:
            # VCout == 64: avoid a misaligned lane concat; accumulate per tap instead.
            y = jnp.dot(taps[0], wt[0:vcout, :], preferred_element_type=jnp.float32) + b_t
            for dt in range(1, t_k):
                y = y + jnp.dot(taps[dt], wt[dt * vcout:(dt + 1) * vcout, :],
                                preferred_element_type=jnp.float32)

        # ---- residual + ReLU (canonical ST-GCN ordering: ReLU after the add) ---------
        if res_kind == RES_ID:
            res = h
        elif res_kind == RES_PROJ:
            # strided 1x1 conv + bn_res: stride == center-tap row selection of r_pre.
            res = jnp.dot(S_ref[pad], r_pre.astype(jnp.bfloat16),
                          preferred_element_type=jnp.float32) + b_res
        else:
            res = 0.0
        h = jnp.maximum(y + res, 0.0)  # TODO(synk): Dropout skipped (eval-mode identity)

        if is_mid:
            out_mid_ref[...] = h
    out_last_ref[...] = h


# --------------------------------------------------------------------------------------
# Parameter folding (eval-mode BN, A*M, stacked temporal taps, fused residual weights)
# --------------------------------------------------------------------------------------

def _fold_bn(bn):
    s = bn['g'] * jax.lax.rsqrt(bn['var'] + EPS)
    return s, bn['b'] - bn['mu'] * s


def _prep_block(p, A, V, t_k, cin, cout, stride, residual, bn0=None):
    """Fold A*M, bn1, bn2 (+bn0 for block 0, +bn_res) into dense kernel weight slabs."""
    K = A.shape[0]
    A_eff = A * p['M']                                               # (K, V, V)

    # Graph conv: Weff[(v,ci),(w,co)] = sum_k A_eff[k,v,w] * W[ci,k,co]; bn1 folded.
    W4 = p['Wsgc'].reshape(cin, K, cout)
    w_eff = jnp.einsum('kvw,ckd->vcwd', A_eff, W4).reshape(V * cin, V * cout)
    b_eff = jnp.einsum('kvw,kd->wd', A_eff, p['bsgc'].reshape(K, cout)).reshape(V * cout)
    s1, t1 = _fold_bn(p['bn1'])
    s1v, t1v = jnp.tile(s1, V), jnp.tile(t1, V)
    w_eff = w_eff * s1v[None, :]
    b_eff = b_eff * s1v + t1v
    if bn0 is not None:                                              # fold BN0 into block 0
        s0, b0 = bn0
        b_eff = b_eff + b0 @ w_eff
        w_eff = w_eff * s0[:, None]

    # Temporal conv + bn2: block-diagonal over vertices, taps stacked along rows.
    s2, t2 = _fold_bn(p['bn2'])
    wt = p['Wt'] * s2[None, None, :]                                 # (t_k, cout, cout)
    b_t = jnp.tile(p['bt'] * s2 + t2, V)
    eye = jnp.eye(V, dtype=jnp.float32)
    wt_bd = jnp.einsum('vw,tio->tviwo', eye, wt).reshape(t_k * V * cout, V * cout)

    b_res = jnp.zeros((V * cout,), jnp.float32)
    if not residual:
        res_kind = RES_NONE
    elif cin == cout and stride == 1:
        res_kind = RES_ID
    else:
        res_kind = RES_PROJ
        sr, tr = _fold_bn(p['bnres'])
        w_r = p['Wres'] * sr[None, :]
        b_res = jnp.tile(p['bres'] * sr + tr, V)
        w_r_bd = jnp.einsum('vw,io->viwo', eye, w_r).reshape(V * cin, V * cout)

    bias_slab = jnp.stack([b_eff, b_t, b_res], axis=0)               # (3, V*cout) f32

    if res_kind == RES_PROJ:
        w0 = jnp.concatenate([w_eff, w_r_bd], axis=1).astype(jnp.bfloat16)
        ins = [w0, wt_bd.astype(jnp.bfloat16), bias_slab]
    else:
        slab = jnp.concatenate([w_eff, wt_bd], axis=0).astype(jnp.bfloat16)
        ins = [slab, bias_slab]
    return ins, res_kind


def _shift_pack(b, t_in, t_out, stride, t_k, pad):
    """0/1 selection matrices S[dt, b*t_out+to, b*t_in+ti] implementing, per sample,
    ti = to*stride + (dt - pad) with zero padding (out-of-range rows stay all-zero)."""
    S = np.zeros((t_k, b * t_out, b * t_in), np.float32)
    for dt in range(t_k):
        off = dt - pad
        for bi in range(b):
            for to in range(t_out):
                ti = to * stride + off
                if 0 <= ti < t_in:
                    S[dt, bi * t_out + to, bi * t_in + ti] = 1.0
    return jnp.asarray(S, dtype=jnp.bfloat16)


def _pick_batch_block(n, target):
    """Largest divisor B of n with B <= target, B even (sublane-aligned T=4 output
    blocks) and, when possible, n // B >= 2 grid steps (keeps both v7x TCs busy)."""
    divs = [d for d in range(1, n + 1) if n % d == 0 and (d % 2 == 0 or d == n)]
    pref = [d for d in divs if d <= target and n // d >= 2]
    if pref:
        return max(pref)
    ok = [d for d in divs if d <= target]
    return max(ok) if ok else n


# --------------------------------------------------------------------------------------
# Forward wrapper (single pallas_call for the whole Feature_extractor)
# --------------------------------------------------------------------------------------

def feature_extractor(x, A, params, *, config, t_k, batch_block=8):
    """Non-STAGCN branch of Feature_extractor.forward. Returns (x_mid, x_last) in NCTV."""
    N, C0, T0, V = x.shape
    assert t_k % 2 == 1, "temporal kernel size must be odd ('same' padding assumption)"
    pad = (t_k - 1) // 2
    B = _pick_batch_block(N, batch_block)    # samples per grid step
    # NOTE: the shift-selection matmul cost grows as (B*T)^2; B<=8 keeps it well below
    # the main matmuls.  For much larger batch blocks switch the stride-1 shifts to
    # pltpu.roll + boundary masks.

    # PyTorch: permute(0,3,1,2).view(N, V*C, T) -> BN1d -> back.  In the (N*T, V*C)
    # slab the BN1d channel index is exactly the flattened (v, c) lane index; BN0 is
    # folded into block 0's weights (see _prep_block).
    x2d = jnp.transpose(x, (0, 2, 3, 1)).reshape(N * T0, V * C0)
    bn0 = _fold_bn(params['bn0'])

    block_inputs, meta = [], []
    group_keys, group_packs = [], []
    T = T0
    t_mid = c_mid = None
    for i, (cin, cout, stride) in enumerate(config):
        ins, res_kind = _prep_block(params['blocks'][i], A, V, t_k, cin, cout, stride,
                                    residual=(i != 0), bn0=bn0 if i == 0 else None)
        block_inputs += ins
        T_out = (T + 2 * pad - t_k) // stride + 1
        key = (T, T_out, stride)
        if key not in group_keys:
            group_keys.append(key)
            group_packs.append(_shift_pack(B, T, T_out, stride, t_k, pad))
        meta.append((V * cin, V * cout, stride, res_kind, group_keys.index(key), i == 4))
        if i == 4:
            t_mid, c_mid = T_out, cout
        T = T_out
    t_last, c_last = T, config[-1][1]

    inputs = [x2d] + block_inputs + group_packs
    n_in, n_groups = len(inputs), len(group_packs)

    def resident_spec(a):                 # weights: constant index_map -> DMA'd once
        zeros = (0,) * a.ndim
        return pl.BlockSpec(a.shape, lambda n: zeros)
    # NOTE: resident weights total ~3 MB; default double-buffering of these blocks is
    # immaterial next to the 32 MiB VMEM budget, so pipeline_mode tuning is skipped.

    in_specs = [pl.BlockSpec((B * T0, V * C0), lambda n: (n, 0))]
    in_specs += [resident_spec(a) for a in inputs[1:]]
    out_specs = (pl.BlockSpec((B * t_mid, V * c_mid), lambda n: (n, 0)),
                 pl.BlockSpec((B * t_last, V * c_last), lambda n: (n, 0)))
    out_shape = (jax.ShapeDtypeStruct((N * t_mid, V * c_mid), jnp.float32),
                 jax.ShapeDtypeStruct((N * t_last, V * c_last), jnp.float32))

    out_mid, out_last = pl.pallas_call(
        functools.partial(fused_stgcn_kernel, meta=tuple(meta), n_in=n_in,
                          n_groups=n_groups, t_k=t_k, pad=pad),
        grid=(N // B,),
        in_specs=in_specs,
        out_specs=out_specs,
        out_shape=out_shape,
        compiler_params=pltpu.CompilerParams(
            dimension_semantics=("parallel",),       # v7x: 2 TCs split the batch blocks
            vmem_limit_bytes=32 * 1024 * 1024),      # headroom vs v7x's 64 MiB VMEM
    )(*inputs)

    x_mid = out_mid.reshape(N, t_mid, V, c_mid).transpose(0, 3, 1, 2)
    x_last = out_last.reshape(N, t_last, V, c_last).transpose(0, 3, 1, 2)
    return x_mid, x_last


# --------------------------------------------------------------------------------------
# Deterministic parameter initialization (same structure as the PyTorch module)
# --------------------------------------------------------------------------------------

def _init_bn(c):
    return dict(g=jnp.ones((c,), jnp.float32), b=jnp.zeros((c,), jnp.float32),
                mu=jnp.zeros((c,), jnp.float32), var=jnp.ones((c,), jnp.float32))


def _normal(key, shape, scale=0.1):
    return scale * jax.random.normal(key, shape, dtype=jnp.float32)


def init_block(key, cin, cout, stride, K, V, t_k, residual):
    ks = jax.random.split(key, 6)
    p = dict(
        Wsgc=_normal(ks[0], (cin, K * cout)),
        bsgc=_normal(ks[1], (K * cout,)),
        M=jnp.ones((K, V, V), jnp.float32),
        bn1=_init_bn(cout),
        Wt=_normal(ks[2], (t_k, cout, cout)),
        bt=_normal(ks[3], (cout,)),
        bn2=_init_bn(cout),
    )
    if residual and (cin != cout or stride != 1):
        p['Wres'] = _normal(ks[4], (cin, cout))
        p['bres'] = _normal(ks[5], (cout,))
        p['bnres'] = _init_bn(cout)
    return p


def init_params(key, config, K, V, t_k):
    c0 = config[0][0]
    keys = jax.random.split(key, len(config))
    blocks = [init_block(keys[i], cin, cout, stride, K, V, t_k, residual=(i != 0))
              for i, (cin, cout, stride) in enumerate(config)]
    return dict(bn0=_init_bn(c0 * V), blocks=blocks)


# --------------------------------------------------------------------------------------

if __name__ == "__main__":
    N, C, T, V = 8, 4, 16, 8          # x is (N, C, T, V); N=8 -> B=4, grid=(2,)
    K, t_k = 3, 3                     # s_kernel_size=3 (A_size=(3,V,V)), t_kernel_size=3
    config = [
        (4, 8, 1), (8, 8, 1), (8, 8, 1), (8, 16, 2), (16, 16, 1),
        (16, 16, 1), (16, 32, 2), (32, 32, 1), (32, 32, 1), (32, 32, 1),
    ]

    key = jax.random.PRNGKey(0)
    kx, ka, kp = jax.random.split(key, 3)
    x = jax.random.normal(kx, (N, C, T, V), dtype=jnp.float32)
    A = jax.random.uniform(ka, (K, V, V), dtype=jnp.float32)
    params = init_params(kp, config, K, V, t_k)

    fwd = jax.jit(functools.partial(feature_extractor, config=config, t_k=t_k))
    x_mid, x_last = fwd(x, A, params)
    jax.block_until_ready((x_mid, x_last))

    assert x_mid.shape == (N, 16, 8, V), x_mid.shape     # after blocks 0..4 (one stride-2)
    assert x_last.shape == (N, 32, 4, V), x_last.shape   # after blocks 5..9 (another stride-2)
    assert bool(jnp.all(jnp.isfinite(x_mid))) and bool(jnp.all(jnp.isfinite(x_last)))
    print("KERNEL_OK")
</pallas_src>

<mosaic_0001>
module attributes {stable_mosaic.version = 11 : i64} {
  func.func @fused_stgcn_kernel(%arg0: i32, %arg1: memref<64x32xf32, #tpu.memory_space<vmem>>, %arg2: memref<224x64xbf16, #tpu.memory_space<vmem>>, %arg3: memref<3x64xf32, #tpu.memory_space<vmem>>, %arg4: memref<256x64xbf16, #tpu.memory_space<vmem>>, %arg5: memref<3x64xf32, #tpu.memory_space<vmem>>, %arg6: memref<256x64xbf16, #tpu.memory_space<vmem>>, %arg7: memref<3x64xf32, #tpu.memory_space<vmem>>, %arg8: memref<64x256xbf16, #tpu.memory_space<vmem>>, %arg9: memref<384x128xbf16, #tpu.memory_space<vmem>>, %arg10: memref<3x128xf32, #tpu.memory_space<vmem>>, %arg11: memref<512x128xbf16, #tpu.memory_space<vmem>>, %arg12: memref<3x128xf32, #tpu.memory_space<vmem>>, %arg13: memref<512x128xbf16, #tpu.memory_space<vmem>>, %arg14: memref<3x128xf32, #tpu.memory_space<vmem>>, %arg15: memref<128x512xbf16, #tpu.memory_space<vmem>>, %arg16: memref<768x256xbf16, #tpu.memory_space<vmem>>, %arg17: memref<3x256xf32, #tpu.memory_space<vmem>>, %arg18: memref<1024x256xbf16, #tpu.memory_space<vmem>>, %arg19: memref<3x256xf32, #tpu.memory_space<vmem>>, %arg20: memref<1024x256xbf16, #tpu.memory_space<vmem>>, %arg21: memref<3x256xf32, #tpu.memory_space<vmem>>, %arg22: memref<1024x256xbf16, #tpu.memory_space<vmem>>, %arg23: memref<3x256xf32, #tpu.memory_space<vmem>>, %arg24: memref<3x64x64xbf16, #tpu.memory_space<vmem>>, %arg25: memref<3x32x64xbf16, #tpu.memory_space<vmem>>, %arg26: memref<3x32x32xbf16, #tpu.memory_space<vmem>>, %arg27: memref<3x16x32xbf16, #tpu.memory_space<vmem>>, %arg28: memref<3x16x16xbf16, #tpu.memory_space<vmem>>, %arg29: memref<32x128xf32, #tpu.memory_space<vmem>>, %arg30: memref<16x256xf32, #tpu.memory_space<vmem>>) attributes {dimension_semantics = [#tpu.dimension_semantics<parallel>], iteration_bounds = array<i64: 2>, scalar_prefetch = 0 : i64, scratch_operands = 0 : i64, tpu.core_type = #tpu.core_type<tc>, window_params = [{transform_indices = @transform_0, window_bounds = array<i64: 64, 32>}, {pipeline_mode = #tpu.pipeline_mode<synchronous>, transform_indices = @transform_1, window_bounds = array<i64: 224, 64>}, {pipeline_mode = #tpu.pipeline_mode<synchronous>, transform_indices = @transform_2, window_bounds = array<i64: 3, 64>}, {pipeline_mode = #tpu.pipeline_mode<synchronous>, transform_indices = @transform_3, window_bounds = array<i64: 256, 64>}, {pipeline_mode = #tpu.pipeline_mode<synchronous>, transform_indices = @transform_4, window_bounds = array<i64: 3, 64>}, {pipeline_mode = #tpu.pipeline_mode<synchronous>, transform_indices = @transform_5, window_bounds = array<i64: 256, 64>}, {pipeline_mode = #tpu.pipeline_mode<synchronous>, transform_indices = @transform_6, window_bounds = array<i64: 3, 64>}, {pipeline_mode = #tpu.pipeline_mode<synchronous>, transform_indices = @transform_7, window_bounds = array<i64: 64, 256>}, {pipeline_mode = #tpu.pipeline_mode<synchronous>, transform_indices = @transform_8, window_bounds = array<i64: 384, 128>}, {pipeline_mode = #tpu.pipeline_mode<synchronous>, transform_indices = @transform_9, window_bounds = array<i64: 3, 128>}, {pipeline_mode = #tpu.pipeline_mode<synchronous>, transform_indices = @transform_10, window_bounds = array<i64: 512, 128>}, {pipeline_mode = #tpu.pipeline_mode<synchronous>, transform_indices = @transform_11, window_bounds = array<i64: 3, 128>}, {pipeline_mode = #tpu.pipeline_mode<synchronous>, transform_indices = @transform_12, window_bounds = array<i64: 512, 128>}, {pipeline_mode = #tpu.pipeline_mode<synchronous>, transform_indices = @transform_13, window_bounds = array<i64: 3, 128>}, {pipeline_mode = #tpu.pipeline_mode<synchronous>, transform_indices = @transform_14, window_bounds = array<i64: 128, 512>}, {pipeline_mode = #tpu.pipeline_mode<synchronous>, transform_indices = @transform_15, window_bounds = array<i64: 768, 256>}, {pipeline_mode = #tpu.pipeline_mode<synchronous>, transform_indices = @transform_16, window_bounds = array<i64: 3, 256>}, {pipeline_mode = #tpu.pipeline_mode<synchronous>, transform_indices = @transform_17, window_bounds = array<i64: 1024, 256>}, {pipeline_mode = #tpu.pipeline_mode<synchronous>, transform_indices = @transform_18, window_bounds = array<i64: 3, 256>}, {pipeline_mode = #tpu.pipeline_mode<synchronous>, transform_indices = @transform_19, window_bounds = array<i64: 1024, 256>}, {pipeline_mode = #tpu.pipeline_mode<synchronous>, transform_indices = @transform_20, window_bounds = array<i64: 3, 256>}, {pipeline_mode = #tpu.pipeline_mode<synchronous>, transform_indices = @transform_21, window_bounds = array<i64: 1024, 256>}, {pipeline_mode = #tpu.pipeline_mode<synchronous>, transform_indices = @transform_22, window_bounds = array<i64: 3, 256>}, {pipeline_mode = #tpu.pipeline_mode<synchronous>, transform_indices = @transform_23, window_bounds = array<i64: 3, 64, 64>}, {pipeline_mode = #tpu.pipeline_mode<synchronous>, transform_indices = @transform_24, window_bounds = array<i64: 3, 32, 64>}, {pipeline_mode = #tpu.pipeline_mode<synchronous>, transform_indices = @transform_25, window_bounds = array<i64: 3, 32, 32>}, {pipeline_mode = #tpu.pipeline_mode<synchronous>, transform_indices = @transform_26, window_bounds = array<i64: 3, 16, 32>}, {pipeline_mode = #tpu.pipeline_mode<synchronous>, transform_indices = @transform_27, window_bounds = array<i64: 3, 16, 16>}, {transform_indices = @transform_28, window_bounds = array<i64: 32, 128>}, {transform_indices = @transform_29, window_bounds = array<i64: 16, 256>}]} {
    %c0 = arith.constant 0 : index
    %c0_0 = arith.constant 0 : index
    %0 = vector.load %arg1[%c0, %c0_0] : memref<64x32xf32, #tpu.memory_space<vmem>>, vector<64x32xf32>
    %c0_1 = arith.constant 0 : index
    %c0_2 = arith.constant 0 : index
    %1 = vector.load %arg2[%c0_1, %c0_2] : memref<224x64xbf16, #tpu.memory_space<vmem>>, vector<32x64xbf16>
    %c32 = arith.constant 32 : index
    %c0_3 = arith.constant 0 : index
    %2 = vector.load %arg2[%c32, %c0_3] : memref<224x64xbf16, #tpu.memory_space<vmem>>, vector<192x64xbf16>
    %c0_4 = arith.constant 0 : index
    %c0_5 = arith.constant 0 : index
    %3 = vector.load %arg3[%c0_4, %c0_5] : memref<3x64xf32, #tpu.memory_space<vmem>>, vector<1x64xf32>
    %c1 = arith.constant 1 : index
    %c0_6 = arith.constant 0 : index
    %4 = vector.load %arg3[%c1, %c0_6] : memref<3x64xf32, #tpu.memory_space<vmem>>, vector<1x64xf32>
    %5 = arith.truncf %0 : vector<64x32xf32> to vector<64x32xbf16>
    %cst = arith.constant dense<0.000000e+00> : vector<64x64xf32>
    %6 = tpu.matmul %5, %1, %cst {dimension_numbers = #tpu.dot_dimension_numbers<[1], [0], [0], [1], [0, 0, 1, 1], [], []>} : vector<64x32xbf16>, vector<32x64xbf16>, vector<64x64xf32> -> vector<64x64xf32>
    %7 = vector.broadcast %3 : vector<1x64xf32> to vector<64x64xf32>
    %8 = arith.addf %6, %7 : vector<64x64xf32>
    %cst_7 = arith.constant 0.000000e+00 : f32
    %9 = vector.broadcast %cst_7 : f32 to vector<64x64xf32>
    %10 = arith.maximumf %8, %9 : vector<64x64xf32>
    %11 = arith.truncf %10 : vector<64x64xf32> to vector<64x64xbf16>
    %c0_8 = arith.constant 0 : index
    %c0_9 = arith.constant 0 : index
    %c0_10 = arith.constant 0 : index
    %12 = vector.load %arg24[%c0_8, %c0_9, %c0_10] : memref<3x64x64xbf16, #tpu.memory_space<vmem>>, vector<1x64x64xbf16>
    %13 = vector.shape_cast %12 : vector<1x64x64xbf16> to vector<64x64xbf16>
    %cst_11 = arith.constant dense<0.000000e+00> : vector<64x64xf32>
    %14 = tpu.matmul %13, %11, %cst_11 {dimension_numbers = #tpu.dot_dimension_numbers<[1], [0], [0], [1], [0, 0, 1, 1], [], []>} : vector<64x64xbf16>, vector<64x64xbf16>, vector<64x64xf32> -> vector<64x64xf32>
    %15 = arith.truncf %14 : vector<64x64xf32> to vector<64x64xbf16>
    %c2 = arith.constant 2 : index
    %c0_12 = arith.constant 0 : index
    %c0_13 = arith.constant 0 : index
    %16 = vector.load %arg24[%c2, %c0_12, %c0_13] : memref<3x64x64xbf16, #tpu.memory_space<vmem>>, vector<1x64x64xbf16>
    %17 = vector.shape_cast %16 : vector<1x64x64xbf16> to vector<64x64xbf16>
    %cst_14 = arith.constant dense<0.000000e+00> : vector<64x64xf32>
    %18 = tpu.matmul %17, %11, %cst_14 {dimension_numbers = #tpu.dot_dimension_numbers<[1], [0], [0], [1], [0, 0, 1, 1], [], []>} : vector<64x64xbf16>, vector<64x64xbf16>, vector<64x64xf32> -> vector<64x64xf32>
    %19 = arith.truncf %18 : vector<64x64xf32> to vector<64x64xbf16>
    %20 = vector.extract_strided_slice %2 {offsets = [0, 0], sizes = [64, 64], strides = [1, 1]} : vector<192x64xbf16> to vector<64x64xbf16>
    %cst_15 = arith.constant dense<0.000000e+00> : vector<64x64xf32>
    %21 = tpu.matmul %15, %20, %cst_15 {dimension_numbers = #tpu.dot_dimension_numbers<[1], [0], [0], [1], [0, 0, 1, 1], [], []>} : vector<64x64xbf16>, vector<64x64xbf16>, vector<64x64xf32> -> vector<64x64xf32>
    %22 = vector.broadcast %4 : vector<1x64xf32> to vector<64x64xf32>
    %23 = arith.addf %21, %22 : vector<64x64xf32>
    %24 = vector.extract_strided_slice %2 {offsets = [64, 0], sizes = [64, 64], strides = [1, 1]} : vector<192x64xbf16> to vector<64x64xbf16>
    %cst_16 = arith.constant dense<0.000000e+00> : vector<64x64xf32>
    %25 = tpu.matmul %11, %24, %cst_16 {dimension_numbers = #tpu.dot_dimension_numbers<[1], [0], [0], [1], [0, 0, 1, 1], [], []>} : vector<64x64xbf16>, vector<64x64xbf16>, vector<64x64xf32> -> vector<64x64xf32>
    %26 = arith.addf %23, %25 : vector<64x64xf32>
    %27 = vector.extract_strided_slice %2 {offsets = [128, 0], sizes = [64, 64], strides = [1, 1]} : vector<192x64xbf16> to vector<64x64xbf16>
    %cst_17 = arith.constant dense<0.000000e+00> : vector<64x64xf32>
    %28 = tpu.matmul %19, %27, %cst_17 {dimension_numbers = #tpu.dot_dimension_numbers<[1], [0], [0], [1], [0, 0, 1, 1], [], []>} : vector<64x64xbf16>, vector<64x64xbf16>, vector<64x64xf32> -> vector<64x64xf32>
    %29 = arith.addf %26, %28 : vector<64x64xf32>
    %cst_18 = arith.constant 0.000000e+00 : f32
    %30 = vector.broadcast %cst_18 : f32 to vector<64x64xf32>
    %31 = arith.addf %29, %30 : vector<64x64xf32>
    %cst_19 = arith.constant 0.000000e+00 : f32
    %32 = vector.broadcast %cst_19 : f32 to vector<64x64xf32>
    %33 = arith.maximumf %31, %32 : vector<64x64xf32>
    %c0_20 = arith.constant 0 : index
    %c0_21 = arith.constant 0 : index
    %34 = vector.load %arg4[%c0_20, %c0_21] : memref<256x64xbf16, #tpu.memory_space<vmem>>, vector<64x64xbf16>
    %c64 = arith.constant 64 : index
    %c0_22 = arith.constant 0 : index
    %35 = vector.load %arg4[%c64, %c0_22] : memref<256x64xbf16, #tpu.memory_space<vmem>>, vector<192x64xbf16>
    %c0_23 = arith.constant 0 : index
    %c0_24 = arith.constant 0 : index
    %36 = vector.load %arg5[%c0_23, %c0_24] : memref<3x64xf32, #tpu.memory_space<vmem>>, vector<1x64xf32>
    %c1_25 = arith.constant 1 : index
    %c0_26 = arith.constant 0 : index
    %37 = vector.load %arg5[%c1_25, %c0_26] : memref<3x64xf32, #tpu.memory_space<vmem>>, vector<1x64xf32>
    %38 = arith.truncf %33 : vector<64x64xf32> to vector<64x64xbf16>
    %cst_27 = arith.constant dense<0.000000e+00> : vector<64x64xf32>
    %39 = tpu.matmul %38, %34, %cst_27 {dimension_numbers = #tpu.dot_dimension_numbers<[1], [0], [0], [1], [0, 0, 1, 1], [], []>} : vector<64x64xbf16>, vector<64x64xbf16>, vector<64x64xf32> -> vector<64x64xf32>
    %40 = vector.broadcast %36 : vector<1x64xf32> to vector<64x64xf32>
    %41 = arith.addf %39, %40 : vector<64x64xf32>
    %cst_28 = arith.constant 0.000000e+00 : f32
    %42 = vector.broadcast %cst_28 : f32 to vector<64x64xf32>
    %43 = arith.maximumf %41, %42 : vector<64x64xf32>
    %44 = arith.truncf %43 : vector<64x64xf32> to vector<64x64xbf16>
    %c0_29 = arith.constant 0 : index
    %c0_30 = arith.constant 0 : index
    %c0_31 = arith.constant 0 : index
    %45 = vector.load %arg24[%c0_29, %c0_30, %c0_31] : memref<3x64x64xbf16, #tpu.memory_space<vmem>>, vector<1x64x64xbf16>
    %46 = vector.shape_cast %45 : vector<1x64x64xbf16> to vector<64x64xbf16>
    %cst_32 = arith.constant dense<0.000000e+00> : vector<64x64xf32>
    %47 = tpu.matmul %46, %44, %cst_32 {dimension_numbers = #tpu.dot_dimension_numbers<[1], [0], [0], [1], [0, 0, 1, 1], [], []>} : vector<64x64xbf16>, vector<64x64xbf16>, vector<64x64xf32> -> vector<64x64xf32>
    %48 = arith.truncf %47 : vector<64x64xf32> to vector<64x64xbf16>
    %c2_33 = arith.constant 2 : index
    %c0_34 = arith.constant 0 : index
    %c0_35 = arith.constant 0 : index
    %49 = vector.load %arg24[%c2_33, %c0_34, %c0_35] : memref<3x64x64xbf16, #tpu.memory_space<vmem>>, vector<1x64x64xbf16>
    %50 = vector.shape_cast %49 : vector<1x64x64xbf16> to vector<64x64xbf16>
    %cst_36 = arith.constant dense<0.000000e+00> : vector<64x64xf32>
    %51 = tpu.matmul %50, %44, %cst_36 {dimension_numbers = #tpu.dot_dimension_numbers<[1], [0], [0], [1], [0, 0, 1, 1], [], []>} : vector<64x64xbf16>, vector<64x64xbf16>, vector<64x64xf32> -> vector<64x64xf32>
    %52 = arith.truncf %51 : vector<64x64xf32> to vector<64x64xbf16>
    %53 = vector.extract_strided_slice %35 {offsets = [0, 0], sizes = [64, 64], strides = [1, 1]} : vector<192x64xbf16> to vector<64x64xbf16>
    %cst_37 = arith.constant dense<0.000000e+00> : vector<64x64xf32>
    %54 = tpu.matmul %48, %53, %cst_37 {dimension_numbers = #tpu.dot_dimension_numbers<[1], [0], [0], [1], [0, 0, 1, 1], [], []>} : vector<64x64xbf16>, vector<64x64xbf16>, vector<64x64xf32> -> vector<64x64xf32>
    %55 = vector.broadcast %37 : vector<1x64xf32> to vector<64x64xf32>
    %56 = arith.addf %54, %55 : vector<64x64xf32>
    %57 = vector.extract_strided_slice %35 {offsets = [64, 0], sizes = [64, 64], strides = [1, 1]} : vector<192x64xbf16> to vector<64x64xbf16>
    %cst_38 = arith.constant dense<0.000000e+00> : vector<64x64xf32>
    %58 = tpu.matmul %44, %57, %cst_38 {dimension_numbers = #tpu.dot_dimension_numbers<[1], [0], [0], [1], [0, 0, 1, 1], [], []>} : vector<64x64xbf16>, vector<64x64xbf16>, vector<64x64xf32> -> vector<64x64xf32>
    %59 = arith.addf %56, %58 : vector<64x64xf32>
    %60 = vector.extract_strided_slice %35 {offsets = [128, 0], sizes = [64, 64], strides = [1, 1]} : vector<192x64xbf16> to vector<64x64xbf16>
    %cst_39 = arith.constant dense<0.000000e+00> : vector<64x64xf32>
    %61 = tpu.matmul %52, %60, %cst_39 {dimension_numbers = #tpu.dot_dimension_numbers<[1], [0], [0], [1], [0, 0, 1, 1], [], []>} : vector<64x64xbf16>, vector<64x64xbf16>, vector<64x64xf32> -> vector<64x64xf32>
    %62 = arith.addf %59, %61 : vector<64x64xf32>
    %63 = arith.addf %62, %33 : vector<64x64xf32>
    %cst_40 = arith.constant 0.000000e+00 : f32
    %64 = vector.broadcast %cst_40 : f32 to vector<64x64xf32>
    %65 = arith.maximumf %63, %64 : vector<64x64xf32>
    %c0_41 = arith.constant 0 : index
    %c0_42 = arith.constant 0 : index
    %66 = vector.load %arg6[%c0_41, %c0_42] : memref<256x64xbf16, #tpu.memory_space<vmem>>, vector<64x64xbf16>
    %c64_43 = arith.constant 64 : index
    %c0_44 = arith.constant 0 : index
    %67 = vector.load %arg6[%c64_43, %c0_44] : memref<256x64xbf16, #tpu.memory_space<vmem>>, vector<192x64xbf16>
    %c0_45 = arith.constant 0 : index
    %c0_46 = arith.constant 0 : index
    %68 = vector.load %arg7[%c0_45, %c0_46] : memref<3x64xf32, #tpu.memory_space<vmem>>, vector<1x64xf32>
    %c1_47 = arith.constant 1 : index
    %c0_48 = arith.constant 0 : index
    %69 = vector.load %arg7[%c1_47, %c0_48] : memref<3x64xf32, #tpu.memory_space<vmem>>, vector<1x64xf32>
    %70 = arith.truncf %65 : vector<64x64xf32> to vector<64x64xbf16>
    %cst_49 = arith.constant dense<0.000000e+00> : vector<64x64xf32>
    %71 = tpu.matmul %70, %66, %cst_49 {dimension_numbers = #tpu.dot_dimension_numbers<[1], [0], [0], [1], [0, 0, 1, 1], [], []>} : vector<64x64xbf16>, vector<64x64xbf16>, vector<64x64xf32> -> vector<64x64xf32>
    %72 = vector.broadcast %68 : vector<1x64xf32> to vector<64x64xf32>
    %73 = arith.addf %71, %72 : vector<64x64xf32>
    %cst_50 = arith.constant 0.000000e+00 : f32
    %74 = vector.broadcast %cst_50 : f32 to vector<64x64xf32>
    %75 = arith.maximumf %73, %74 : vector<64x64xf32>
    %76 = arith.truncf %75 : vector<64x64xf32> to vector<64x64xbf16>
    %c0_51 = arith.constant 0 : index
    %c0_52 = arith.constant 0 : index
    %c0_53 = arith.constant 0 : index
    %77 = vector.load %arg24[%c0_51, %c0_52, %c0_53] : memref<3x64x64xbf16, #tpu.memory_space<vmem>>, vector<1x64x64xbf16>
    %78 = vector.shape_cast %77 : vector<1x64x64xbf16> to vector<64x64xbf16>
    %cst_54 = arith.constant dense<0.000000e+00> : vector<64x64xf32>
    %79 = tpu.matmul %78, %76, %cst_54 {dimension_numbers = #tpu.dot_dimension_numbers<[1], [0], [0], [1], [0, 0, 1, 1], [], []>} : vector<64x64xbf16>, vector<64x64xbf16>, vector<64x64xf32> -> vector<64x64xf32>
    %80 = arith.truncf %79 : vector<64x64xf32> to vector<64x64xbf16>
    %c2_55 = arith.constant 2 : index
    %c0_56 = arith.constant 0 : index
    %c0_57 = arith.constant 0 : index
    %81 = vector.load %arg24[%c2_55, %c0_56, %c0_57] : memref<3x64x64xbf16, #tpu.memory_space<vmem>>, vector<1x64x64xbf16>
    %82 = vector.shape_cast %81 : vector<1x64x64xbf16> to vector<64x64xbf16>
    %cst_58 = arith.constant dense<0.000000e+00> : vector<64x64xf32>
    %83 = tpu.matmul %82, %76, %cst_58 {dimension_numbers = #tpu.dot_dimension_numbers<[1], [0], [0], [1], [0, 0, 1, 1], [], []>} : vector<64x64xbf16>, vector<64x64xbf16>, vector<64x64xf32> -> vector<64x64xf32>
    %84 = arith.truncf %83 : vector<64x64xf32> to vector<64x64xbf16>
    %85 = vector.extract_strided_slice %67 {offsets = [0, 0], sizes = [64, 64], strides = [1, 1]} : vector<192x64xbf16> to vector<64x64xbf16>
    %cst_59 = arith.constant dense<0.000000e+00> : vector<64x64xf32>
    %86 = tpu.matmul %80, %85, %cst_59 {dimension_numbers = #tpu.dot_dimension_numbers<[1], [0], [0], [1], [0, 0, 1, 1], [], []>} : vector<64x64xbf16>, vector<64x64xbf16>, vector<64x64xf32> -> vector<64x64xf32>
    %87 = vector.broadcast %69 : vector<1x64xf32> to vector<64x64xf32>
    %88 = arith.addf %86, %87 : vector<64x64xf32>
    %89 = vector.extract_strided_slice %67 {offsets = [64, 0], sizes = [64, 64], strides = [1, 1]} : vector<192x64xbf16> to vector<64x64xbf16>
    %cst_60 = arith.constant dense<0.000000e+00> : vector<64x64xf32>
    %90 = tpu.matmul %76, %89, %cst_60 {dimension_numbers = #tpu.dot_dimension_numbers<[1], [0], [0], [1], [0, 0, 1, 1], [], []>} : vector<64x64xbf16>, vector<64x64xbf16>, vector<64x64xf32> -> vector<64x64xf32>
    %91 = arith.addf %88, %90 : vector<64x64xf32>
    %92 = vector.extract_strided_slice %67 {offsets = [128, 0], sizes = [64, 64], strides = [1, 1]} : vector<192x64xbf16> to vector<64x64xbf16>
    %cst_61 = arith.constant dense<0.000000e+00> : vector<64x64xf32>
    %93 = tpu.matmul %84, %92, %cst_61 {dimension_numbers = #tpu.dot_dimension_numbers<[1], [0], [0], [1], [0, 0, 1, 1], [], []>} : vector<64x64xbf16>, vector<64x64xbf16>, vector<64x64xf32> -> vector<64x64xf32>
    %94 = arith.addf %91, %93 : vector<64x64xf32>
    %95 = arith.addf %94, %65 : vector<64x64xf32>
    %cst_62 = arith.constant 0.000000e+00 : f32
    %96 = vector.broadcast %cst_62 : f32 to vector<64x64xf32>
    %97 = arith.maximumf %95, %96 : vector<64x64xf32>
    %c0_63 = arith.constant 0 : index
    %c0_64 = arith.constant 0 : index
    %98 = vector.load %arg8[%c0_63, %c0_64] : memref<64x256xbf16, #tpu.memory_space<vmem>>, vector<64x256xbf16>
    %c0_65 = arith.constant 0 : index
    %c0_66 = arith.constant 0 : index
    %99 = vector.load %arg9[%c0_65, %c0_66] : memref<384x128xbf16, #tpu.memory_space<vmem>>, vector<384x128xbf16>
    %c0_67 = arith.constant 0 : index
    %c0_68 = arith.constant 0 : index
    %100 = vector.load %arg10[%c0_67, %c0_68] : memref<3x128xf32, #tpu.memory_space<vmem>>, vector<1x128xf32>
    %c1_69 = arith.constant 1 : index
    %c0_70 = arith.constant 0 : index
    %101 = vector.load %arg10[%c1_69, %c0_70] : memref<3x128xf32, #tpu.memory_space<vmem>>, vector<1x128xf32>
    %c2_71 = arith.constant 2 : index
    %c0_72 = arith.constant 0 : index
    %102 = vector.load %arg10[%c2_71, %c0_72] : memref<3x128xf32, #tpu.memory_space<vmem>>, vector<1x128xf32>
    %103 = arith.truncf %97 : vector<64x64xf32> to vector<64x64xbf16>
    %cst_73 = arith.constant dense<0.000000e+00> : vector<64x256xf32>
    %104 = tpu.matmul %103, %98, %cst_73 {dimension_numbers = #tpu.dot_dimension_numbers<[1], [0], [0], [1], [0, 0, 1, 1], [], []>} : vector<64x64xbf16>, vector<64x256xbf16>, vector<64x256xf32> -> vector<64x256xf32>
    %105 = vector.extract_strided_slice %104 {offsets = [0, 0], sizes = [64, 128], strides = [1, 1]} : vector<64x256xf32> to vector<64x128xf32>
    %106 = vector.extract_strided_slice %104 {offsets = [0, 128], sizes = [64, 128], strides = [1, 1]} : vector<64x256xf32> to vector<64x128xf32>
    %107 = vector.broadcast %100 : vector<1x128xf32> to vector<64x128xf32>
    %108 = arith.addf %105, %107 : vector<64x128xf32>
    %cst_74 = arith.constant 0.000000e+00 : f32
    %109 = vector.broadcast %cst_74 : f32 to vector<64x128xf32>
    %110 = arith.maximumf %108, %109 : vector<64x128xf32>
    %111 = arith.truncf %110 : vector<64x128xf32> to vector<64x128xbf16>
    %c0_75 = arith.constant 0 : index
    %c0_76 = arith.constant 0 : index
    %c0_77 = arith.constant 0 : index
    %112 = vector.load %arg25[%c0_75, %c0_76, %c0_77] : memref<3x32x64xbf16, #tpu.memory_space<vmem>>, vector<1x32x64xbf16>
    %113 = vector.shape_cast %112 : vector<1x32x64xbf16> to vector<32x64xbf16>
    %cst_78 = arith.constant dense<0.000000e+00> : vector<32x128xf32>
    %114 = tpu.matmul %113, %111, %cst_78 {dimension_numbers = #tpu.dot_dimension_numbers<[1], [0], [0], [1], [0, 0, 1, 1], [], []>} : vector<32x64xbf16>, vector<64x128xbf16>, vector<32x128xf32> -> vector<32x128xf32>
    %115 = arith.truncf %114 : vector<32x128xf32> to vector<32x128xbf16>
    %c1_79 = arith.constant 1 : index
    %c0_80 = arith.constant 0 : index
    %c0_81 = arith.constant 0 : index
    %116 = vector.load %arg25[%c1_79, %c0_80, %c0_81] : memref<3x32x64xbf16, #tpu.memory_space<vmem>>, vector<1x32x64xbf16>
    %117 = vector.shape_cast %116 : vector<1x32x64xbf16> to vector<32x64xbf16>
    %cst_82 = arith.constant dense<0.000000e+00> : vector<32x128xf32>
    %118 = tpu.matmul %117, %111, %cst_82 {dimension_numbers = #tpu.dot_dimension_numbers<[1], [0], [0], [1], [0, 0, 1, 1], [], []>} : vector<32x64xbf16>, vector<64x128xbf16>, vector<32x128xf32> -> vector<32x128xf32>
    %119 = arith.truncf %118 : vector<32x128xf32> to vector<32x128xbf16>
    %c2_83 = arith.constant 2 : index
    %c0_84 = arith.constant 0 : index
    %c0_85 = arith.constant 0 : index
    %120 = vector.load %arg25[%c2_83, %c0_84, %c0_85] : memref<3x32x64xbf16, #tpu.memory_space<vmem>>, vector<1x32x64xbf16>
    %121 = vector.shape_cast %120 : vector<1x32x64xbf16> to vector<32x64xbf16>
    %cst_86 = arith.constant dense<0.000000e+00> : vector<32x128xf32>
    %122 = tpu.matmul %121, %111, %cst_86 {dimension_numbers = #tpu.dot_dimension_numbers<[1], [0], [0], [1], [0, 0, 1, 1], [], []>} : vector<32x64xbf16>, vector<64x128xbf16>, vector<32x128xf32> -> vector<32x128xf32>
    %123 = arith.truncf %122 : vector<32x128xf32> to vector<32x128xbf16>
    %124 = tpu.concatenate %115, %119, %123 in 1 : vector<32x128xbf16>, vector<32x128xbf16>, vector<32x128xbf16> -> vector<32x384xbf16>
    %cst_87 = arith.constant dense<0.000000e+00> : vector<32x128xf32>
    %125 = tpu.matmul %124, %99, %cst_87 {dimension_numbers = #tpu.dot_dimension_numbers<[1], [0], [0], [1], [0, 0, 1, 1], [], []>} : vector<32x384xbf16>, vector<384x128xbf16>, vector<32x128xf32> -> vector<32x128xf32>
    %126 = vector.broadcast %101 : vector<1x128xf32> to vector<32x128xf32>
    %127 = arith.addf %125, %126 : vector<32x128xf32>
    %c1_88 = arith.constant 1 : index
    %c0_89 = arith.constant 0 : index
    %c0_90 = arith.constant 0 : index
    %128 = vector.load %arg25[%c1_88, %c0_89, %c0_90] : memref<3x32x64xbf16, #tpu.memory_space<vmem>>, vector<1x32x64xbf16>
    %129 = vector.shape_cast %128 : vector<1x32x64xbf16> to vector<32x64xbf16>
    %130 = arith.truncf %106 : vector<64x128xf32> to vector<64x128xbf16>
    %cst_91 = arith.constant dense<0.000000e+00> : vector<32x128xf32>
    %131 = tpu.matmul %129, %130, %cst_91 {dimension_numbers = #tpu.dot_dimension_numbers<[1], [0], [0], [1], [0, 0, 1, 1], [], []>} : vector<32x64xbf16>, vector<64x128xbf16>, vector<32x128xf32> -> vector<32x128xf32>
    %132 = vector.broadcast %102 : vector<1x128xf32> to vector<32x128xf32>
    %133 = arith.addf %131, %132 : vector<32x128xf32>
    %134 = arith.addf %127, %133 : vector<32x128xf32>
    %cst_92 = arith.constant 0.000000e+00 : f32
    %135 = vector.broadcast %cst_92 : f32 to vector<32x128xf32>
    %136 = arith.maximumf %134, %135 : vector<32x128xf32>
    %c0_93 = arith.constant 0 : index
    %c0_94 = arith.constant 0 : index
    %137 = vector.load %arg11[%c0_93, %c0_94] : memref<512x128xbf16, #tpu.memory_space<vmem>>, vector<128x128xbf16>
    %c128 = arith.constant 128 : index
    %c0_95 = arith.constant 0 : index
    %138 = vector.load %arg11[%c128, %c0_95] : memref<512x128xbf16, #tpu.memory_space<vmem>>, vector<384x128xbf16>
    %c0_96 = arith.constant 0 : index
    %c0_97 = arith.constant 0 : index
    %139 = vector.load %arg12[%c0_96, %c0_97] : memref<3x128xf32, #tpu.memory_space<vmem>>, vector<1x128xf32>
    %c1_98 = arith.constant 1 : index
    %c0_99 = arith.constant 0 : index
    %140 = vector.load %arg12[%c1_98, %c0_99] : memref<3x128xf32, #tpu.memory_space<vmem>>, vector<1x128xf32>
    %141 = arith.truncf %136 : vector<32x128xf32> to vector<32x128xbf16>
    %cst_100 = arith.constant dense<0.000000e+00> : vector<32x128xf32>
    %142 = tpu.matmul %141, %137, %cst_100 {dimension_numbers = #tpu.dot_dimension_numbers<[1], [0], [0], [1], [0, 0, 1, 1], [], []>} : vector<32x128xbf16>, vector<128x128xbf16>, vector<32x128xf32> -> vector<32x128xf32>
    %143 = vector.broadcast %139 : vector<1x128xf32> to vector<32x128xf32>
    %144 = arith.addf %142, %143 : vector<32x128xf32>
    %cst_101 = arith.constant 0.000000e+00 : f32
    %145 = vector.broadcast %cst_101 : f32 to vector<32x128xf32>
    %146 = arith.maximumf %144, %145 : vector<32x128xf32>
    %147 = arith.truncf %146 : vector<32x128xf32> to vector<32x128xbf16>
    %c0_102 = arith.constant 0 : index
    %c0_103 = arith.constant 0 : index
    %c0_104 = arith.constant 0 : index
    %148 = vector.load %arg26[%c0_102, %c0_103, %c0_104] : memref<3x32x32xbf16, #tpu.memory_space<vmem>>, vector<1x32x32xbf16>
    %149 = vector.shape_cast %148 : vector<1x32x32xbf16> to vector<32x32xbf16>
    %cst_105 = arith.constant dense<0.000000e+00> : vector<32x128xf32>
    %150 = tpu.matmul %149, %147, %cst_105 {dimension_numbers = #tpu.dot_dimension_numbers<[1], [0], [0], [1], [0, 0, 1, 1], [], []>} : vector<32x32xbf16>, vector<32x128xbf16>, vector<32x128xf32> -> vector<32x128xf32>
    %151 = arith.truncf %150 : vector<32x128xf32> to vector<32x128xbf16>
    %c2_106 = arith.constant 2 : index
    %c0_107 = arith.constant 0 : index
    %c0_108 = arith.constant 0 : index
    %152 = vector.load %arg26[%c2_106, %c0_107, %c0_108] : memref<3x32x32xbf16, #tpu.memory_space<vmem>>, vector<1x32x32xbf16>
    %153 = vector.shape_cast %152 : vector<1x32x32xbf16> to vector<32x32xbf16>
    %cst_109 = arith.constant dense<0.000000e+00> : vector<32x128xf32>
    %154 = tpu.matmul %153, %147, %cst_109 {dimension_numbers = #tpu.dot_dimension_numbers<[1], [0], [0], [1], [0, 0, 1, 1], [], []>} : vector<32x32xbf16>, vector<32x128xbf16>, vector<32x128xf32> -> vector<32x128xf32>
    %155 = arith.truncf %154 : vector<32x128xf32> to vector<32x128xbf16>
    %156 = tpu.concatenate %151, %147, %155 in 1 : vector<32x128xbf16>, vector<32x128xbf16>, vector<32x128xbf16> -> vector<32x384xbf16>
    %cst_110 = arith.constant dense<0.000000e+00> : vector<32x128xf32>
    %157 = tpu.matmul %156, %138, %cst_110 {dimension_numbers = #tpu.dot_dimension_numbers<[1], [0], [0], [1], [0, 0, 1, 1], [], []>} : vector<32x384xbf16>, vector<384x128xbf16>, vector<32x128xf32> -> vector<32x128xf32>
    %158 = vector.broadcast %140 : vector<1x128xf32> to vector<32x128xf32>
    %159 = arith.addf %157, %158 : vector<32x128xf32>
    %160 = arith.addf %159, %136 : vector<32x128xf32>
    %cst_111 = arith.constant 0.000000e+00 : f32
    %161 = vector.broadcast %cst_111 : f32 to vector<32x128xf32>
    %162 = arith.maximumf %160, %161 : vector<32x128xf32>
    %c0_112 = arith.constant 0 : index
    %c0_113 = arith.constant 0 : index
    %163 = vector.load %arg29[%c0_112, %c0_113] : memref<32x128xf32, #tpu.memory_space<vmem>>, vector<32x128xf32>
    tpu.vector_store %arg29[%c0_112, %c0_113], %162 {strides = array<i32>} : memref<32x128xf32, #tpu.memory_space<vmem>>, vector<32x128xf32>,
    %c0_114 = arith.constant 0 : index
    %c0_115 = arith.constant 0 : index
    %164 = vector.load %arg13[%c0_114, %c0_115] : memref<512x128xbf16, #tpu.memory_space<vmem>>, vector<128x128xbf16>
    %c128_116 = arith.constant 128 : index
    %c0_117 = arith.constant 0 : index
    %165 = vector.load %arg13[%c128_116, %c0_117] : memref<512x128xbf16, #tpu.memory_space<vmem>>, vector<384x128xbf16>
    %c0_118 = arith.constant 0 : index
    %c0_119 = arith.constant 0 : index
    %166 = vector.load %arg14[%c0_118, %c0_119] : memref<3x128xf32, #tpu.memory_space<vmem>>, vector<1x128xf32>
    %c1_120 = arith.constant 1 : index
    %c0_121 = arith.constant 0 : index
    %167 = vector.load %arg14[%c1_120, %c0_121] : memref<3x128xf32, #tpu.memory_space<vmem>>, vector<1x128xf32>
    %168 = arith.truncf %162 : vector<32x128xf32> to vector<32x128xbf16>
    %cst_122 = arith.constant dense<0.000000e+00> : vector<32x128xf32>
    %169 = tpu.matmul %168, %164, %cst_122 {dimension_numbers = #tpu.dot_dimension_numbers<[1], [0], [0], [1], [0, 0, 1, 1], [], []>} : vector<32x128xbf16>, vector<128x128xbf16>, vector<32x128xf32> -> vector<32x128xf32>
    %170 = vector.broadcast %166 : vector<1x128xf32> to vector<32x128xf32>
    %171 = arith.addf %169, %170 : vector<32x128xf32>
    %cst_123 = arith.constant 0.000000e+00 : f32
    %172 = vector.broadcast %cst_123 : f32 to vector<32x128xf32>
    %173 = arith.maximumf %171, %172 : vector<32x128xf32>
    %174 = arith.truncf %173 : vector<32x128xf32> to vector<32x128xbf16>
    %c0_124 = arith.constant 0 : index
    %c0_125 = arith.constant 0 : index
    %c0_126 = arith.constant 0 : index
    %175 = vector.load %arg26[%c0_124, %c0_125, %c0_126] : memref<3x32x32xbf16, #tpu.memory_space<vmem>>, vector<1x32x32xbf16>
    %176 = vector.shape_cast %175 : vector<1x32x32xbf16> to vector<32x32xbf16>
    %cst_127 = arith.constant dense<0.000000e+00> : vector<32x128xf32>
    %177 = tpu.matmul %176, %174, %cst_127 {dimension_numbers = #tpu.dot_dimension_numbers<[1], [0], [0], [1], [0, 0, 1, 1], [], []>} : vector<32x32xbf16>, vector<32x128xbf16>, vector<32x128xf32> -> vector<32x128xf32>
    %178 = arith.truncf %177 : vector<32x128xf32> to vector<32x128xbf16>
    %c2_128 = arith.constant 2 : index
    %c0_129 = arith.constant 0 : index
    %c0_130 = arith.constant 0 : index
    %179 = vector.load %arg26[%c2_128, %c0_129, %c0_130] : memref<3x32x32xbf16, #tpu.memory_space<vmem>>, vector<1x32x32xbf16>
    %180 = vector.shape_cast %179 : vector<1x32x32xbf16> to vector<32x32xbf16>
    %cst_131 = arith.constant dense<0.000000e+00> : vector<32x128xf32>
    %181 = tpu.matmul %180, %174, %cst_131 {dimension_numbers = #tpu.dot_dimension_numbers<[1], [0], [0], [1], [0, 0, 1, 1], [], []>} : vector<32x32xbf16>, vector<32x128xbf16>, vector<32x128xf32> -> vector<32x128xf32>
    %182 = arith.truncf %181 : vector<32x128xf32> to vector<32x128xbf16>
    %183 = tpu.concatenate %178, %174, %182 in 1 : vector<32x128xbf16>, vector<32x128xbf16>, vector<32x128xbf16> -> vector<32x384xbf16>
    %cst_132 = arith.constant dense<0.000000e+00> : vector<32x128xf32>
    %184 = tpu.matmul %183, %165, %cst_132 {dimension_numbers = #tpu.dot_dimension_numbers<[1], [0], [0], [1], [0, 0, 1, 1], [], []>} : vector<32x384xbf16>, vector<384x128xbf16>, vector<32x128xf32> -> vector<32x128xf32>
    %185 = vector.broadcast %167 : vector<1x128xf32> to vector<32x128xf32>
    %186 = arith.addf %184, %185 : vector<32x128xf32>
    %187 = arith.addf %186, %162 : vector<32x128xf32>
    %cst_133 = arith.constant 0.000000e+00 : f32
    %188 = vector.broadcast %cst_133 : f32 to vector<32x128xf32>
    %189 = arith.maximumf %187, %188 : vector<32x128xf32>
    %c0_134 = arith.constant 0 : index
    %c0_135 = arith.constant 0 : index
    %190 = vector.load %arg15[%c0_134, %c0_135] : memref<128x512xbf16, #tpu.memory_space<vmem>>, vector<128x512xbf16>
    %c0_136 = arith.constant 0 : index
    %c0_137 = arith.constant 0 : index
    %191 = vector.load %arg16[%c0_136, %c0_137] : memref<768x256xbf16, #tpu.memory_space<vmem>>, vector<768x256xbf16>
    %c0_138 = arith.constant 0 : index
    %c0_139 = arith.constant 0 : index
    %192 = vector.load %arg17[%c0_138, %c0_139] : memref<3x256xf32, #tpu.memory_space<vmem>>, vector<1x256xf32>
    %c1_140 = arith.constant 1 : index
    %c0_141 = arith.constant 0 : index
    %193 = vector.load %arg17[%c1_140, %c0_141] : memref<3x256xf32, #tpu.memory_space<vmem>>, vector<1x256xf32>
    %c2_142 = arith.constant 2 : index
    %c0_143 = arith.constant 0 : index
    %194 = vector.load %arg17[%c2_142, %c0_143] : memref<3x256xf32, #tpu.memory_space<vmem>>, vector<1x256xf32>
    %195 = arith.truncf %189 : vector<32x128xf32> to vector<32x128xbf16>
    %cst_144 = arith.constant dense<0.000000e+00> : vector<32x512xf32>
    %196 = tpu.matmul %195, %190, %cst_144 {dimension_numbers = #tpu.dot_dimension_numbers<[1], [0], [0], [1], [0, 0, 1, 1], [], []>} : vector<32x128xbf16>, vector<128x512xbf16>, vector<32x512xf32> -> vector<32x512xf32>
    %197 = vector.extract_strided_slice %196 {offsets = [0, 0], sizes = [32, 256], strides = [1, 1]} : vector<32x512xf32> to vector<32x256xf32>
    %198 = vector.extract_strided_slice %196 {offsets = [0, 256], sizes = [32, 256], strides = [1, 1]} : vector<32x512xf32> to vector<32x256xf32>
    %199 = vector.broadcast %192 : vector<1x256xf32> to vector<32x256xf32>
    %200 = arith.addf %197, %199 : vector<32x256xf32>
    %cst_145 = arith.constant 0.000000e+00 : f32
    %201 = vector.broadcast %cst_145 : f32 to vector<32x256xf32>
    %202 = arith.maximumf %200, %201 : vector<32x256xf32>
    %203 = arith.truncf %202 : vector<32x256xf32> to vector<32x256xbf16>
    %c0_146 = arith.constant 0 : index
    %c0_147 = arith.constant 0 : index
    %c0_148 = arith.constant 0 : index
    %204 = vector.load %arg27[%c0_146, %c0_147, %c0_148] : memref<3x16x32xbf16, #tpu.memory_space<vmem>>, vector<1x16x32xbf16>
    %205 = vector.shape_cast %204 : vector<1x16x32xbf16> to vector<16x32xbf16>
    %cst_149 = arith.constant dense<0.000000e+00> : vector<16x256xf32>
    %206 = tpu.matmul %205, %203, %cst_149 {dimension_numbers = #tpu.dot_dimension_numbers<[1], [0], [0], [1], [0, 0, 1, 1], [], []>} : vector<16x32xbf16>, vector<32x256xbf16>, vector<16x256xf32> -> vector<16x256xf32>
    %207 = arith.truncf %206 : vector<16x256xf32> to vector<16x256xbf16>
    %c1_150 = arith.constant 1 : index
    %c0_151 = arith.constant 0 : index
    %c0_152 = arith.constant 0 : index
    %208 = vector.load %arg27[%c1_150, %c0_151, %c0_152] : memref<3x16x32xbf16, #tpu.memory_space<vmem>>, vector<1x16x32xbf16>
    %209 = vector.shape_cast %208 : vector<1x16x32xbf16> to vector<16x32xbf16>
    %cst_153 = arith.constant dense<0.000000e+00> : vector<16x256xf32>
    %210 = tpu.matmul %209, %203, %cst_153 {dimension_numbers = #tpu.dot_dimension_numbers<[1], [0], [0], [1], [0, 0, 1, 1], [], []>} : vector<16x32xbf16>, vector<32x256xbf16>, vector<16x256xf32> -> vector<16x256xf32>
    %211 = arith.truncf %210 : vector<16x256xf32> to vector<16x256xbf16>
    %c2_154 = arith.constant 2 : index
    %c0_155 = arith.constant 0 : index
    %c0_156 = arith.constant 0 : index
    %212 = vector.load %arg27[%c2_154, %c0_155, %c0_156] : memref<3x16x32xbf16, #tpu.memory_space<vmem>>, vector<1x16x32xbf16>
    %213 = vector.shape_cast %212 : vector<1x16x32xbf16> to vector<16x32xbf16>
    %cst_157 = arith.constant dense<0.000000e+00> : vector<16x256xf32>
    %214 = tpu.matmul %213, %203, %cst_157 {dimension_numbers = #tpu.dot_dimension_numbers<[1], [0], [0], [1], [0, 0, 1, 1], [], []>} : vector<16x32xbf16>, vector<32x256xbf16>, vector<16x256xf32> -> vector<16x256xf32>
    %215 = arith.truncf %214 : vector<16x256xf32> to vector<16x256xbf16>
    %216 = tpu.concatenate %207, %211, %215 in 1 : vector<16x256xbf16>, vector<16x256xbf16>, vector<16x256xbf16> -> vector<16x768xbf16>
    %cst_158 = arith.constant dense<0.000000e+00> : vector<16x256xf32>
    %217 = tpu.matmul %216, %191, %cst_158 {dimension_numbers = #tpu.dot_dimension_numbers<[1], [0], [0], [1], [0, 0, 1, 1], [], []>} : vector<16x768xbf16>, vector<768x256xbf16>, vector<16x256xf32> -> vector<16x256xf32>
    %218 = vector.broadcast %193 : vector<1x256xf32> to vector<16x256xf32>
    %219 = arith.addf %217, %218 : vector<16x256xf32>
    %c1_159 = arith.constant 1 : index
    %c0_160 = arith.constant 0 : index
    %c0_161 = arith.constant 0 : index
    %220 = vector.load %arg27[%c1_159, %c0_160, %c0_161] : memref<3x16x32xbf16, #tpu.memory_space<vmem>>, vector<1x16x32xbf16>
    %221 = vector.shape_cast %220 : vector<1x16x32xbf16> to vector<16x32xbf16>
    %222 = arith.truncf %198 : vector<32x256xf32> to vector<32x256xbf16>
    %cst_162 = arith.constant dense<0.000000e+00> : vector<16x256xf32>
    %223 = tpu.matmul %221, %222, %cst_162 {dimension_numbers = #tpu.dot_dimension_numbers<[1], [0], [0], [1], [0, 0, 1, 1], [], []>} : vector<16x32xbf16>, vector<32x256xbf16>, vector<16x256xf32> -> vector<16x256xf32>
    %224 = vector.broadcast %194 : vector<1x256xf32> to vector<16x256xf32>
    %225 = arith.addf %223, %224 : vector<16x256xf32>
    %226 = arith.addf %219, %225 : vector<16x256xf32>
    %cst_163 = arith.constant 0.000000e+00 : f32
    %227 = vector.broadcast %cst_163 : f32 to vector<16x256xf32>
    %228 = arith.maximumf %226, %227 : vector<16x256xf32>
    %c0_164 = arith.constant 0 : index
    %c0_165 = arith.constant 0 : index
    %229 = vector.load %arg18[%c0_164, %c0_165] : memref<1024x256xbf16, #tpu.memory_space<vmem>>, vector<256x256xbf16>
    %c256 = arith.constant 256 : index
    %c0_166 = arith.constant 0 : index
    %230 = vector.load %arg18[%c256, %c0_166] : memref<1024x256xbf16, #tpu.memory_space<vmem>>, vector<768x256xbf16>
    %c0_167 = arith.constant 0 : index
    %c0_168 = arith.constant 0 : index
    %231 = vector.load %arg19[%c0_167, %c0_168] : memref<3x256xf32, #tpu.memory_space<vmem>>, vector<1x256xf32>
    %c1_169 = arith.constant 1 : index
    %c0_170 = arith.constant 0 : index
    %232 = vector.load %arg19[%c1_169, %c0_170] : memref<3x256xf32, #tpu.memory_space<vmem>>, vector<1x256xf32>
    %233 = arith.truncf %228 : vector<16x256xf32> to vector<16x256xbf16>
    %cst_171 = arith.constant dense<0.000000e+00> : vector<16x256xf32>
    %234 = tpu.matmul %233, %229, %cst_171 {dimension_numbers = #tpu.dot_dimension_numbers<[1], [0], [0], [1], [0, 0, 1, 1], [], []>} : vector<16x256xbf16>, vector<256x256xbf16>, vector<16x256xf32> -> vector<16x256xf32>
    %235 = vector.broadcast %231 : vector<1x256xf32> to vector<16x256xf32>
    %236 = arith.addf %234, %235 : vector<16x256xf32>
    %cst_172 = arith.constant 0.000000e+00 : f32
    %237 = vector.broadcast %cst_172 : f32 to vector<16x256xf32>
    %238 = arith.maximumf %236, %237 : vector<16x256xf32>
    %239 = arith.truncf %238 : vector<16x256xf32> to vector<16x256xbf16>
    %c0_173 = arith.constant 0 : index
    %c0_174 = arith.constant 0 : index
    %c0_175 = arith.constant 0 : index
    %240 = vector.load %arg28[%c0_173, %c0_174, %c0_175] : memref<3x16x16xbf16, #tpu.memory_space<vmem>>, vector<1x16x16xbf16>
    %241 = vector.shape_cast %240 : vector<1x16x16xbf16> to vector<16x16xbf16>
    %cst_176 = arith.constant dense<0.000000e+00> : vector<16x256xf32>
    %242 = tpu.matmul %241, %239, %cst_176 {dimension_numbers = #tpu.dot_dimension_numbers<[1], [0], [0], [1], [0, 0, 1, 1], [], []>} : vector<16x16xbf16>, vector<16x256xbf16>, vector<16x256xf32> -> vector<16x256xf32>
    %243 = arith.truncf %242 : vector<16x256xf32> to vector<16x256xbf16>
    %c2_177 = arith.constant 2 : index
    %c0_178 = arith.constant 0 : index
    %c0_179 = arith.constant 0 : index
    %244 = vector.load %arg28[%c2_177, %c0_178, %c0_179] : memref<3x16x16xbf16, #tpu.memory_space<vmem>>, vector<1x16x16xbf16>
    %245 = vector.shape_cast %244 : vector<1x16x16xbf16> to vector<16x16xbf16>
    %cst_180 = arith.constant dense<0.000000e+00> : vector<16x256xf32>
    %246 = tpu.matmul %245, %239, %cst_180 {dimension_numbers = #tpu.dot_dimension_numbers<[1], [0], [0], [1], [0, 0, 1, 1], [], []>} : vector<16x16xbf16>, vector<16x256xbf16>, vector<16x256xf32> -> vector<16x256xf32>
    %247 = arith.truncf %246 : vector<16x256xf32> to vector<16x256xbf16>
    %248 = tpu.concatenate %243, %239, %247 in 1 : vector<16x256xbf16>, vector<16x256xbf16>, vector<16x256xbf16> -> vector<16x768xbf16>
    %cst_181 = arith.constant dense<0.000000e+00> : vector<16x256xf32>
    %249 = tpu.matmul %248, %230, %cst_181 {dimension_numbers = #tpu.dot_dimension_numbers<[1], [0], [0], [1], [0, 0, 1, 1], [], []>} : vector<16x768xbf16>, vector<768x256xbf16>, vector<16x256xf32> -> vector<16x256xf32>
    %250 = vector.broadcast %232 : vector<1x256xf32> to vector<16x256xf32>
    %251 = arith.addf %249, %250 : vector<16x256xf32>
    %252 = arith.addf %251, %228 : vector<16x256xf32>
    %cst_182 = arith.constant 0.000000e+00 : f32
    %253 = vector.broadcast %cst_182 : f32 to vector<16x256xf32>
    %254 = arith.maximumf %252, %253 : vector<16x256xf32>
    %c0_183 = arith.constant 0 : index
    %c0_184 = arith.constant 0 : index
    %255 = vector.load %arg20[%c0_183, %c0_184] : memref<1024x256xbf16, #tpu.memory_space<vmem>>, vector<256x256xbf16>
    %c256_185 = arith.constant 256 : index
    %c0_186 = arith.constant 0 : index
    %256 = vector.load %arg20[%c256_185, %c0_186] : memref<1024x256xbf16, #tpu.memory_space<vmem>>, vector<768x256xbf16>
    %c0_187 = arith.constant 0 : index
    %c0_188 = arith.constant 0 : index
    %257 = vector.load %arg21[%c0_187, %c0_188] : memref<3x256xf32, #tpu.memory_space<vmem>>, vector<1x256xf32>
    %c1_189 = arith.constant 1 : index
    %c0_190 = arith.constant 0 : index
    %258 = vector.load %arg21[%c1_189, %c0_190] : memref<3x256xf32, #tpu.memory_space<vmem>>, vector<1x256xf32>
    %259 = arith.truncf %254 : vector<16x256xf32> to vector<16x256xbf16>
    %cst_191 = arith.constant dense<0.000000e+00> : vector<16x256xf32>
    %260 = tpu.matmul %259, %255, %cst_191 {dimension_numbers = #tpu.dot_dimension_numbers<[1], [0], [0], [1], [0, 0, 1, 1], [], []>} : vector<16x256xbf16>, vector<256x256xbf16>, vector<16x256xf32> -> vector<16x256xf32>
    %261 = vector.broadcast %257 : vector<1x256xf32> to vector<16x256xf32>
    %262 = arith.addf %260, %261 : vector<16x256xf32>
    %cst_192 = arith.constant 0.000000e+00 : f32
    %263 = vector.broadcast %cst_192 : f32 to vector<16x256xf32>
    %264 = arith.maximumf %262, %263 : vector<16x256xf32>
    %265 = arith.truncf %264 : vector<16x256xf32> to vector<16x256xbf16>
    %c0_193 = arith.constant 0 : index
    %c0_194 = arith.constant 0 : index
    %c0_195 = arith.constant 0 : index
    %266 = vector.load %arg28[%c0_193, %c0_194, %c0_195] : memref<3x16x16xbf16, #tpu.memory_space<vmem>>, vector<1x16x16xbf16>
    %267 = vector.shape_cast %266 : vector<1x16x16xbf16> to vector<16x16xbf16>
    %cst_196 = arith.constant dense<0.000000e+00> : vector<16x256xf32>
    %268 = tpu.matmul %267, %265, %cst_196 {dimension_numbers = #tpu.dot_dimension_numbers<[1], [0], [0], [1], [0, 0, 1, 1], [], []>} : vector<16x16xbf16>, vector<16x256xbf16>, vector<16x256xf32> -> vector<16x256xf32>
    %269 = arith.truncf %268 : vector<16x256xf32> to vector<16x256xbf16>
    %c2_197 = arith.constant 2 : index
    %c0_198 = arith.constant 0 : index
    %c0_199 = arith.constant 0 : index
    %270 = vector.load %arg28[%c2_197, %c0_198, %c0_199] : memref<3x16x16xbf16, #tpu.memory_space<vmem>>, vector<1x16x16xbf16>
    %271 = vector.shape_cast %270 : vector<1x16x16xbf16> to vector<16x16xbf16>
    %cst_200 = arith.constant dense<0.000000e+00> : vector<16x256xf32>
    %272 = tpu.matmul %271, %265, %cst_200 {dimension_numbers = #tpu.dot_dimension_numbers<[1], [0], [0], [1], [0, 0, 1, 1], [], []>} : vector<16x16xbf16>, vector<16x256xbf16>, vector<16x256xf32> -> vector<16x256xf32>
    %273 = arith.truncf %272 : vector<16x256xf32> to vector<16x256xbf16>
    %274 = tpu.concatenate %269, %265, %273 in 1 : vector<16x256xbf16>, vector<16x256xbf16>, vector<16x256xbf16> -> vector<16x768xbf16>
    %cst_201 = arith.constant dense<0.000000e+00> : vector<16x256xf32>
    %275 = tpu.matmul %274, %256, %cst_201 {dimension_numbers = #tpu.dot_dimension_numbers<[1], [0], [0], [1], [0, 0, 1, 1], [], []>} : vector<16x768xbf16>, vector<768x256xbf16>, vector<16x256xf32> -> vector<16x256xf32>
    %276 = vector.broadcast %258 : vector<1x256xf32> to vector<16x256xf32>
    %277 = arith.addf %275, %276 : vector<16x256xf32>
    %278 = arith.addf %277, %254 : vector<16x256xf32>
    %cst_202 = arith.constant 0.000000e+00 : f32
    %279 = vector.broadcast %cst_202 : f32 to vector<16x256xf32>
    %280 = arith.maximumf %278, %279 : vector<16x256xf32>
    %c0_203 = arith.constant 0 : index
    %c0_204 = arith.constant 0 : index
    %281 = vector.load %arg22[%c0_203, %c0_204] : memref<1024x256xbf16, #tpu.memory_space<vmem>>, vector<256x256xbf16>
    %c256_205 = arith.constant 256 : index
    %c0_206 = arith.constant 0 : index
    %282 = vector.load %arg22[%c256_205, %c0_206] : memref<1024x256xbf16, #tpu.memory_space<vmem>>, vector<768x256xbf16>
    %c0_207 = arith.constant 0 : index
    %c0_208 = arith.constant 0 : index
    %283 = vector.load %arg23[%c0_207, %c0_208] : memref<3x256xf32, #tpu.memory_space<vmem>>, vector<1x256xf32>
    %c1_209 = arith.constant 1 : index
    %c0_210 = arith.constant 0 : index
    %284 = vector.load %arg23[%c1_209, %c0_210] : memref<3x256xf32, #tpu.memory_space<vmem>>, vector<1x256xf32>
    %285 = arith.truncf %280 : vector<16x256xf32> to vector<16x256xbf16>
    %cst_211 = arith.constant dense<0.000000e+00> : vector<16x256xf32>
    %286 = tpu.matmul %285, %281, %cst_211 {dimension_numbers = #tpu.dot_dimension_numbers<[1], [0], [0], [1], [0, 0, 1, 1], [], []>} : vector<16x256xbf16>, vector<256x256xbf16>, vector<16x256xf32> -> vector<16x256xf32>
    %287 = vector.broadcast %283 : vector<1x256xf32> to vector<16x256xf32>
    %288 = arith.addf %286, %287 : vector<16x256xf32>
    %cst_212 = arith.constant 0.000000e+00 : f32
    %289 = vector.broadcast %cst_212 : f32 to vector<16x256xf32>
    %290 = arith.maximumf %288, %289 : vector<16x256xf32>
    %291 = arith.truncf %290 : vector<16x256xf32> to vector<16x256xbf16>
    %c0_213 = arith.constant 0 : index
    %c0_214 = arith.constant 0 : index
    %c0_215 = arith.constant 0 : index
    %292 = vector.load %arg28[%c0_213, %c0_214, %c0_215] : memref<3x16x16xbf16, #tpu.memory_space<vmem>>, vector<1x16x16xbf16>
    %293 = vector.shape_cast %292 : vector<1x16x16xbf16> to vector<16x16xbf16>
    %cst_216 = arith.constant dense<0.000000e+00> : vector<16x256xf32>
    %294 = tpu.matmul %293, %291, %cst_216 {dimension_numbers = #tpu.dot_dimension_numbers<[1], [0], [0], [1], [0, 0, 1, 1], [], []>} : vector<16x16xbf16>, vector<16x256xbf16>, vector<16x256xf32> -> vector<16x256xf32>
    %295 = arith.truncf %294 : vector<16x256xf32> to vector<16x256xbf16>
    %c2_217 = arith.constant 2 : index
    %c0_218 = arith.constant 0 : index
    %c0_219 = arith.constant 0 : index
    %296 = vector.load %arg28[%c2_217, %c0_218, %c0_219] : memref<3x16x16xbf16, #tpu.memory_space<vmem>>, vector<1x16x16xbf16>
    %297 = vector.shape_cast %296 : vector<1x16x16xbf16> to vector<16x16xbf16>
    %cst_220 = arith.constant dense<0.000000e+00> : vector<16x256xf32>
    %298 = tpu.matmul %297, %291, %cst_220 {dimension_numbers = #tpu.dot_dimension_numbers<[1], [0], [0], [1], [0, 0, 1, 1], [], []>} : vector<16x16xbf16>, vector<16x256xbf16>, vector<16x256xf32> -> vector<16x256xf32>
    %299 = arith.truncf %298 : vector<16x256xf32> to vector<16x256xbf16>
    %300 = tpu.concatenate %295, %291, %299 in 1 : vector<16x256xbf16>, vector<16x256xbf16>, vector<16x256xbf16> -> vector<16x768xbf16>
    %cst_221 = arith.constant dense<0.000000e+00> : vector<16x256xf32>
    %301 = tpu.matmul %300, %282, %cst_221 {dimension_numbers = #tpu.dot_dimension_numbers<[1], [0], [0], [1], [0, 0, 1, 1], [], []>} : vector<16x768xbf16>, vector<768x256xbf16>, vector<16x256xf32> -> vector<16x256xf32>
    %302 = vector.broadcast %284 : vector<1x256xf32> to vector<16x256xf32>
    %303 = arith.addf %301, %302 : vector<16x256xf32>
    %304 = arith.addf %303, %280 : vector<16x256xf32>
    %cst_222 = arith.constant 0.000000e+00 : f32
    %305 = vector.broadcast %cst_222 : f32 to vector<16x256xf32>
    %306 = arith.maximumf %304, %305 : vector<16x256xf32>
    %c0_223 = arith.constant 0 : index
    %c0_224 = arith.constant 0 : index
    %307 = vector.load %arg30[%c0_223, %c0_224] : memref<16x256xf32, #tpu.memory_space<vmem>>, vector<16x256xf32>
    tpu.vector_store %arg30[%c0_223, %c0_224], %306 {strides = array<i32>} : memref<16x256xf32, #tpu.memory_space<vmem>>, vector<16x256xf32>,
    return
  }
  func.func @transform_0(%arg0: i32) -> (i32, i32) {
    %c0_i32 = arith.constant 0 : i32
    %c0_i32_0 = arith.constant 0 : i32
    return %arg0, %c0_i32 : i32, i32
  }
  func.func @transform_1(%arg0: i32) -> (i32, i32) {
    %c0_i32 = arith.constant 0 : i32
    %c0_i32_0 = arith.constant 0 : i32
    %c0_i32_1 = arith.constant 0 : i32
    return %c0_i32, %c0_i32_0 : i32, i32
  }
  func.func @transform_2(%arg0: i32) -> (i32, i32) {
    %c0_i32 = arith.constant 0 : i32
    %c0_i32_0 = arith.constant 0 : i32
    %c0_i32_1 = arith.constant 0 : i32
    return %c0_i32, %c0_i32_0 : i32, i32
  }
  func.func @transform_3(%arg0: i32) -> (i32, i32) {
    %c0_i32 = arith.constant 0 : i32
    %c0_i32_0 = arith.constant 0 : i32
    %c0_i32_1 = arith.constant 0 : i32
    return %c0_i32, %c0_i32_0 : i32, i32
  }
  func.func @transform_4(%arg0: i32) -> (i32, i32) {
    %c0_i32 = arith.constant 0 : i32
    %c0_i32_0 = arith.constant 0 : i32
    %c0_i32_1 = arith.constant 0 : i32
    return %c0_i32, %c0_i32_0 : i32, i32
  }
  func.func @transform_5(%arg0: i32) -> (i32, i32) {
    %c0_i32 = arith.constant 0 : i32
    %c0_i32_0 = arith.constant 0 : i32
    %c0_i32_1 = arith.constant 0 : i32
    return %c0_i32, %c0_i32_0 : i32, i32
  }
  func.func @transform_6(%arg0: i32) -> (i32, i32) {
    %c0_i32 = arith.constant 0 : i32
    %c0_i32_0 = arith.constant 0 : i32
    %c0_i32_1 = arith.constant 0 : i32
    return %c0_i32, %c0_i32_0 : i32, i32
  }
  func.func @transform_7(%arg0: i32) -> (i32, i32) {
    %c0_i32 = arith.constant 0 : i32
    %c0_i32_0 = arith.constant 0 : i32
    %c0_i32_1 = arith.constant 0 : i32
    return %c0_i32, %c0_i32_0 : i32, i32
  }
  func.func @transform_8(%arg0: i32) -> (i32, i32) {
    %c0_i32 = arith.constant 0 : i32
    %c0_i32_0 = arith.constant 0 : i32
    %c0_i32_1 = arith.constant 0 : i32
    return %c0_i32, %c0_i32_0 : i32, i32
  }
  func.func @transform_9(%arg0: i32) -> (i32, i32) {
    %c0_i32 = arith.constant 0 : i32
    %c0_i32_0 = arith.constant 0 : i32
    %c0_i32_1 = arith.constant 0 : i32
    return %c0_i32, %c0_i32_0 : i32, i32
  }
  func.func @transform_10(%arg0: i32) -> (i32, i32) {
    %c0_i32 = arith.constant 0 : i32
    %c0_i32_0 = arith.constant 0 : i32
    %c0_i32_1 = arith.constant 0 : i32
    return %c0_i32, %c0_i32_0 : i32, i32
  }
  func.func @transform_11(%arg0: i32) -> (i32, i32) {
    %c0_i32 = arith.constant 0 : i32
    %c0_i32_0 = arith.constant 0 : i32
    %c0_i32_1 = arith.constant 0 : i32
    return %c0_i32, %c0_i32_0 : i32, i32
  }
  func.func @transform_12(%arg0: i32) -> (i32, i32) {
    %c0_i32 = arith.constant 0 : i32
    %c0_i32_0 = arith.constant 0 : i32
    %c0_i32_1 = arith.constant 0 : i32
    return %c0_i32, %c0_i32_0 : i32, i32
  }
  func.func @transform_13(%arg0: i32) -> (i32, i32) {
    %c0_i32 = arith.constant 0 : i32
    %c0_i32_0 = arith.constant 0 : i32
    %c0_i32_1 = arith.constant 0 : i32
    return %c0_i32, %c0_i32_0 : i32, i32
  }
  func.func @transform_14(%arg0: i32) -> (i32, i32) {
    %c0_i32 = arith.constant 0 : i32
    %c0_i32_0 = arith.constant 0 : i32
    %c0_i32_1 = arith.constant 0 : i32
    return %c0_i32, %c0_i32_0 : i32, i32
  }
  func.func @transform_15(%arg0: i32) -> (i32, i32) {
    %c0_i32 = arith.constant 0 : i32
    %c0_i32_0 = arith.constant 0 : i32
    %c0_i32_1 = arith.constant 0 : i32
    return %c0_i32, %c0_i32_0 : i32, i32
  }
  func.func @transform_16(%arg0: i32) -> (i32, i32) {
    %c0_i32 = arith.constant 0 : i32
    %c0_i32_0 = arith.constant 0 : i32
    %c0_i32_1 = arith.constant 0 : i32
    return %c0_i32, %c0_i32_0 : i32, i32
  }
  func.func @transform_17(%arg0: i32) -> (i32, i32) {
    %c0_i32 = arith.constant 0 : i32
    %c0_i32_0 = arith.constant 0 : i32
    %c0_i32_1 = arith.constant 0 : i32
    return %c0_i32, %c0_i32_0 : i32, i32
  }
  func.func @transform_18(%arg0: i32) -> (i32, i32) {
    %c0_i32 = arith.constant 0 : i32
    %c0_i32_0 = arith.constant 0 : i32
    %c0_i32_1 = arith.constant 0 : i32
    return %c0_i32, %c0_i32_0 : i32, i32
  }
  func.func @transform_19(%arg0: i32) -> (i32, i32) {
    %c0_i32 = arith.constant 0 : i32
    %c0_i32_0 = arith.constant 0 : i32
    %c0_i32_1 = arith.constant 0 : i32
    return %c0_i32, %c0_i32_0 : i32, i32
  }
  func.func @transform_20(%arg0: i32) -> (i32, i32) {
    %c0_i32 = arith.constant 0 : i32
    %c0_i32_0 = arith.constant 0 : i32
    %c0_i32_1 = arith.constant 0 : i32
    return %c0_i32, %c0_i32_0 : i32, i32
  }
  func.func @transform_21(%arg0: i32) -> (i32, i32) {
    %c0_i32 = arith.constant 0 : i32
    %c0_i32_0 = arith.constant 0 : i32
    %c0_i32_1 = arith.constant 0 : i32
    return %c0_i32, %c0_i32_0 : i32, i32
  }
  func.func @transform_22(%arg0: i32) -> (i32, i32) {
    %c0_i32 = arith.constant 0 : i32
    %c0_i32_0 = arith.constant 0 : i32
    %c0_i32_1 = arith.constant 0 : i32
    return %c0_i32, %c0_i32_0 : i32, i32
  }
  func.func @transform_23(%arg0: i32) -> (i32, i32, i32) {
    %c0_i32 = arith.constant 0 : i32
    %c0_i32_0 = arith.constant 0 : i32
    %c0_i32_1 = arith.constant 0 : i32
    %c0_i32_2 = arith.constant 0 : i32
    return %c0_i32, %c0_i32_0, %c0_i32_1 : i32, i32, i32
  }
  func.func @transform_24(%arg0: i32) -> (i32, i32, i32) {
    %c0_i32 = arith.constant 0 : i32
    %c0_i32_0 = arith.constant 0 : i32
    %c0_i32_1 = arith.constant 0 : i32
    %c0_i32_2 = arith.constant 0 : i32
    return %c0_i32, %c0_i32_0, %c0_i32_1 : i32, i32, i32
  }
  func.func @transform_25(%arg0: i32) -> (i32, i32, i32) {
    %c0_i32 = arith.constant 0 : i32
    %c0_i32_0 = arith.constant 0 : i32
    %c0_i32_1 = arith.constant 0 : i32
    %c0_i32_2 = arith.constant 0 : i32
    return %c0_i32, %c0_i32_0, %c0_i32_1 : i32, i32, i32
  }
  func.func @transform_26(%arg0: i32) -> (i32, i32, i32) {
    %c0_i32 = arith.constant 0 : i32
    %c0_i32_0 = arith.constant 0 : i32
    %c0_i32_1 = arith.constant 0 : i32
    %c0_i32_2 = arith.constant 0 : i32
    return %c0_i32, %c0_i32_0, %c0_i32_1 : i32, i32, i32
  }
  func.func @transform_27(%arg0: i32) -> (i32, i32, i32) {
    %c0_i32 = arith.constant 0 : i32
    %c0_i32_0 = arith.constant 0 : i32
    %c0_i32_1 = arith.constant 0 : i32
    %c0_i32_2 = arith.constant 0 : i32
    return %c0_i32, %c0_i32_0, %c0_i32_1 : i32, i32, i32
  }
  func.func @transform_28(%arg0: i32) -> (i32, i32) {
    %c0_i32 = arith.constant 0 : i32
    %c0_i32_0 = arith.constant 0 : i32
    return %arg0, %c0_i32 : i32, i32
  }
  func.func @transform_29(%arg0: i32) -> (i32, i32) {
    %c0_i32 = arith.constant 0 : i32
    %c0_i32_0 = arith.constant 0 : i32
    return %arg0, %c0_i32 : i32, i32
  }
}

</mosaic_0001>

<bundles_post_ra>
// kernel: tile.285
= control target key start
LH: loop header
LB: loop body
LE: loop exit
PB: predicated region body
PF: predicated region fallthrough
CT: control target
= control target key end

     0   :  { %s22_s0 = inlined_call_operand.vmem [shape: f32[32], index: 0, kind: input, shape index: {}]   ;;  %s23_s1 = inlined_call_operand.vmem [shape: f32[8,32], index: 1, kind: output, shape index: {}]  }
   0x1   :  { %v4_v0 = vld [vmem:[%s22_s0] ss:$0 sm:$0xff] }
   0x2   :  { %5 = vst [vmem:[%s23_s1] sm:$0xff] %v4_v0 }

// kernel: tile.173
= control target key start
LH: loop header
LB: loop body
LE: loop exit
PB: predicated region body
PF: predicated region fallthrough
CT: control target
= control target key end

     0   :  { %s22_s0 = inlined_call_operand.vmem [shape: f32[8], index: 0, kind: input, shape index: {}]   ;;  %s23_s1 = inlined_call_operand.vmem [shape: f32[8,8], index: 1, kind: output, shape index: {}]  }
   0x1   :  { %v4_v0 = vld [vmem:[%s22_s0] ss:$0 sm:$0xff] }
   0x2   :  { %5 = vst [vmem:[%s23_s1] sm:$0xff] %v4_v0 }

// kernel: mul.176
= control target key start
LH: loop header
LB: loop body
LE: loop exit
PB: predicated region body
PF: predicated region fallthrough
CT: control target
= control target key end

     0   :  { %s69_s10 = smov 56   ;;  %s70_s11 = smov 40   ;;  %vm3_vm0 = vcmask 64512   ;;  %vm9_vm1 = vcmask 523712   ;;  %vm15_vm2 = vcmask 458112   ;;  %vm21_vm3 = vcmask 392512   ;;  %s113_s0 = inlined_call_operand.vmem [shape: f32[8,8], index: 0, kind: input, shape index: {}]   ;;  %s114_s1 = inlined_call_operand.vmem [shape: f32[64], index: 1, kind: output, shape index: {}]  }
   0x1   :  { %v55_v0 = vld [vmem:[%s113_s0 + $0x7] sm:$0x1]   ;;  %v57_v1 = vld [vmem:[%s113_s0 + $0x5] sm:$0x1]   ;;  %v56_v2 = vld [vmem:[%s113_s0 + $0x6] sm:$0x1]  }
   0x2   :  { %7 = vrot.lane.b32.xlu0 %v55_v0, %s69_s10  ;;  %19 = vrot.lane.b32.xlu1 %v57_v1, %s70_s11  ;;  %v58_v3 = vld [vmem:[%s113_s0 + $0x4] sm:$0x1]   ;;  %v2_v4 = vld [vmem:[%s113_s0] sm:$0x1]   ;;  %s71_s18 = smov 48   ;;  %s72_s19 = smov 32  }
   0x3   :  { %4 = vst.msk [vmem:[#allocation0] sm:$0x1] %vm3_vm0, %v2_v4   ;;  %v59_v5 = vld [vmem:[%s113_s0 + $0x3] sm:$0x1]   ;;  %v60_v6 = vld [vmem:[%s113_s0 + $0x2] sm:$0x1]  }
   0x4   :  { %s73_s24 = smov 24   ;;  %s74_s25 = smov 16   ;;  %v61_v7 = vld [vmem:[%s113_s0 + $0x1] sm:$0x1]   ;;  %vm27_vm4 = vcmask 326912   ;;  %vm33_vm5 = vcmask 261312  }
   0x5   :  { %s75_s0 = smov 8   ;;  %vm39_vm6 = vcmask 195712   ;;  %vm45_vm7 = vcmask 130112  }
   0x6   :  { %13 = vrot.lane.b32.xlu0 %v56_v2, %s71_s18  ;;  %25 = vrot.lane.b32.xlu1 %v58_v3, %s72_s19 }
   0xa   :  { %31 = vrot.lane.b32.xlu0 %v59_v5, %s73_s24  ;;  %37 = vrot.lane.b32.xlu1 %v60_v6, %s74_s25 }
   0xe   :  { %43 = vrot.lane.b32.xlu0 %v61_v7, %s75_s0 }
  0x74   :  { %v8_v8 = vpop.permute.xlu0 %7   ;;  %v20_v9 = vpop.permute.xlu1 %19  }
  0x75   :  { %10 = vst.msk [vmem:[#allocation0] sm:$0x1] %vm9_vm1, %v8_v8  }
  0x78   :  { %v14_v10 = vpop.permute.xlu0 %13   ;;  %v26_v11 = vpop.permute.xlu1 %25  }
  0x79   :  { %16 = vst.msk [vmem:[#allocation0] sm:$0x1] %vm15_vm2, %v14_v10  }
  0x7a   :  { %22 = vst.msk [vmem:[#allocation0] sm:$0x1] %vm21_vm3, %v20_v9  }
  0x7b   :  { %28 = vst.msk [vmem:[#allocation0] sm:$0x1] %vm27_vm4, %v26_v11  }
  0x7c   :  { %v32_v12 = vpop.permute.xlu0 %31   ;;  %v38_v13 = vpop.permute.xlu1 %37  }
  0x7d   :  { %34 = vst.msk [vmem:[#allocation0] sm:$0x1] %vm33_vm5, %v32_v12  }
  0x7e   :  { %40 = vst.msk [vmem:[#allocation0] sm:$0x1] %vm39_vm6, %v38_v13  }
  0x80   :  { %v44_v14 = vpop.permute.xlu0 %43  }
  0x81   :  { %46 = vst.msk [vmem:[#allocation0] sm:$0x1] %vm45_vm7, %v44_v14  }
  0x88   :  { %v51_v15 = vld [vmem:[#allocation0] sm:$0x1] }
  0x89   :  { %54 = vst [vmem:[%s114_s1] sm:$0x1] %v51_v15 }

// kernel: tile.232
= control target key start
LH: loop header
LB: loop body
LE: loop exit
PB: predicated region body
PF: predicated region fallthrough
CT: control target
= control target key end

     0   :  { %s22_s0 = inlined_call_operand.vmem [shape: f32[16], index: 0, kind: input, shape index: {}]   ;;  %s23_s1 = inlined_call_operand.vmem [shape: f32[8,16], index: 1, kind: output, shape index: {}]  }
   0x1   :  { %v4_v0 = vld [vmem:[%s22_s0] ss:$0 sm:$0xff] }
   0x2   :  { %5 = vst [vmem:[%s23_s1] sm:$0xff] %v4_v0 }

// kernel: mul.299
= control target key start
LH: loop header
LB: loop body
LE: loop exit
PB: predicated region body
PF: predicated region fallthrough
CT: control target
= control target key end

     0   :  { %s7_s6 = smov 3  ;;  %s14_s9 = smov 3  ;;  %vm4_vm0 = vcmask 261120   ;;  %vm11_vm1 = vcmask 1048320   ;;  %vm18_vm2 = vcmask 785920   ;;  %vm25_vm3 = vcmask 523520   ;;  %s69_s0 = inlined_call_operand.vmem [shape: f32[8,32], index: 0, kind: input, shape index: {}]   ;;  %s70_s1 = inlined_call_operand.vmem [shape: f32[256], index: 1, kind: output, shape index: {}]  }
   0x1   :  { %v35_v0 = vld [vmem:[%s69_s0 + $0x3] ss:$4 sm:%s7_s6]   ;;  %s41_s10 = smov 96   ;;  %s21_s11 = smov 3  ;;  %v36_v1 = vld [vmem:[%s69_s0 + $0x2] ss:$4 sm:%s14_s9]  }
   0x2   :  { %9 = vrot.lane.b32.xlu0 %v35_v0, %s41_s10  ;;  %v37_v2 = vld [vmem:[%s69_s0 + $0x1] ss:$4 sm:%s21_s11]   ;;  %s2_s16 = smov 3  ;;  %s42_s17 = smov 32  }
   0x3   :  { %23 = vrot.lane.b32.xlu1 %v37_v2, %s42_s17  ;;  %v3_v3 = vld [vmem:[%s69_s0] ss:$4 sm:%s2_s16]   ;;  %s43_s0 = smov 64  }
   0x4   :  { %5 = vst.msk [vmem:[#allocation0] sm:$0x3] %vm4_vm0, %v3_v3  }
   0x6   :  { %16 = vrot.lane.b32.xlu0 %v36_v1, %s43_s0 }
  0x74   :  { %v10_v4 = vpop.permute.xlu0 %9  }
  0x75   :  { %12 = vst.msk [vmem:[#allocation0] sm:$0x3] %vm11_vm1, %v10_v4   ;;  %v24_v5 = vpop.permute.xlu1 %23  }
  0x78   :  { %v17_v6 = vpop.permute.xlu0 %16  }
  0x79   :  { %19 = vst.msk [vmem:[#allocation0] sm:$0x3] %vm18_vm2, %v17_v6  }
  0x7a   :  { %26 = vst.msk [vmem:[#allocation0] sm:$0x3] %vm25_vm3, %v24_v5  }
  0x81   :  { %v31_v7 = vld [vmem:[#allocation0] sm:$0x3] }
  0x82   :  { %34 = vst [vmem:[%s70_s1] sm:$0x3] %v31_v7 }

// kernel: mul.247
= control target key start
LH: loop header
LB: loop body
LE: loop exit
PB: predicated region body
PF: predicated region fallthrough
CT: control target
= control target key end

     0   :  { %s69_s10 = smov 112   ;;  %s70_s11 = smov 80   ;;  %vm3_vm0 = vcmask 130048   ;;  %vm9_vm1 = vcmask 1048448   ;;  %vm15_vm2 = vcmask 917248   ;;  %vm21_vm3 = vcmask 786048   ;;  %s113_s0 = inlined_call_operand.vmem [shape: f32[8,16], index: 0, kind: input, shape index: {}]   ;;  %s114_s1 = inlined_call_operand.vmem [shape: f32[128], index: 1, kind: output, shape index: {}]  }
   0x1   :  { %v55_v0 = vld [vmem:[%s113_s0 + $0x7] sm:$0x1]   ;;  %v57_v1 = vld [vmem:[%s113_s0 + $0x5] sm:$0x1]   ;;  %v56_v2 = vld [vmem:[%s113_s0 + $0x6] sm:$0x1]  }
   0x2   :  { %7 = vrot.lane.b32.xlu0 %v55_v0, %s69_s10  ;;  %19 = vrot.lane.b32.xlu1 %v57_v1, %s70_s11  ;;  %v58_v3 = vld [vmem:[%s113_s0 + $0x4] sm:$0x1]   ;;  %v2_v4 = vld [vmem:[%s113_s0] sm:$0x1]   ;;  %s71_s18 = smov 96   ;;  %s72_s19 = smov 64  }
   0x3   :  { %4 = vst.msk [vmem:[#allocation0] sm:$0x1] %vm3_vm0, %v2_v4   ;;  %v59_v5 = vld [vmem:[%s113_s0 + $0x3] sm:$0x1]   ;;  %v60_v6 = vld [vmem:[%s113_s0 + $0x2] sm:$0x1]  }
   0x4   :  { %s73_s24 = smov 48   ;;  %s74_s25 = smov 32   ;;  %v61_v7 = vld [vmem:[%s113_s0 + $0x1] sm:$0x1]   ;;  %vm27_vm4 = vcmask 654848   ;;  %vm33_vm5 = vcmask 523648  }
   0x5   :  { %s75_s0 = smov 16   ;;  %vm39_vm6 = vcmask 392448   ;;  %vm45_vm7 = vcmask 261248  }
   0x6   :  { %13 = vrot.lane.b32.xlu0 %v56_v2, %s71_s18  ;;  %25 = vrot.lane.b32.xlu1 %v58_v3, %s72_s19 }
   0xa   :  { %31 = vrot.lane.b32.xlu0 %v59_v5, %s73_s24  ;;  %37 = vrot.lane.b32.xlu1 %v60_v6, %s74_s25 }
   0xe   :  { %43 = vrot.lane.b32.xlu0 %v61_v7, %s75_s0 }
  0x74   :  { %v8_v8 = vpop.permute.xlu0 %7   ;;  %v20_v9 = vpop.permute.xlu1 %19  }
  0x75   :  { %10 = vst.msk [vmem:[#allocation0] sm:$0x1] %vm9_vm1, %v8_v8  }
  0x78   :  { %v14_v10 = vpop.permute.xlu0 %13   ;;  %v26_v11 = vpop.permute.xlu1 %25  }
  0x79   :  { %16 = vst.msk [vmem:[#allocation0] sm:$0x1] %vm15_vm2, %v14_v10  }
  0x7a   :  { %22 = vst.msk [vmem:[#allocation0] sm:$0x1] %vm21_vm3, %v20_v9  }
  0x7b   :  { %28 = vst.msk [vmem:[#allocation0] sm:$0x1] %vm27_vm4, %v26_v11  }
  0x7c   :  { %v32_v12 = vpop.permute.xlu0 %31   ;;  %v38_v13 = vpop.permute.xlu1 %37  }
  0x7d   :  { %34 = vst.msk [vmem:[#allocation0] sm:$0x1] %vm33_vm5, %v32_v12  }
  0x7e   :  { %40 = vst.msk [vmem:[#allocation0] sm:$0x1] %vm39_vm6, %v38_v13  }
  0x80   :  { %v44_v14 = vpop.permute.xlu0 %43  }
  0x81   :  { %46 = vst.msk [vmem:[#allocation0] sm:$0x1] %vm45_vm7, %v44_v14  }
  0x88   :  { %v51_v15 = vld [vmem:[#allocation0] sm:$0x1] }
  0x89   :  { %54 = vst [vmem:[%s114_s1] sm:$0x1] %v51_v15 }

// kernel: feature_extractor.1
= control target key start
LH: loop header
LB: loop body
LE: loop exit
PB: predicated region body
PF: predicated region fallthrough
CT: control target
= control target key end

     0   :  { %s12047_s6 = smov 1   ;;  %s12048_s10 = smov 2   ;;  %s13501_s0 = inlined_call_operand.smem [shape: u32[30], index: -1, kind: input, shape index: {}] }
   0x1   :  { %s12085_s5 = sld [smem:[%s13501_s0]]   ;;  %s12049_s14 = smov 3  }
   0x2   :  { %s12090_s9 = sld [smem:[%s13501_s0 + %s12047_s6]]   ;;  %s12050_s18 = smov 4  }
   0x3   :  { %s12095_s13 = sld [smem:[%s13501_s0 + %s12048_s10]]   ;;  %s12051_s22 = smov 5  }
   0x4   :  { %s12100_s17 = sld [smem:[%s13501_s0 + %s12049_s14]]   ;;  %s12052_s26 = smov 6  }
   0x5   :  { %s12105_s21 = sld [smem:[%s13501_s0 + %s12050_s18]]   ;;  %s12053_s30 = smov 7  }
   0x6   :  { %s12110_s25 = sld [smem:[%s13501_s0 + %s12051_s22]]   ;;  %s12054_s4 = smov 8  }
   0x7   :  { %s12115_s29 = sld [smem:[%s13501_s0 + %s12052_s26]]   ;;  %s12055_s10 = smov 9  }
   0x8   :  { %s12120_s3 = sld [smem:[%s13501_s0 + %s12053_s30]]   ;;  %s12056_s15 = smov 10  }
   0x9   :  { %s12125_s8 = sld [smem:[%s13501_s0 + %s12054_s4]]   ;;  %s12057_s20 = smov 11  }
   0xa   :  { %s12130_s14 = sld [smem:[%s13501_s0 + %s12055_s10]]   ;;  %s12058_s26 = smov 12  }
   0xb   :  { %s12135_s19 = sld [smem:[%s13501_s0 + %s12056_s15]]   ;;  %s12059_s1 = smov 13  }
   0xc   :  { %s12140_s24 = sld [smem:[%s13501_s0 + %s12057_s20]]   ;;  %s12060_s7 = smov 14  }
   0xd   :  { %s12145_s30 = sld [smem:[%s13501_s0 + %s12058_s26]]   ;;  %s12061_s15 = smov 15  }
   0xe   :  { %s12150_s6 = sld [smem:[%s13501_s0 + %s12059_s1]]   ;;  %s12062_s22 = smov 16  }
   0xf   :  { %s12155_s12 = sld [smem:[%s13501_s0 + %s12060_s7]]   ;;  %s12063_s28 = smov 17  }
  0x10   :  { %s12160_s20 = sld [smem:[%s13501_s0 + %s12061_s15]]   ;;  %s12064_s7 = smov 18  }
  0x11   :  { %s12165_s27 = sld [smem:[%s13501_s0 + %s12062_s22]]   ;;  %s12065_s15 = smov 19  }
  0x12   :  { %13517 = sst [smem:[#allocation2_spill]] %s12140_s24  ;;  %s12066_s22 = smov 20  }
  0x13   :  { %13518 = sst [smem:[#allocation3_spill]] %s12145_s30 }
  0x14   :  { %13519 = sst [smem:[#allocation4_spill]] %s12150_s6 }
  0x15   :  { %13520 = sst [smem:[#allocation5_spill]] %s12155_s12 }
  0x16   :  { %13521 = sst [smem:[#allocation6_spill]] %s12160_s20 }
  0x17   :  { %13522 = sst [smem:[#allocation7_spill]] %s12165_s27 }
  0x18   :  { %s12170_s4 = sld [smem:[%s13501_s0 + %s12063_s28]]   ;;  %s12067_s28 = smov 21  }
  0x19   :  { %s12175_s12 = sld [smem:[%s13501_s0 + %s12064_s7]]   ;;  %s12068_s7 = smov 22  }
  0x1a   :  { %s12180_s20 = sld [smem:[%s13501_s0 + %s12065_s15]]   ;;  %s12069_s15 = smov 23  }
  0x1b   :  { %s12185_s27 = sld [smem:[%s13501_s0 + %s12066_s22]]   ;;  %s12070_s22 = smov 24  }
  0x1e   :  { %13523 = sst [smem:[#allocation8_spill]] %s12170_s4 }
  0x1f   :  { %13524 = sst [smem:[#allocation9_spill]] %s12175_s12 }
  0x20   :  { %13525 = sst [smem:[#allocation10_spill]] %s12180_s20 }
  0x21   :  { %13526 = sst [smem:[#allocation11_spill]] %s12185_s27 }
  0x22   :  { %s12190_s4 = sld [smem:[%s13501_s0 + %s12067_s28]]   ;;  %s12071_s28 = smov 25  }
  0x23   :  { %s12195_s12 = sld [smem:[%s13501_s0 + %s12068_s7]]   ;;  %s12072_s7 = smov 26  }
  0x24   :  { %s12200_s20 = sld [smem:[%s13501_s0 + %s12069_s15]]   ;;  %s12073_s15 = smov 27  }
  0x25   :  { %s12205_s27 = sld [smem:[%s13501_s0 + %s12070_s22]]   ;;  %s12074_s22 = smov 28  }
  0x26   :  { %s12220_s6 = sld [smem:[%s13501_s0 + %s12073_s15]]  }
  0x27   :  { %s12225_s30 = sld [smem:[%s13501_s0 + %s12074_s22]]  }
  0x28   :  { %13527 = sst [smem:[#allocation12_spill]] %s12190_s4 }
  0x29   :  { %13528 = sst [smem:[#allocation13_spill]] %s12195_s12 }
  0x2a   :  { %s12210_s4 = sld [smem:[%s13501_s0 + %s12071_s28]]   ;;  %s12075_s28 = smov 29  }
  0x2b   :  { %s12215_s12 = sld [smem:[%s13501_s0 + %s12072_s7]]   ;;  %s12232_s7 = smov 0  }
  0x2c   :  { %s12230_s24 = sld [smem:[%s13501_s0 + %s12075_s28]]  }
  0x2d LB: > { %s12238_s10 = sadd.s32 4294967295, %s12045_s7   ;;  %p9428_p0 = scmp.ge.s32.totalorder %s12045_s7, 1  ;;  %s12045_s7 = sphi %s12232_s7, %s70_s7  }
  0x2e   : > { %p821_p1 = scmp.lt.s32.totalorder %s12045_s7, 3 }
  0x30   : > { %p822_p2 = pnand %p9428_p0, %p821_p1 }
  0x31   : > { %s9429_s0 = sshll.u32 (!%p822_p2), %s12238_s10, 3  ;;  %s13529_s16 = sld [smem:[#allocation2_spill]] (!%p822_p2) }
  0x32   : > { %825 = sbr.rel (%p822_p2) target bundleno = 6722 (0x1a42), region = 132  ;;  %p904_p3 = scmp.lt.s32.totalorder (!%p822_p2), %s9429_s0, 15 }
  0x33   : > { %s13530_s18 = sld [smem:[#allocation3_spill]] (!%p822_p2)  ;;  %s9431_s22 = sshll.u32 (!%p822_p2), %s12238_s10, 2 }
  0x34   : > { %p910_p4 = scmp.lt.s32.totalorder (!%p822_p2), %s9431_s22, 7  ;;  %s13531_s28 = sld [smem:[#allocation4_spill]] (!%p822_p2) }
  0x35   : > { %s13532_s1 = sld [smem:[#allocation5_spill]] (!%p822_p2) }
  0x36   : > { %s13533_s2 = sld [smem:[#allocation7_spill]] (!%p822_p2) }
  0x37   : > { %v11088_v0 = vld [vmem:[%s12090_s9 + $0x8] sm:$0xff]   ;;  %v11089_v1 = vld [vmem:[%s12090_s9] sm:$0xff]   ;;  %s13542_s0 = smov (!%p904_p3, %s9429_s0), 15  ;;  %vm981_vm0 = vcmask 261120   ;;  %vm1099_vm1 = vcmask 523264   ;;  %v12264_v49 = vld [vmem:[%s12200_s20 + $0x10] sm:$0xff]  }
  0x38   : > { %10586 = vmatprep.subr.bf16.mxu0 %v11088_v0  ;;  %s9430_s11 = sshll.u32 %s13542_s0, 3  ;;  %v11090_v14 = vld [vmem:[%s12200_s20] sm:$0xff]   ;;  %v11094_v45 = vld [vmem:[%s12090_s9 + $0x48] sm:$0xff]   ;;  %v12268_v51 = vld [vmem:[%s12200_s20 + $0x50] sm:$0xff]   ;;  %s13544_s22 = smov (!%p910_p4, %s9431_s22), 7  ;;  %vm6424_vm2 = vcmask 130048  }
  0x39   : > { %10587 = vmatpush3.bf16.msra.mxu0 %v11088_v0  ;;  %s907_s15 = scalar_lea.vmem %s12085_s5, %s9430_s11  ;;  %v11091_v15 = vld [vmem:[%s12200_s20 + $0x40] sm:$0xff]   ;;  %10606 = vmatprep.mubr.msk.bf16.mxu1 %vm1099_vm1, %v11090_v14  ;;  %v11102_v46 = vld [vmem:[%s12090_s9 + $0x28] sm:$0xff]   ;;  %v11100_v53 = vld [vmem:[%s12090_s9 + $0x38] sm:$0xff]   ;;  %s9432_s23 = sshll.u32 %s13544_s22, 3 }
  0x3a   : > { %10588 = vmatprep.subr.bf16.mxu0 %v11089_v1  ;;  %v923_v2 = vld [vmem:[%s907_s15] sm:$0xff]  ;;  %v924_v3 = vld [vmem:[%s907_s15 + $0x8] sm:$0xff]  ;;  %v925_v4 = vld [vmem:[%s907_s15 + $0x10] sm:$0xff]  ;;  %s913_s26 = scalar_lea.vmem %s12225_s30, %s9432_s23  ;;  %s13534_s0 = sld [smem:[#allocation6_spill]] }
  0x3b   : > { %v961_v5 = vpack.c.bf16 %v924_v3, %v923_v2  ;;  %v926_v6 = vld [vmem:[%s907_s15 + $0x18] sm:$0xff]  ;;  %v927_v7 = vld [vmem:[%s907_s15 + $0x20] sm:$0xff]  ;;  %v928_v8 = vld [vmem:[%s907_s15 + $0x28] sm:$0xff]  ;;  %s13535_s11 = sld [smem:[#allocation8_spill]] }
  0x3c   : > { %v962_v9 = vpack.c.bf16 %v926_v6, %v925_v4  ;;  %v963_v10 = vpack.c.bf16 %v928_v8, %v927_v7  ;;  %v929_v11 = vld [vmem:[%s907_s15 + $0x30] sm:$0xff]  ;;  %v930_v12 = vld [vmem:[%s907_s15 + $0x38] sm:$0xff]  ;;  %v9436_v20 = vld [vmem:[%s12095_s13] ss:$0 sm:$0xff]  ;;  %s13536_s15 = sld [smem:[#allocation9_spill]] }
  0x3d   : > { %10589 = vmatpush3.bf16.msra.mxu0 %v11089_v1  ;;  %10590 = vmatprep.mubr.msk.bf16.mxu0 %vm981_vm0, %v961_v5  ;;  %v964_v13 = vpack.c.bf16 %v930_v12, %v929_v11  ;;  %v12258_v47 = vld [vmem:[%s12200_s20 + $0x8] sm:$0xff]   ;;  %v11095_v50 = vld [vmem:[%s12090_s9 + $0x40] sm:$0xff]   ;;  %v12281_v54 = vld [vmem:[%s12200_s20 + $0x18] sm:$0xff]   ;;  %s13537_s22 = sld [smem:[#allocation10_spill]] }
  0x3e   : > { %v12261_v48 = vld [vmem:[%s12200_s20 + $0x48] sm:$0xff]   ;;  %v11103_v52 = vld [vmem:[%s12090_s9 + $0x20] sm:$0xff]   ;;  %v12284_v55 = vld [vmem:[%s12200_s20 + $0x58] sm:$0xff]   ;;  %s13538_s23 = sld [smem:[#allocation11_spill]] }
  0x3f   : > { %v11101_v56 = vld [vmem:[%s12090_s9 + $0x30] sm:$0xff]   ;;  %v11104_v57 = vld [vmem:[%s12090_s9 + $0x18] sm:$0xff]   ;;  %v11106_v59 = vld [vmem:[%s12090_s9 + $0x68] sm:$0xff]  }
  0x40   : > { %10591 = vmatmul.mubr.msk.bf16.vlgmr.msra.gmra.mxu0 %vm981_vm0, %v962_v9  ;;  %v11105_v58 = vld [vmem:[%s12090_s9 + $0x10] sm:$0xff]   ;;  %v11107_v7 = vld [vmem:[%s12090_s9 + $0x60] sm:$0xff]   ;;  %v11108_v11 = vld [vmem:[%s12090_s9 + $0x58] sm:$0xff]  }
  0x41   : > { %10594 = vmatprep.mubr.msk.bf16.mxu0 %vm981_vm0, %v963_v10 }
  0x48   : > { %10595 = vmatmul.mubr.msk.bf16.gmra.mxu0 %vm981_vm0, %v964_v13 }
  0x49   : > { %10622 = vmatprep.mubr.msk.bf16.mxu0 %vm1099_vm1, %v11091_v15 }
 0x100   : > { %v10592_v16 = vpop.f32.mrf.mxu0 }
 0x101   : > { %v1037_v32 = vadd.f32 %v10592_v16, %v9436_v20 }
 0x102   : > { %v1028_v17 = vpop.f32.mrf.mxu0 }
 0x103   : > { %v1061_v39 = vmax.f32 %v1037_v32, 0.0  ;;  %v1029_v40 = vadd.f32 %v9436_v20, %v1028_v17  ;;  %v11109_v17 = vld [vmem:[%s12090_s9 + $0x50] sm:$0xff]  }
 0x104   : > { %v10593_v18 = vpop.f32.mrf.mxu0 }
 0x105   : > { %v1040_v28 = vadd.f32 %v10593_v18, %v9436_v20  ;;  %v1059_v43 = vmax.f32 %v1029_v40, 0.0 }
 0x106   : > { %v1031_v19 = vpop.f32.mrf.mxu0 }
 0x107   : > { %v1062_v36 = vmax.f32 %v1040_v28, 0.0  ;;  %v1032_v37 = vadd.f32 %v9436_v20, %v1031_v19 }
 0x108   : > { %v10596_v21 = vpop.f32.mrf.mxu0 }
 0x109   : > { %v1053_v23 = vadd.f32 %v10596_v21, %v9436_v20  ;;  %v1068_v41 = vpack.c.bf16 %v1062_v36, %v1061_v39  ;;  %v1060_v42 = vmax.f32 %v1032_v37, 0.0  ;;  %v9467_v39 = vld [vmem:[%s12095_s13 + $0x1] ss:$0 sm:$0xff] }
 0x10a   : > { %v1044_v22 = vpop.f32.mrf.mxu0 }
 0x10b   : > { %v1045_v25 = vadd.f32 %v9436_v20, %v1044_v22  ;;  %v1065_v29 = vmax.f32 %v1053_v23, 0.0  ;;  %v1067_v44 = vpack.c.bf16 %v1060_v42, %v1059_v43  ;;  %v12310_v23 = vld [vmem:[%s12200_s20] sm:$0xff]  }
 0x10c   : > { %v10597_v24 = vpop.f32.mrf.mxu0 }
 0x10d   : > { %v1056_v26 = vadd.f32 %v10597_v24, %v9436_v20  ;;  %v1063_v33 = vmax.f32 %v1045_v25, 0.0  ;;  %v11110_v24 = vld [vmem:[%s12100_s17 + $0x18] sm:$0xff]   ;;  %v11111_v25 = vld [vmem:[%s12100_s17 + $0x10] sm:$0xff]  }
 0x10e   : > { %v1047_v27 = vpop.f32.mrf.mxu0 }
 0x10f   : > { %v1066_v30 = vmax.f32 %v1056_v26, 0.0  ;;  %v1048_v31 = vadd.f32 %v9436_v20, %v1047_v27  ;;  %v11112_v26 = vld [vmem:[%s12100_s17 + $0x8] sm:$0xff]   ;;  %v11113_v27 = vld [vmem:[%s12100_s17] sm:$0xff]  }
 0x111   : > { %v1070_v34 = vpack.c.bf16 %v1066_v30, %v1065_v29  ;;  %v1064_v35 = vmax.f32 %v1048_v31, 0.0 }
 0x113   : > { %v1069_v38 = vpack.c.bf16 %v1064_v35, %v1063_v33  ;;  %10598 = vmatprep.subr.bf16.mxu1 %v1070_v34  ;;  %10614 = vmatprep.subr.bf16.mxu0 %v1070_v34 }
 0x114   : > { %10599 = vmatpush3.bf16.msra.mxu1 %v1070_v34  ;;  %10615 = vmatpush3.bf16.msra.mxu0 %v1070_v34 }
 0x115   : > { %10600 = vmatprep.subr.bf16.mxu1 %v1069_v38  ;;  %10616 = vmatprep.subr.bf16.mxu0 %v1069_v38 }
 0x118   : > { %10601 = vmatpush3.bf16.msra.mxu1 %v1069_v38  ;;  %10617 = vmatpush3.bf16.msra.mxu0 %v1069_v38 }
 0x119   : > { %10602 = vmatprep.subr.bf16.mxu1 %v1068_v41  ;;  %10618 = vmatprep.subr.bf16.mxu0 %v1068_v41 }
 0x11c   : > { %10603 = vmatpush3.bf16.msra.mxu1 %v1068_v41  ;;  %10619 = vmatpush3.bf16.msra.mxu0 %v1068_v41 }
 0x11d   : > { %10604 = vmatprep.subr.bf16.mxu1 %v1067_v44  ;;  %10620 = vmatprep.subr.bf16.mxu0 %v1067_v44 }
 0x120   : > { %10605 = vmatpush3.bf16.msra.mxu1 %v1067_v44  ;;  %10621 = vmatpush3.bf16.msra.mxu0 %v1067_v44 }
 0x121   : > { %10646 = vmatprep.subr.bf16.mxu0 %v11094_v45  ;;  %10630 = vmatprep.subr.bf16.mxu1 %v11102_v46 }
 0x123   : > { %10607 = vmatmul.mubr.msk.bf16.vlgmr.msra.gmra.mxu1 %vm1099_vm1, %v12258_v47  ;;  %10623 = vmatmul.mubr.msk.bf16.vlgmr.msra.gmra.mxu0 %vm1099_vm1, %v12261_v48 }
 0x124   : > { %10647 = vmatpush3.bf16.msra.mxu0 %v11094_v45  ;;  %10610 = vmatprep.mubr.msk.bf16.mxu1 %vm1099_vm1, %v12264_v49 }
 0x125   : > { %10648 = vmatprep.subr.bf16.mxu0 %v11095_v50  ;;  %10626 = vmatprep.mubr.msk.bf16.mxu0 %vm1099_vm1, %v12268_v51 }
 0x126   : > { %10631 = vmatpush3.bf16.msra.mxu1 %v11102_v46 }
 0x127   : > { %10632 = vmatprep.subr.bf16.mxu1 %v11103_v52 }
 0x128   : > { %10649 = vmatpush3.bf16.msra.mxu0 %v11095_v50 }
 0x129   : > { %10650 = vmatprep.subr.bf16.mxu0 %v11100_v53 }
 0x12a   : > { %10633 = vmatpush3.bf16.msra.mxu1 %v11103_v52 }
 0x12b   : > { %10611 = vmatmul.mubr.msk.bf16.gmra.mxu1 %vm1099_vm1, %v12281_v54  ;;  %10627 = vmatmul.mubr.msk.bf16.gmra.mxu0 %vm1099_vm1, %v12284_v55 }
 0x12c   : > { %10651 = vmatpush3.bf16.msra.mxu0 %v11100_v53  ;;  %10654 = vmatprep.mubr.msk.bf16.mxu0 %vm1099_vm1, %v1067_v44 }
 0x12d   : > { %10652 = vmatprep.subr.bf16.mxu0 %v11101_v56  ;;  %10634 = vmatprep.subr.bf16.mxu1 %v11104_v57 }
 0x12e   : > { %10635 = vmatpush3.bf16.msra.mxu1 %v11104_v57 }
 0x12f   : > { %10636 = vmatprep.subr.bf16.mxu1 %v11105_v58 }
 0x130   : > { %10653 = vmatpush3.bf16.msra.mxu0 %v11101_v56 }
 0x131   : > { %10678 = vmatprep.subr.bf16.mxu0 %v11110_v24 }
 0x132   : > { %10637 = vmatpush3.bf16.msra.mxu1 %v11105_v58 }
 0x133   : > { %10655 = vmatmul.mubr.msk.bf16.vlgmr.msra.gmra.mxu0 %vm1099_vm1, %v1068_v41  ;;  %10662 = vmatprep.subr.bf16.mxu1 %v11106_v59 }
 0x134   : > { %10658 = vmatprep.mubr.msk.bf16.mxu0 %vm1099_vm1, %v1069_v38  ;;  %10679 = vmatpush3.bf16.msra.mxu0 %v11110_v24 }
 0x135   : > { %10680 = vmatprep.subr.bf16.mxu0 %v11111_v25 }
 0x138   : > { %10681 = vmatpush3.bf16.msra.mxu0 %v11111_v25 }
 0x139   : > { %10682 = vmatprep.subr.bf16.mxu0 %v11112_v26 }
 0x13b   : > { %10659 = vmatmul.mubr.msk.bf16.gmra.mxu0 %vm1099_vm1, %v1070_v34 }
 0x13c   : > { %10683 = vmatpush3.bf16.msra.mxu0 %v11112_v26 }
 0x13d   : > { %10684 = vmatprep.subr.bf16.mxu0 %v11113_v27 }
 0x140   : > { %10685 = vmatpush3.bf16.msra.mxu0 %v11113_v27 }
 0x1e3   : > { %v10608_v60 = vpop.f32.mrf.mxu1  ;;  %v10624_v61 = vpop.f32.mrf.mxu0 }
 0x1e5   : > { %v1146_v62 = vpop.f32.mrf.mxu1  ;;  %v1256_v63 = vpop.f32.mrf.mxu0 }
 0x1e7   : > { %v10609_v0 = vpop.f32.mrf.mxu1  ;;  %v10625_v1 = vpop.f32.mrf.mxu0 }
 0x1e8   : > { %v1178_v5 = vpack.c.bf16 %v10609_v0, %v10608_v60  ;;  %v1288_v21 = vpack.c.bf16 %v10625_v1, %v10624_v61 }
 0x1e9   : > { %v1149_v2 = vpop.f32.mrf.mxu1  ;;  %v1259_v3 = vpop.f32.mrf.mxu0 }
 0x1ea   : > { %v1177_v4 = vpack.c.bf16 %v1149_v2, %v1146_v62  ;;  %v1287_v14 = vpack.c.bf16 %v1259_v3, %v1256_v63 }
 0x1eb   : > { %v10612_v6 = vpop.f32.mrf.mxu1  ;;  %v10628_v8 = vpop.f32.mrf.mxu0 }
 0x1ec   : > { %10638 = vmatprep.mubr.msk.bf16.mxu1 %vm1099_vm1, %v1177_v4 }
 0x1ed   : > { %v1162_v9 = vpop.f32.mrf.mxu1  ;;  %10639 = vmatmul.mubr.msk.bf16.vlgmr.msra.gmra.mxu1 %vm1099_vm1, %v1178_v5  ;;  %v1272_v12 = vpop.f32.mrf.mxu0 }
 0x1ee   : > { %10663 = vmatpush3.bf16.msra.mxu1 %v11106_v59 }
 0x1ef   : > { %v10613_v10 = vpop.f32.mrf.mxu1  ;;  %10664 = vmatprep.subr.bf16.mxu1 %v11107_v7  ;;  %v10629_v18 = vpop.f32.mrf.mxu0 }
 0x1f0   : > { %v1180_v16 = vpack.c.bf16 %v10613_v10, %v10612_v6  ;;  %v1290_v22 = vpack.c.bf16 %v10629_v18, %v10628_v8 }
 0x1f1   : > { %v1165_v13 = vpop.f32.mrf.mxu1  ;;  %v1275_v19 = vpop.f32.mrf.mxu0 }
 0x1f2   : > { %v1179_v15 = vpack.c.bf16 %v1165_v13, %v1162_v9  ;;  %10665 = vmatpush3.bf16.msra.mxu1 %v11107_v7  ;;  %v1289_v20 = vpack.c.bf16 %v1275_v19, %v1272_v12 }
 0x1f3   : > { %10666 = vmatprep.subr.bf16.mxu1 %v11108_v11  ;;  %v10656_v28 = vpop.f32.mrf.mxu0 }
 0x1f4   : > { %10642 = vmatprep.mubr.msk.bf16.mxu1 %vm1099_vm1, %v1179_v15 }
 0x1f5   : > { %10643 = vmatmul.mubr.msk.bf16.gmra.mxu1 %vm1099_vm1, %v1180_v16  ;;  %v1466_v31 = vpop.f32.mrf.mxu0 }
 0x1f6   : > { %10667 = vmatpush3.bf16.msra.mxu1 %v11108_v11  ;;  %10670 = vmatprep.mubr.msk.bf16.mxu1 %vm1099_vm1, %v1287_v14 }
 0x1f7   : > { %10668 = vmatprep.subr.bf16.mxu1 %v11109_v17  ;;  %v10657_v34 = vpop.f32.mrf.mxu0 }
 0x1f9   : > { %v1469_v37 = vpop.f32.mrf.mxu0 }
 0x1fa   : > { %10669 = vmatpush3.bf16.msra.mxu1 %v11109_v17 }
 0x1fb   : > { %v10660_v43 = vpop.f32.mrf.mxu0 }
 0x1fd   : > { %10671 = vmatmul.mubr.msk.bf16.vlgmr.msra.gmra.mxu1 %vm1099_vm1, %v1288_v21  ;;  %v1482_v56 = vpop.f32.mrf.mxu0 }
 0x1fe   : > { %10674 = vmatprep.mubr.msk.bf16.mxu1 %vm1099_vm1, %v1289_v20 }
 0x1ff   : > { %v10661_v3 = vpop.f32.mrf.mxu0 }
 0x201   : > { %v1485_v15 = vpop.f32.mrf.mxu0 }
 0x205   : > { %10675 = vmatmul.mubr.msk.bf16.gmra.mxu1 %vm1099_vm1, %v1290_v22 }
 0x206   : > { %10702 = vmatprep.mubr.msk.bf16.mxu1 %vm1099_vm1, %v12310_v23 }
 0x2ad   : > { %v10640_v29 = vpop.f32.mrf.mxu1 }
 0x2ae   : > { %v1374_v44 = vadd.f32 %v10640_v29, %v9467_v39 }
 0x2af   : > { %v1365_v30 = vpop.f32.mrf.mxu1 }
 0x2b0   : > { %v1366_v41 = vadd.f32 %v9467_v39, %v1365_v30  ;;  %v1499_v57 = vadd.f32 %v10656_v28, %v1374_v44 }
 0x2b1   : > { %v10641_v32 = vpop.f32.mrf.mxu1 }
 0x2b2   : > { %v1377_v42 = vadd.f32 %v10641_v32, %v9467_v39  ;;  %v1497_v52 = vadd.f32 %v1466_v31, %v1366_v41  ;;  %v12364_v32 = vld [vmem:[%s12200_s20 + $0x40] sm:$0xff]  }
 0x2b3   : > { %v1368_v33 = vpop.f32.mrf.mxu1 }
 0x2b4   : > { %v1369_v46 = vadd.f32 %v9467_v39, %v1368_v33  ;;  %v1500_v53 = vadd.f32 %v10657_v34, %v1377_v42 }
 0x2b5   : > { %v10644_v35 = vpop.f32.mrf.mxu1 }
 0x2b6   : > { %v1498_v61 = vadd.f32 %v1469_v37, %v1369_v46  ;;  %v1390_v4 = vadd.f32 %v10644_v35, %v9467_v39 }
 0x2b7   : > { %v1381_v36 = vpop.f32.mrf.mxu1 }
 0x2b8   : > { %v1382_v0 = vadd.f32 %v9467_v39, %v1381_v36  ;;  %v1503_v17 = vadd.f32 %v10660_v43, %v1390_v4 }
 0x2b9   : > { %v10645_v38 = vpop.f32.mrf.mxu1 }
 0x2ba   : > { %v1393_v1 = vadd.f32 %v10645_v38, %v9467_v39  ;;  %v1501_v13 = vadd.f32 %v1482_v56, %v1382_v0  ;;  %v9492_v38 = vld [vmem:[%s12105_s21] ss:$0 sm:$0xff] }
 0x2bb   : > { %v1384_v40 = vpop.f32.mrf.mxu1 }
 0x2bc   : > { %v1385_v7 = vadd.f32 %v9467_v39, %v1384_v40  ;;  %v1504_v14 = vadd.f32 %v10661_v3, %v1393_v1 }
 0x2bd   : > { %v10672_v45 = vpop.f32.mrf.mxu1 }
 0x2be   : > { %v12323_v62 = vadd.f32 %v10672_v45, %v1499_v57  ;;  %v1502_v21 = vadd.f32 %v1485_v15, %v1385_v7  ;;  %v11119_v15 = vld [vmem:[%s12100_s17 + $0x30] sm:$0xff]  }
 0x2bf   : > { %v1575_v50 = vpop.f32.mrf.mxu1 }
 0x2c0   : > { %v12319_v59 = vadd.f32 %v1575_v50, %v1497_v52  ;;  %v1624_v10 = vmax.f32 %v12323_v62, 0.0 }
 0x2c1   : > { %v10673_v58 = vpop.f32.mrf.mxu1 }
 0x2c2   : > { %v12321_v60 = vadd.f32 %v10673_v58, %v1500_v53  ;;  %v1622_v8 = vmax.f32 %v12319_v59, 0.0 }
 0x2c3   : > { %v1578_v63 = vpop.f32.mrf.mxu1 }
 0x2c4   : > { %v12325_v2 = vadd.f32 %v1578_v63, %v1498_v61  ;;  %v1625_v5 = vmax.f32 %v12321_v60, 0.0 }
 0x2c5   : > { %v10676_v6 = vpop.f32.mrf.mxu1 }
 0x2c6   : > { %v1623_v9 = vmax.f32 %v12325_v2, 0.0  ;;  %v1665_v16 = vpack.c.bf16 %v1625_v5, %v1624_v10  ;;  %v12344_v22 = vadd.f32 %v10676_v6, %v1503_v17 }
 0x2c7   : > { %v1591_v11 = vpop.f32.mrf.mxu1 }
 0x2c8   : > { %v1664_v12 = vpack.c.bf16 %v1623_v9, %v1622_v8  ;;  %v12339_v19 = vadd.f32 %v1591_v11, %v1501_v13  ;;  %v1628_v29 = vmax.f32 %v12344_v22, 0.0  ;;  %v11118_v13 = vld [vmem:[%s12100_s17 + $0x38] sm:$0xff]  }
 0x2c9   : > { %v10677_v18 = vpop.f32.mrf.mxu1 }
 0x2ca   : > { %v12341_v20 = vadd.f32 %v10677_v18, %v1504_v14  ;;  %10686 = vmatprep.mubr.msk.bf16.mxu0 %vm1099_vm1, %v1664_v12  ;;  %v1626_v27 = vmax.f32 %v12339_v19, 0.0  ;;  %v11114_v12 = vld [vmem:[%s12100_s17 + $0x58] sm:$0xff]   ;;  %v11115_v14 = vld [vmem:[%s12100_s17 + $0x50] sm:$0xff]  }
 0x2cb   : > { %v1594_v24 = vpop.f32.mrf.mxu1  ;;  %10687 = vmatmul.mubr.msk.bf16.vlgmr.msra.gmra.mxu0 %vm1099_vm1, %v1665_v16  ;;  %v11116_v16 = vld [vmem:[%s12100_s17 + $0x48] sm:$0xff]  }
 0x2cc   : > { %v12347_v25 = vadd.f32 %v1594_v24, %v1502_v21  ;;  %v1629_v26 = vmax.f32 %v12341_v20, 0.0 }
 0x2ce   : > { %v1627_v28 = vmax.f32 %v12347_v25, 0.0  ;;  %v1667_v31 = vpack.c.bf16 %v1629_v26, %v1628_v29 }
 0x2d0   : > { %v1666_v30 = vpack.c.bf16 %v1627_v28, %v1626_v27 }
 0x2d2   : > { %10690 = vmatprep.mubr.msk.bf16.mxu0 %vm1099_vm1, %v1666_v30 }
 0x2d3   : > { %10691 = vmatmul.mubr.msk.bf16.gmra.mxu0 %vm1099_vm1, %v1667_v31 }
 0x2d4   : > { %10718 = vmatprep.mubr.msk.bf16.mxu0 %vm1099_vm1, %v12364_v32 }
 0x38b   : > { %v10688_v33 = vpop.f32.mrf.mxu0 }
 0x38c   : > { %v1751_v53 = vadd.f32 %v10688_v33, %v9492_v38 }
 0x38d   : > { %v1742_v34 = vpop.f32.mrf.mxu0 }
 0x38e   : > { %v1775_v1 = vmax.f32 %v1751_v53, 0.0  ;;  %v1743_v3 = vadd.f32 %v9492_v38, %v1742_v34 }
 0x38f   : > { %v10689_v35 = vpop.f32.mrf.mxu0 }
 0x390   : > { %v1754_v45 = vadd.f32 %v10689_v35, %v9492_v38  ;;  %v1773_v7 = vmax.f32 %v1743_v3, 0.0 }
 0x391   : > { %v1745_v36 = vpop.f32.mrf.mxu0 }
 0x392   : > { %v1776_v61 = vmax.f32 %v1754_v45, 0.0  ;;  %v1746_v63 = vadd.f32 %v9492_v38, %v1745_v36  ;;  %v11123_v36 = vld [vmem:[%s12100_s17 + $0x70] sm:$0xff]  }
 0x393   : > { %v10692_v37 = vpop.f32.mrf.mxu0 }
 0x394   : > { %v1767_v40 = vadd.f32 %v10692_v37, %v9492_v38  ;;  %v1782_v4 = vpack.c.bf16 %v1776_v61, %v1775_v1  ;;  %v1774_v6 = vmax.f32 %v1746_v63, 0.0  ;;  %v11127_v61 = vld [vmem:[%s12110_s25 + $0x10] sm:$0xff]   ;;  %v11128_v63 = vld [vmem:[%s12110_s25 + $0x8] sm:$0xff]  }
 0x395   : > { %v1758_v39 = vpop.f32.mrf.mxu0 }
 0x396   : > { %v1759_v42 = vadd.f32 %v9492_v38, %v1758_v39  ;;  %v1779_v46 = vmax.f32 %v1767_v40, 0.0  ;;  %v1781_v11 = vpack.c.bf16 %v1774_v6, %v1773_v7  ;;  %v11124_v40 = vld [vmem:[%s12100_s17 + $0x68] sm:$0xff]  }
 0x397   : > { %v10693_v41 = vpop.f32.mrf.mxu0 }
 0x398   : > { %v1770_v43 = vadd.f32 %v10693_v41, %v9492_v38  ;;  %v1777_v56 = vmax.f32 %v1759_v42, 0.0 }
 0x399   : > { %v1761_v44 = vpop.f32.mrf.mxu0 }
 0x39a   : > { %v1780_v50 = vmax.f32 %v1770_v43, 0.0  ;;  %v1762_v52 = vadd.f32 %v9492_v38, %v1761_v44 }
 0x39c   : > { %v1784_v57 = vpack.c.bf16 %v1780_v50, %v1779_v46  ;;  %v1778_v58 = vmax.f32 %v1762_v52, 0.0  ;;  %v11125_v46 = vld [vmem:[%s12100_s17 + $0x60] sm:$0xff]  }
 0x39e   : > { %v1783_v0 = vpack.c.bf16 %v1778_v58, %v1777_v56  ;;  %10694 = vmatprep.subr.bf16.mxu1 %v1784_v57  ;;  %10710 = vmatprep.subr.bf16.mxu0 %v1784_v57  ;;  %v11126_v58 = vld [vmem:[%s12110_s25 + $0x18] sm:$0xff]  }
 0x39f   : > { %10695 = vmatpush3.bf16.msra.mxu1 %v1784_v57  ;;  %10711 = vmatpush3.bf16.msra.mxu0 %v1784_v57 }
 0x3a0   : > { %10696 = vmatprep.subr.bf16.mxu1 %v1783_v0  ;;  %10712 = vmatprep.subr.bf16.mxu0 %v1783_v0 }
 0x3a3   : > { %10697 = vmatpush3.bf16.msra.mxu1 %v1783_v0  ;;  %10713 = vmatpush3.bf16.msra.mxu0 %v1783_v0 }
 0x3a4   : > { %10698 = vmatprep.subr.bf16.mxu1 %v1782_v4  ;;  %10714 = vmatprep.subr.bf16.mxu0 %v1782_v4 }
 0x3a7   : > { %10699 = vmatpush3.bf16.msra.mxu1 %v1782_v4  ;;  %10715 = vmatpush3.bf16.msra.mxu0 %v1782_v4 }
 0x3a8   : > { %10700 = vmatprep.subr.bf16.mxu1 %v1781_v11  ;;  %10716 = vmatprep.subr.bf16.mxu0 %v1781_v11 }
 0x3ab   : > { %10701 = vmatpush3.bf16.msra.mxu1 %v1781_v11  ;;  %10717 = vmatpush3.bf16.msra.mxu0 %v1781_v11 }
 0x3ac   : > { %10742 = vmatprep.subr.bf16.mxu0 %v11114_v12  ;;  %10726 = vmatprep.subr.bf16.mxu1 %v11118_v13 }
 0x3ae   : > { %10703 = vmatmul.mubr.msk.bf16.vlgmr.msra.gmra.mxu1 %vm1099_vm1, %v12258_v47  ;;  %10719 = vmatmul.mubr.msk.bf16.vlgmr.msra.gmra.mxu0 %vm1099_vm1, %v12261_v48  ;;  %v11117_v47 = vld [vmem:[%s12100_s17 + $0x40] sm:$0xff]   ;;  %v11120_v48 = vld [vmem:[%s12100_s17 + $0x28] sm:$0xff]  }
 0x3af   : > { %10743 = vmatpush3.bf16.msra.mxu0 %v11114_v12  ;;  %10706 = vmatprep.mubr.msk.bf16.mxu1 %vm1099_vm1, %v12264_v49  ;;  %v11121_v49 = vld [vmem:[%s12100_s17 + $0x20] sm:$0xff]  }
 0x3b0   : > { %10744 = vmatprep.subr.bf16.mxu0 %v11115_v14  ;;  %10722 = vmatprep.mubr.msk.bf16.mxu0 %vm1099_vm1, %v12268_v51  ;;  %v11122_v51 = vld [vmem:[%s12100_s17 + $0x78] sm:$0xff]  }
 0x3b1   : > { %10727 = vmatpush3.bf16.msra.mxu1 %v11118_v13 }
 0x3b2   : > { %10728 = vmatprep.subr.bf16.mxu1 %v11119_v15 }
 0x3b3   : > { %10745 = vmatpush3.bf16.msra.mxu0 %v11115_v14  ;;  %v9509_v14 = vld [vmem:[%s12105_s21 + $0x1] ss:$0 sm:$0xff] }
 0x3b4   : > { %10746 = vmatprep.subr.bf16.mxu0 %v11116_v16 }
 0x3b5   : > { %10729 = vmatpush3.bf16.msra.mxu1 %v11119_v15 }
 0x3b6   : > { %10707 = vmatmul.mubr.msk.bf16.gmra.mxu1 %vm1099_vm1, %v12281_v54  ;;  %10723 = vmatmul.mubr.msk.bf16.gmra.mxu0 %vm1099_vm1, %v12284_v55 }
 0x3b7   : > { %10747 = vmatpush3.bf16.msra.mxu0 %v11116_v16  ;;  %10750 = vmatprep.mubr.msk.bf16.mxu0 %vm1099_vm1, %v1781_v11 }
 0x3b8   : > { %10748 = vmatprep.subr.bf16.mxu0 %v11117_v47  ;;  %10730 = vmatprep.subr.bf16.mxu1 %v11120_v48 }
 0x3b9   : > { %10731 = vmatpush3.bf16.msra.mxu1 %v11120_v48 }
 0x3ba   : > { %10732 = vmatprep.subr.bf16.mxu1 %v11121_v49 }
 0x3bb   : > { %10749 = vmatpush3.bf16.msra.mxu0 %v11117_v47 }
 0x3bc   : > { %10774 = vmatprep.subr.bf16.mxu0 %v11126_v58 }
 0x3bd   : > { %10733 = vmatpush3.bf16.msra.mxu1 %v11121_v49 }
 0x3be   : > { %10751 = vmatmul.mubr.msk.bf16.vlgmr.msra.gmra.mxu0 %vm1099_vm1, %v1782_v4  ;;  %10758 = vmatprep.subr.bf16.mxu1 %v11122_v51 }
 0x3bf   : > { %10754 = vmatprep.mubr.msk.bf16.mxu0 %vm1099_vm1, %v1783_v0  ;;  %10775 = vmatpush3.bf16.msra.mxu0 %v11126_v58  ;;  %v11129_v0 = vld [vmem:[%s12110_s25] sm:$0xff]  }
 0x3c0   : > { %10776 = vmatprep.subr.bf16.mxu0 %v11127_v61 }
 0x3c3   : > { %10777 = vmatpush3.bf16.msra.mxu0 %v11127_v61 }
 0x3c4   : > { %10778 = vmatprep.subr.bf16.mxu0 %v11128_v63 }
 0x3c6   : > { %10755 = vmatmul.mubr.msk.bf16.gmra.mxu0 %vm1099_vm1, %v1784_v57 }
 0x3c7   : > { %10779 = vmatpush3.bf16.msra.mxu0 %v11128_v63 }
 0x3c8   : > { %10780 = vmatprep.subr.bf16.mxu0 %v11129_v0 }
 0x3cb   : > { %10781 = vmatpush3.bf16.msra.mxu0 %v11129_v0 }
 0x46e   : > { %v10704_v54 = vpop.f32.mrf.mxu1  ;;  %v10720_v55 = vpop.f32.mrf.mxu0 }
 0x470   : > { %v1819_v17 = vpop.f32.mrf.mxu1  ;;  %v1888_v18 = vpop.f32.mrf.mxu0 }
 0x472   : > { %v10705_v21 = vpop.f32.mrf.mxu1  ;;  %v10721_v24 = vpop.f32.mrf.mxu0 }
 0x473   : > { %v1851_v34 = vpack.c.bf16 %v10705_v21, %v10704_v54  ;;  %v1920_v56 = vpack.c.bf16 %v10721_v24, %v10720_v55 }
 0x474   : > { %v1822_v30 = vpop.f32.mrf.mxu1  ;;  %v1891_v31 = vpop.f32.mrf.mxu0 }
 0x475   : > { %v1850_v33 = vpack.c.bf16 %v1822_v30, %v1819_v17  ;;  %v1919_v43 = vpack.c.bf16 %v1891_v31, %v1888_v18 }
 0x476   : > { %v10708_v35 = vpop.f32.mrf.mxu1  ;;  %v10724_v37 = vpop.f32.mrf.mxu0 }
 0x477   : > { %10734 = vmatprep.mubr.msk.bf16.mxu1 %vm1099_vm1, %v1850_v33 }
 0x478   : > { %v1835_v38 = vpop.f32.mrf.mxu1  ;;  %10735 = vmatmul.mubr.msk.bf16.vlgmr.msra.gmra.mxu1 %vm1099_vm1, %v1851_v34  ;;  %v1904_v41 = vpop.f32.mrf.mxu0 }
 0x479   : > { %10759 = vmatpush3.bf16.msra.mxu1 %v11122_v51 }
 0x47a   : > { %v10709_v39 = vpop.f32.mrf.mxu1  ;;  %10760 = vmatprep.subr.bf16.mxu1 %v11123_v36  ;;  %v10725_v50 = vpop.f32.mrf.mxu0 }
 0x47b   : > { %v1853_v45 = vpack.c.bf16 %v10709_v39, %v10708_v35  ;;  %v1922_v57 = vpack.c.bf16 %v10725_v50, %v10724_v37 }
 0x47c   : > { %v1838_v42 = vpop.f32.mrf.mxu1  ;;  %v1907_v52 = vpop.f32.mrf.mxu0 }
 0x47d   : > { %v1852_v44 = vpack.c.bf16 %v1838_v42, %v1835_v38  ;;  %10761 = vmatpush3.bf16.msra.mxu1 %v11123_v36  ;;  %v1921_v53 = vpack.c.bf16 %v1907_v52, %v1904_v41 }
 0x47e   : > { %10762 = vmatprep.subr.bf16.mxu1 %v11124_v40  ;;  %v10752_v1 = vpop.f32.mrf.mxu0 }
 0x47f   : > { %10738 = vmatprep.mubr.msk.bf16.mxu1 %vm1099_vm1, %v1852_v44 }
 0x480   : > { %10739 = vmatmul.mubr.msk.bf16.gmra.mxu1 %vm1099_vm1, %v1853_v45  ;;  %v2098_v6 = vpop.f32.mrf.mxu0 }
 0x481   : > { %10763 = vmatpush3.bf16.msra.mxu1 %v11124_v40  ;;  %10766 = vmatprep.mubr.msk.bf16.mxu1 %vm1099_vm1, %v1919_v43 }
 0x482   : > { %10764 = vmatprep.subr.bf16.mxu1 %v11125_v46 }
 0x485   : > { %10765 = vmatpush3.bf16.msra.mxu1 %v11125_v46 }
 0x488   : > { %10767 = vmatmul.mubr.msk.bf16.vlgmr.msra.gmra.mxu1 %vm1099_vm1, %v1920_v56 }
 0x489   : > { %10770 = vmatprep.mubr.msk.bf16.mxu1 %vm1099_vm1, %v1921_v53 }
 0x490   : > { %10771 = vmatmul.mubr.msk.bf16.gmra.mxu1 %vm1099_vm1, %v1922_v57 }
 0x491   : > { %10798 = vmatprep.mubr.msk.bf16.mxu1 %vm1099_vm1, %v12310_v23  ;;  %v10753_v23 = vpop.f32.mrf.mxu0 }
 0x493   : > { %v2101_v15 = vpop.f32.mrf.mxu0 }
 0x495   : > { %v10756_v54 = vpop.f32.mrf.mxu0 }
 0x497   : > { %v2114_v33 = vpop.f32.mrf.mxu0 }
 0x499   : > { %v10757_v45 = vpop.f32.mrf.mxu0 }
 0x49b   : > { %v2117_v62 = vpop.f32.mrf.mxu0 }
 0x538   : > { %v10736_v3 = vpop.f32.mrf.mxu1 }
 0x539   : > { %v2006_v48 = vadd.f32 %v10736_v3, %v9509_v14 }
 0x53a   : > { %v1997_v4 = vpop.f32.mrf.mxu1 }
 0x53b   : > { %v1998_v47 = vadd.f32 %v9509_v14, %v1997_v4  ;;  %v2131_v21 = vadd.f32 %v10752_v1, %v2006_v48 }
 0x53c   : > { %v10737_v7 = vpop.f32.mrf.mxu1 }
 0x53d   : > { %v2009_v51 = vadd.f32 %v10737_v7, %v9509_v14  ;;  %v2129_v18 = vadd.f32 %v2098_v6, %v1998_v47 }
 0x53e   : > { %v2000_v11 = vpop.f32.mrf.mxu1 }
 0x53f   : > { %v2001_v17 = vadd.f32 %v9509_v14, %v2000_v11  ;;  %v2132_v31 = vadd.f32 %v10753_v23, %v2009_v51 }
 0x540   : > { %v10740_v12 = vpop.f32.mrf.mxu1 }
 0x541   : > { %v2130_v38 = vadd.f32 %v2101_v15, %v2001_v17  ;;  %v2022_v39 = vadd.f32 %v10740_v12, %v9509_v14 }
 0x542   : > { %v2013_v13 = vpop.f32.mrf.mxu1 }
 0x543   : > { %v2014_v36 = vadd.f32 %v9509_v14, %v2013_v13 }
 0x544   : > { %v10741_v16 = vpop.f32.mrf.mxu1 }
 0x545   : > { %v2025_v41 = vadd.f32 %v10741_v16, %v9509_v14  ;;  %v2133_v56 = vadd.f32 %v2114_v33, %v2014_v36  ;;  %v9534_v16 = vld [vmem:[%s12115_s29] ss:$0 sm:$0xff] }
 0x546   : > { %v2016_v49 = vpop.f32.mrf.mxu1 }
 0x547   : > { %v2017_v52 = vadd.f32 %v9509_v14, %v2016_v49  ;;  %v2136_v61 = vadd.f32 %v10757_v45, %v2025_v41  ;;  %v11130_v45 = vld [vmem:[%s12110_s25 + $0x58] sm:$0xff]  }
 0x548   : > { %v10768_v55 = vpop.f32.mrf.mxu1 }
 0x549   : > { %v2240_v34 = vadd.f32 %v10768_v55, %v2131_v21  ;;  %v2134_v1 = vadd.f32 %v2117_v62, %v2017_v52  ;;  %v11131_v52 = vld [vmem:[%s12110_s25 + $0x50] sm:$0xff]   ;;  %v11132_v62 = vld [vmem:[%s12110_s25 + $0x48] sm:$0xff]  }
 0x54a   : > { %v2207_v24 = vpop.f32.mrf.mxu1 }
 0x54b   : > { %v2238_v30 = vadd.f32 %v2207_v24, %v2129_v18  ;;  %v12422_v46 = vadd.f32 %v2240_v34, %v1624_v10 }
 0x54c   : > { %v10769_v35 = vpop.f32.mrf.mxu1 }
 0x54d   : > { %v2241_v37 = vadd.f32 %v10769_v35, %v2132_v31  ;;  %v12414_v42 = vadd.f32 %v2238_v30, %v1622_v8  ;;  %v2135_v8 = vadd.f32 %v10756_v54, %v2022_v39  ;;  %v2256_v10 = vmax.f32 %v12422_v46, 0.0 }
 0x54e   : > { %v2210_v40 = vpop.f32.mrf.mxu1 }
 0x54f   : > { %v12418_v43 = vadd.f32 %v2241_v37, %v1625_v5  ;;  %v2239_v44 = vadd.f32 %v2210_v40, %v2130_v38  ;;  %v2254_v60 = vmax.f32 %v12414_v42, 0.0 }
 0x550   : > { %v10772_v50 = vpop.f32.mrf.mxu1 }
 0x551   : > { %v12426_v53 = vadd.f32 %v2239_v44, %v1623_v9  ;;  %v2257_v59 = vmax.f32 %v12418_v43, 0.0  ;;  %v2244_v63 = vadd.f32 %v10772_v50, %v2135_v8  ;;  %v11134_v50 = vld [vmem:[%s12110_s25 + $0x38] sm:$0xff]   ;;  %v12032_v8 = vld [vmem:[%s12200_s20 + $0x48] sm:$0xff]  }
 0x552   : > { %v2223_v57 = vpop.f32.mrf.mxu1 }
 0x553   : > { %v2255_v5 = vmax.f32 %v12426_v53, 0.0  ;;  %v2242_v58 = vadd.f32 %v2223_v57, %v2133_v56  ;;  %v2297_v3 = vpack.c.bf16 %v2257_v59, %v2256_v10  ;;  %v12451_v23 = vadd.f32 %v2244_v63, %v1628_v29  ;;  %v12031_v56 = vld [vmem:[%s12200_s20 + $0x8] sm:$0xff]   ;;  %v11135_v57 = vld [vmem:[%s12110_s25 + $0x30] sm:$0xff]   ;;  %v11133_v63 = vld [vmem:[%s12110_s25 + $0x40] sm:$0xff]  }
 0x554   : > { %v10773_v0 = vpop.f32.mrf.mxu1 }
 0x555   : > { %v2296_v2 = vpack.c.bf16 %v2255_v5, %v2254_v60  ;;  %v2245_v9 = vadd.f32 %v10773_v0, %v2136_v61  ;;  %v12442_v6 = vadd.f32 %v2242_v58, %v1626_v27  ;;  %v2260_v27 = vmax.f32 %v12451_v23, 0.0  ;;  %v12033_v58 = vld [vmem:[%s12200_s20 + $0x10] sm:$0xff]   ;;  %v12035_v0 = vld [vmem:[%s12200_s20 + $0x18] sm:$0xff]  }
 0x556   : > { %v2226_v4 = vpop.f32.mrf.mxu1  ;;  %v12034_v61 = vld [vmem:[%s12200_s20 + $0x50] sm:$0xff]  }
 0x557   : > { %v12446_v7 = vadd.f32 %v2245_v9, %v1629_v26  ;;  %v2243_v11 = vadd.f32 %v2226_v4, %v2134_v1  ;;  %10782 = vmatprep.mubr.msk.bf16.mxu0 %vm1099_vm1, %v2296_v2  ;;  %v2258_v20 = vmax.f32 %v12442_v6, 0.0  ;;  %v12036_v2 = vld [vmem:[%s12200_s20 + $0x58] sm:$0xff]   ;;  %v11136_v9 = vld [vmem:[%s12110_s25 + $0x28] sm:$0xff]   ;;  %v11137_v1 = vld [vmem:[%s12110_s25 + $0x20] sm:$0xff]  }
 0x558   : > { %10783 = vmatmul.mubr.msk.bf16.vlgmr.msra.gmra.mxu0 %vm1099_vm1, %v2297_v3  ;;  %v11138_v3 = vld [vmem:[%s12110_s25 + $0x78] sm:$0xff]  }
 0x559   : > { %v12456_v12 = vadd.f32 %v2243_v11, %v1627_v28  ;;  %v2261_v19 = vmax.f32 %v12446_v7, 0.0 }
 0x55b   : > { %v2259_v26 = vmax.f32 %v12456_v12, 0.0  ;;  %v2299_v25 = vpack.c.bf16 %v2261_v19, %v2260_v27 }
 0x55d   : > { %v2298_v22 = vpack.c.bf16 %v2259_v26, %v2258_v20 }
 0x55f   : > { %10786 = vmatprep.mubr.msk.bf16.mxu0 %vm1099_vm1, %v2298_v22 }
 0x560   : > { %10787 = vmatmul.mubr.msk.bf16.gmra.mxu0 %vm1099_vm1, %v2299_v25 }
 0x561   : > { %10814 = vmatprep.mubr.msk.bf16.mxu0 %vm1099_vm1, %v12364_v32 }
 0x618   : > { %v10784_v28 = vpop.f32.mrf.mxu0 }
 0x619   : > { %v2383_v30 = vadd.f32 %v10784_v28, %v9534_v16 }
 0x61a   : > { %v2374_v29 = vpop.f32.mrf.mxu0 }
 0x61b   : > { %v2407_v37 = vmax.f32 %v2383_v30, 0.0  ;;  %v2375_v38 = vadd.f32 %v9534_v16, %v2374_v29 }
 0x61c   : > { %v10785_v13 = vpop.f32.mrf.mxu0 }
 0x61d   : > { %v2386_v17 = vadd.f32 %v10785_v13, %v9534_v16  ;;  %v2405_v41 = vmax.f32 %v2375_v38, 0.0  ;;  %v11142_v38 = vld [vmem:[%s12120_s3 + $0x30] ss:$8 sps:$4 sm:$0xff]  }
 0x61e   : > { %v2377_v14 = vpop.f32.mrf.mxu0 }
 0x61f   : > { %v2408_v34 = vmax.f32 %v2386_v17, 0.0  ;;  %v2378_v35 = vadd.f32 %v9534_v16, %v2377_v14 }
 0x620   : > { %v10788_v15 = vpop.f32.mrf.mxu0 }
 0x621   : > { %v2399_v48 = vadd.f32 %v10788_v15, %v9534_v16  ;;  %v2414_v39 = vpack.c.bf16 %v2408_v34, %v2407_v37  ;;  %v2406_v40 = vmax.f32 %v2378_v35, 0.0  ;;  %v11144_v37 = vld [vmem:[%s12120_s3 + $0x34] ss:$8 sps:$4 sm:$0xff]  }
 0x622   : > { %v2390_v47 = vpop.f32.mrf.mxu0 }
 0x623   : > { %v2391_v51 = vadd.f32 %v9534_v16, %v2390_v47  ;;  %v2411_v18 = vmax.f32 %v2399_v48, 0.0  ;;  %v2413_v44 = vpack.c.bf16 %v2406_v40, %v2405_v41  ;;  %v11139_v48 = vld [vmem:[%s12110_s25 + $0x70] sm:$0xff]   ;;  %v11145_v40 = vld [vmem:[%s12120_s3 + $0x20] ss:$8 sps:$4 sm:$0xff]  }
 0x624   : > { %v10789_v49 = vpop.f32.mrf.mxu0  ;;  %v11150_v41 = vld [vmem:[%s12120_s3 + $0x14] ss:$8 sps:$4 sm:$0xff]  }
 0x625   : > { %v2402_v54 = vadd.f32 %v10789_v49, %v9534_v16  ;;  %v2409_v31 = vmax.f32 %v2391_v51, 0.0 }
 0x626   : > { %v2393_v55 = vpop.f32.mrf.mxu0 }
 0x627   : > { %v2412_v21 = vmax.f32 %v2402_v54, 0.0  ;;  %v2394_v24 = vadd.f32 %v9534_v16, %v2393_v55  ;;  %v11140_v55 = vld [vmem:[%s12110_s25 + $0x68] sm:$0xff]  }
 0x629   : > { %v2416_v33 = vpack.c.bf16 %v2412_v21, %v2411_v18  ;;  %v2410_v32 = vmax.f32 %v2394_v24, 0.0 }
 0x62b   : > { %v2415_v36 = vpack.c.bf16 %v2410_v32, %v2409_v31  ;;  %10790 = vmatprep.subr.bf16.mxu1 %v2416_v33  ;;  %10806 = vmatprep.subr.bf16.mxu0 %v2416_v33  ;;  %v11141_v31 = vld [vmem:[%s12110_s25 + $0x60] sm:$0xff]  }
 0x62c   : > { %10791 = vmatpush3.bf16.msra.mxu1 %v2416_v33  ;;  %10807 = vmatpush3.bf16.msra.mxu0 %v2416_v33 }
 0x62d   : > { %10792 = vmatprep.subr.bf16.mxu1 %v2415_v36  ;;  %10808 = vmatprep.subr.bf16.mxu0 %v2415_v36 }
 0x630   : > { %10793 = vmatpush3.bf16.msra.mxu1 %v2415_v36  ;;  %10809 = vmatpush3.bf16.msra.mxu0 %v2415_v36 }
 0x631   : > { %10794 = vmatprep.subr.bf16.mxu1 %v2414_v39  ;;  %10810 = vmatprep.subr.bf16.mxu0 %v2414_v39 }
 0x634   : > { %10795 = vmatpush3.bf16.msra.mxu1 %v2414_v39  ;;  %10811 = vmatpush3.bf16.msra.mxu0 %v2414_v39 }
 0x635   : > { %10796 = vmatprep.subr.bf16.mxu1 %v2413_v44  ;;  %10812 = vmatprep.subr.bf16.mxu0 %v2413_v44 }
 0x638   : > { %10797 = vmatpush3.bf16.msra.mxu1 %v2413_v44  ;;  %10813 = vmatpush3.bf16.msra.mxu0 %v2413_v44 }
 0x639   : > { %10838 = vmatprep.subr.bf16.mxu0 %v11130_v45  ;;  %10822 = vmatprep.subr.bf16.mxu1 %v11134_v50 }
 0x63b   : > { %10799 = vmatmul.mubr.msk.bf16.vlgmr.msra.gmra.mxu1 %vm1099_vm1, %v12031_v56  ;;  %10815 = vmatmul.mubr.msk.bf16.vlgmr.msra.gmra.mxu0 %vm1099_vm1, %v12032_v8 }
 0x63c   : > { %10839 = vmatpush3.bf16.msra.mxu0 %v11130_v45  ;;  %10802 = vmatprep.mubr.msk.bf16.mxu1 %vm1099_vm1, %v12033_v58  ;;  %v11153_v45 = vld [vmem:[%s12120_s3 + $0x4] ss:$8 sps:$4 sm:$0xff]  }
 0x63d   : > { %10840 = vmatprep.subr.bf16.mxu0 %v11131_v52  ;;  %10818 = vmatprep.mubr.msk.bf16.mxu0 %vm1099_vm1, %v12034_v61 }
 0x63e   : > { %10823 = vmatpush3.bf16.msra.mxu1 %v11134_v50  ;;  %v11151_v50 = vld [vmem:[%s12120_s3] ss:$8 sps:$4 sm:$0xff]  }
 0x63f   : > { %10824 = vmatprep.subr.bf16.mxu1 %v11135_v57 }
 0x640   : > { %10841 = vmatpush3.bf16.msra.mxu0 %v11131_v52  ;;  %v12076_v52 = vmov 0  }
 0x641   : > { %10842 = vmatprep.subr.bf16.mxu0 %v11132_v62 }
 0x642   : > { %10825 = vmatpush3.bf16.msra.mxu1 %v11135_v57 }
 0x643   : > { %10803 = vmatmul.mubr.msk.bf16.gmra.mxu1 %vm1099_vm1, %v12035_v0  ;;  %10819 = vmatmul.mubr.msk.bf16.gmra.mxu0 %vm1099_vm1, %v12036_v2 }
 0x644   : > { %10843 = vmatpush3.bf16.msra.mxu0 %v11132_v62  ;;  %10846 = vmatprep.mubr.msk.bf16.mxu0 %vm1099_vm1, %v2413_v44  ;;  %v11148_v44 = vld [vmem:[%s12120_s3 + $0x10] ss:$8 sps:$4 sm:$0xff]  }
 0x645   : > { %10844 = vmatprep.subr.bf16.mxu0 %v11133_v63  ;;  %10826 = vmatprep.subr.bf16.mxu1 %v11136_v9 }
 0x646   : > { %10827 = vmatpush3.bf16.msra.mxu1 %v11136_v9  ;;  %v9551_v9 = vld [vmem:[%s12115_s29 + $0x1] ss:$0 sm:$0xff] }
 0x647   : > { %10828 = vmatprep.subr.bf16.mxu1 %v11137_v1 }
 0x648   : > { %10845 = vmatpush3.bf16.msra.mxu0 %v11133_v63 }
 0x649   : > { %3017 = vmatprep.subr.bf16.mxu0 %v11144_v37 }
 0x64a   : > { %10829 = vmatpush3.bf16.msra.mxu1 %v11137_v1 }
 0x64b   : > { %10847 = vmatmul.mubr.msk.bf16.vlgmr.msra.gmra.mxu0 %vm1099_vm1, %v2414_v39  ;;  %10854 = vmatprep.subr.bf16.mxu1 %v11138_v3  ;;  %v11147_v39 = vld [vmem:[%s12120_s3 + $0x24] ss:$8 sps:$4 sm:$0xff]  }
 0x64c   : > { %10850 = vmatprep.mubr.msk.bf16.mxu0 %vm1099_vm1, %v2415_v36  ;;  %3018 = vmatpush1.bf16.msra.mxu0 %v11142_v38 }
 0x64d   : > { %3019 = vmatprep.subr.bf16.mxu0 %v11147_v39 }
 0x650   : > { %3020 = vmatpush1.bf16.msra.mxu0 %v11145_v40 }
 0x651   : > { %3021 = vmatprep.subr.bf16.mxu0 %v11150_v41 }
 0x653   : > { %10851 = vmatmul.mubr.msk.bf16.gmra.mxu0 %vm1099_vm1, %v2416_v33 }
 0x654   : > { %3022 = vmatpush1.bf16.msra.mxu0 %v11148_v44  ;;  %3041 = vmatprep.mubr.bf16.mxu0 %v12076_v52 }
 0x655   : > { %3023 = vmatprep.subr.bf16.mxu0 %v11153_v45 }
 0x658   : > { %3024 = vmatpush1.bf16.msra.mxu0 %v11151_v50 }
 0x6fb   : > { %v10800_v4 = vpop.f32.mrf.mxu1  ;;  %v10816_v11 = vpop.f32.mrf.mxu0 }
 0x6fd   : > { %v2451_v22 = vpop.f32.mrf.mxu1  ;;  %v2520_v25 = vpop.f32.mrf.mxu0 }
 0x6ff   : > { %v10801_v28 = vpop.f32.mrf.mxu1  ;;  %v10817_v29 = vpop.f32.mrf.mxu0 }
 0x700   : > { %v2483_v16 = vpack.c.bf16 %v10801_v28, %v10800_v4  ;;  %v2552_v35 = vpack.c.bf16 %v10817_v29, %v10816_v11 }
 0x701   : > { %v2454_v13 = vpop.f32.mrf.mxu1  ;;  %v2523_v14 = vpop.f32.mrf.mxu0 }
 0x702   : > { %v2482_v15 = vpack.c.bf16 %v2454_v13, %v2451_v22  ;;  %v2551_v21 = vpack.c.bf16 %v2523_v14, %v2520_v25 }
 0x703   : > { %v10804_v47 = vpop.f32.mrf.mxu1  ;;  %v10820_v49 = vpop.f32.mrf.mxu0 }
 0x704   : > { %10830 = vmatprep.mubr.msk.bf16.mxu1 %vm1099_vm1, %v2482_v15 }
 0x705   : > { %v2467_v51 = vpop.f32.mrf.mxu1  ;;  %10831 = vmatmul.mubr.msk.bf16.vlgmr.msra.gmra.mxu1 %vm1099_vm1, %v2483_v16  ;;  %v2536_v17 = vpop.f32.mrf.mxu0 }
 0x706   : > { %10855 = vmatpush3.bf16.msra.mxu1 %v11138_v3 }
 0x707   : > { %v10805_v54 = vpop.f32.mrf.mxu1  ;;  %10856 = vmatprep.subr.bf16.mxu1 %v11139_v48  ;;  %v10821_v33 = vpop.f32.mrf.mxu0 }
 0x708   : > { %v2485_v30 = vpack.c.bf16 %v10805_v54, %v10804_v47  ;;  %v2554_v36 = vpack.c.bf16 %v10821_v33, %v10820_v49 }
 0x709   : > { %v2470_v18 = vpop.f32.mrf.mxu1  ;;  %v2539_v32 = vpop.f32.mrf.mxu0 }
 0x70a   : > { %v2484_v24 = vpack.c.bf16 %v2470_v18, %v2467_v51  ;;  %10857 = vmatpush3.bf16.msra.mxu1 %v11139_v48  ;;  %v2553_v34 = vpack.c.bf16 %v2539_v32, %v2536_v17 }
 0x70b   : > { %10858 = vmatprep.subr.bf16.mxu1 %v11140_v55  ;;  %v10848_v8 = vpop.f32.mrf.mxu0 }
 0x70c   : > { %10834 = vmatprep.mubr.msk.bf16.mxu1 %vm1099_vm1, %v2484_v24 }
 0x70d   : > { %10835 = vmatmul.mubr.msk.bf16.gmra.mxu1 %vm1099_vm1, %v2485_v30  ;;  %v2730_v61 = vpop.f32.mrf.mxu0 }
 0x70e   : > { %10859 = vmatpush3.bf16.msra.mxu1 %v11140_v55  ;;  %10862 = vmatprep.mubr.msk.bf16.mxu1 %vm1099_vm1, %v2551_v21 }
 0x70f   : > { %10860 = vmatprep.subr.bf16.mxu1 %v11141_v31  ;;  %v10849_v0 = vpop.f32.mrf.mxu0 }
 0x711   : > { %v2733_v4 = vpop.f32.mrf.mxu0 }
 0x712   : > { %10861 = vmatpush3.bf16.msra.mxu1 %v11141_v31 }
 0x713   : > { %v10852_v29 = vpop.f32.mrf.mxu0 }
 0x715   : > { %10863 = vmatmul.mubr.msk.bf16.vlgmr.msra.gmra.mxu1 %vm1099_vm1, %v2552_v35  ;;  %v2746_v49 = vpop.f32.mrf.mxu0 }
 0x716   : > { %10866 = vmatprep.mubr.msk.bf16.mxu1 %vm1099_vm1, %v2553_v34 }
 0x717   : > { %v10853_v31 = vpop.f32.mrf.mxu0 }
 0x719   : > { %v2749_v39 = vpop.f32.mrf.mxu0 }
 0x71d   : > { %10867 = vmatmul.mubr.msk.bf16.gmra.mxu1 %vm1099_vm1, %v2554_v36 }
 0x7c5   : > { %v10832_v56 = vpop.f32.mrf.mxu1 }
 0x7c6   : > { %v2638_v47 = vadd.f32 %v10832_v56, %v9551_v9 }
 0x7c7   : > { %v2629_v57 = vpop.f32.mrf.mxu1 }
 0x7c8   : > { %v2630_v3 = vadd.f32 %v9551_v9, %v2629_v57  ;;  %v2763_v21 = vadd.f32 %v10848_v8, %v2638_v47 }
 0x7c9   : > { %v10833_v58 = vpop.f32.mrf.mxu1 }
 0x7ca   : > { %v2761_v28 = vadd.f32 %v2730_v61, %v2630_v3  ;;  %v2641_v14 = vadd.f32 %v10833_v58, %v9551_v9  ;;  %v11158_v3 = vld [vmem:[%s12205_s27 + $0x20] sm:$0xff]  }
 0x7cb   : > { %v2632_v62 = vpop.f32.mrf.mxu1 }
 0x7cc   : > { %v2633_v25 = vadd.f32 %v9551_v9, %v2632_v62  ;;  %v2764_v55 = vadd.f32 %v10849_v0, %v2641_v14 }
 0x7cd   : > { %v10836_v63 = vpop.f32.mrf.mxu1 }
 0x7ce   : > { %v2762_v48 = vadd.f32 %v2733_v4, %v2633_v25  ;;  %v2654_v57 = vadd.f32 %v10836_v63, %v9551_v9 }
 0x7cf   : > { %v2645_v2 = vpop.f32.mrf.mxu1 }
 0x7d0   : > { %v2646_v38 = vadd.f32 %v9551_v9, %v2645_v2  ;;  %v2767_v58 = vadd.f32 %v10852_v29, %v2654_v57  ;;  %v11157_v57 = vld [vmem:[%s12205_s27 + $0x18] sm:$0xff]  }
 0x7d1   : > { %v10837_v1 = vpop.f32.mrf.mxu1 }
 0x7d2   : > { %v2657_v50 = vadd.f32 %v10837_v1, %v9551_v9  ;;  %v11154_v1 = vld [vmem:[%s12205_s27] sm:$0xff]  }
 0x7d3   : > { %v2648_v11 = vpop.f32.mrf.mxu1  ;;  %10878 = vmatprep.mubr.msk.bf16.mxu1 %vm1099_vm1, %v11154_v1  ;;  %v11176_v1 = vld [vmem:[%s12125_s8 + $0xb8] sm:$0xff]  }
 0x7d4   : > { %v2649_v32 = vadd.f32 %v9551_v9, %v2648_v11 }
 0x7d5   : > { %v10864_v22 = vpop.f32.mrf.mxu1 }
 0x7d6   : > { %v2872_v34 = vadd.f32 %v10864_v22, %v2763_v21  ;;  %v2766_v44 = vadd.f32 %v2749_v39, %v2649_v32 }
 0x7d7   : > { %v2839_v13 = vpop.f32.mrf.mxu1 }
 0x7d8   : > { %v2870_v15 = vadd.f32 %v2839_v13, %v2761_v28  ;;  %v2880_v41 = vadd.f32 %v2872_v34, %v2256_v10  ;;  %v2768_v10 = vadd.f32 %v10853_v31, %v2657_v50  ;;  %v11163_v50 = vld [vmem:[%s12125_s8 + $0x30] sm:$0xff]  }
 0x7d9   : > { %v10865_v16 = vpop.f32.mrf.mxu1 }
 0x7da   : > { %v2878_v54 = vadd.f32 %v2870_v15, %v2254_v60  ;;  %v2873_v24 = vadd.f32 %v10865_v16, %v2764_v55  ;;  %v2888_v56 = vmax.f32 %v2880_v41, 0.0  ;;  %v9588_v16 = vld [vmem:[%s12130_s14] ss:$0 sm:$0xff]  ;;  %v11155_v41 = vld [vmem:[%s12205_s27 + $0x8] sm:$0xff]  }
 0x7db   : > { %v2842_v51 = vpop.f32.mrf.mxu1 }
 0x7dc   : > { %v2871_v17 = vadd.f32 %v2842_v51, %v2762_v48  ;;  %v2886_v35 = vmax.f32 %v2878_v54, 0.0  ;;  %v2881_v42 = vadd.f32 %v2873_v24, %v2257_v59 }
 0x7dd   : > { %v10868_v18 = vpop.f32.mrf.mxu1 }
 0x7de   : > { %v2879_v30 = vadd.f32 %v2871_v17, %v2255_v5  ;;  %v2889_v53 = vmax.f32 %v2881_v42, 0.0  ;;  %v2765_v5 = vadd.f32 %v2746_v49, %v2646_v38  ;;  %v2876_v0 = vadd.f32 %v10868_v18, %v2767_v58  ;;  %v11165_v58 = vld [vmem:[%s12125_s8 + $0x28] sm:$0xff]  }
 0x7df   : > { %v2855_v33 = vpop.f32.mrf.mxu1 }
 0x7e0   : > { %v2887_v36 = vmax.f32 %v2879_v30, 0.0  ;;  %v2874_v8 = vadd.f32 %v2855_v33, %v2765_v5  ;;  %v2954_v43 = vpack.c.bf16 %v2889_v53, %v2888_v56  ;;  %v2884_v6 = vadd.f32 %v2876_v0, %v2260_v27  ;;  %v11156_v53 = vld [vmem:[%s12205_s27 + $0x10] sm:$0xff]   ;;  %v11161_v5 = vld [vmem:[%s12125_s8 + $0x38] sm:$0xff]  }
 0x7e1   : > { %v10869_v37 = vpop.f32.mrf.mxu1  ;;  %v11168_v0 = vld [vmem:[%s12125_s8 + $0x58] sm:$0xff]  }
 0x7e2   : > { %v2953_v60 = vpack.c.bf16 %v2887_v36, %v2886_v35  ;;  %v2882_v46 = vadd.f32 %v2874_v8, %v2258_v20  ;;  %v2877_v61 = vadd.f32 %v10869_v37, %v2768_v10  ;;  %v11164_v10 = vld [vmem:[%s12125_s8 + $0x68] sm:$0xff]  }
 0x7e3   : > { %v2858_v40 = vpop.f32.mrf.mxu1 }
 0x7e4   : > { %9584 = vmatmul.mubr.msk.bf16.vlgmr.msra.gmra.mxu0 %vm1099_vm1, %v2953_v60  ;;  %v2875_v45 = vadd.f32 %v2858_v40, %v2766_v44  ;;  %v2890_v2 = vmax.f32 %v2882_v46, 0.0  ;;  %v2885_v63 = vadd.f32 %v2877_v61, %v2261_v19  ;;  %v11160_v40 = vld [vmem:[%s12125_s8 + $0x78] sm:$0xff]   ;;  %v11159_v44 = vld [vmem:[%s12205_s27 + $0x28] sm:$0xff]   ;;  %v11166_v61 = vld [vmem:[%s12125_s8 + $0x60] sm:$0xff]  }
 0x7e5   : > { %3051 = vmatprep.mubr.bf16.mxu0 %v12076_v52 }
 0x7e6   : > { %v2883_v59 = vadd.f32 %v2875_v45, %v2259_v26  ;;  %v2893_v20 = vmax.f32 %v2885_v63, 0.0  ;;  %v2892_v26 = vmax.f32 %v2884_v6, 0.0  ;;  %v11162_v45 = vld [vmem:[%s12125_s8 + $0x70] sm:$0xff]   ;;  %v11172_v6 = vld [vmem:[%s12125_s8 + $0x48] sm:$0xff]  }
 0x7e7   : > { %v11170_v63 = vld [vmem:[%s12125_s8 + $0x50] sm:$0xff]  }
 0x7e8   : > { %v2891_v62 = vmax.f32 %v2883_v59, 0.0  ;;  %v2956_v9 = vpack.c.bf16 %v2893_v20, %v2892_v26  ;;  %v11173_v20 = vld [vmem:[%s12125_s8 + $0x8] sm:$0xff]   ;;  %v11174_v26 = vld [vmem:[%s12125_s8 + $0x40] sm:$0xff]  }
 0x7ea   : > { %v2955_v12 = vpack.c.bf16 %v2891_v62, %v2890_v2  ;;  %v11167_v62 = vld [vmem:[%s12125_s8 + $0x20] sm:$0xff]   ;;  %v11169_v2 = vld [vmem:[%s12125_s8 + $0x18] sm:$0xff]  }
 0x7ec   : > { %9585 = vmatmul.mubr.msk.bf16.gmra.mxu0 %vm1099_vm1, %v2954_v43 }
 0x7ed   : > { %3061 = vmatprep.mubr.bf16.mxu0 %v12076_v52 }
 0x7f4   : > { %9586 = vmatmul.mubr.msk.bf16.gmra.mxu0 %vm1099_vm1, %v2955_v12  ;;  %v11171_v12 = vld [vmem:[%s12125_s8 + $0x10] sm:$0xff]  }
 0x7f5   : > { %3071 = vmatprep.mubr.bf16.mxu0 %v12076_v52 }
 0x7fc   : > { %9587 = vmatmul.mubr.msk.bf16.gmra.mxu0 %vm1099_vm1, %v2956_v9  ;;  %v11175_v9 = vld [vmem:[%s12125_s8] sm:$0xff]  }
 0x7fd   : > { %10902 = vmatprep.mubr.msk.bf16.mxu0 %vm1099_vm1, %v11158_v3 }
 0x8a4   : > { %v3043_v7 = vpop.f32.mrf.mxu0 }
 0x8a5   : > { %v3086_v36 = vadd.f32 %v9588_v16, %v3043_v7 }
 0x8a6   : > { %v12548_v19 = vpop.f32.mrf.mxu0 }
 0x8a7   : > { %v3094_v60 = vmax.f32 %v3086_v36, 0.0  ;;  %v11190_v36 = vld [vmem:[%s12135_s19 + $0x8] sm:$0xff]  }
 0x8a8   : > { %v3047_v23 = vpop.f32.mrf.mxu0 }
 0x8a9   : > { %v3087_v32 = vadd.f32 %v9588_v16, %v3047_v23 }
 0x8aa   : > { %v12550_v27 = vpop.f32.mrf.mxu0 }
 0x8ab   : > { %v3095_v38 = vmax.f32 %v3087_v32, 0.0  ;;  %v3567_v46 = vpack.c.bf16 %v12550_v27, %v12548_v19  ;;  %v11187_v32 = vld [vmem:[%s12135_s19 + $0x20] sm:$0xff]  }
 0x8ac   : > { %v3053_v4 = vpop.f32.mrf.mxu0 }
 0x8ad   : > { %v3088_v30 = vadd.f32 %v9588_v16, %v3053_v4  ;;  %v3102_v39 = vpack.c.bf16 %v3095_v38, %v3094_v60 }
 0x8ae   : > { %v12552_v11 = vpop.f32.mrf.mxu0 }
 0x8af   : > { %v3096_v37 = vmax.f32 %v3088_v30, 0.0  ;;  %v11184_v30 = vld [vmem:[%s12135_s19 + $0x38] sm:$0xff]  }
 0x8b0   : > { %v3057_v22 = vpop.f32.mrf.mxu0 }
 0x8b1   : > { %v3089_v17 = vadd.f32 %v9588_v16, %v3057_v22 }
 0x8b2   : > { %v12554_v25 = vpop.f32.mrf.mxu0 }
 0x8b3   : > { %v3097_v34 = vmax.f32 %v3089_v17, 0.0  ;;  %v3568_v59 = vpack.c.bf16 %v12554_v25, %v12552_v11  ;;  %v11181_v17 = vld [vmem:[%s12125_s8 + $0x90] sm:$0xff]  }
 0x8b4   : > { %v3063_v28 = vpop.f32.mrf.mxu0 }
 0x8b5   : > { %v3090_v54 = vadd.f32 %v9588_v16, %v3063_v28  ;;  %v3103_v42 = vpack.c.bf16 %v3097_v34, %v3096_v37  ;;  %v11188_v34 = vld [vmem:[%s12135_s19 + $0x18] sm:$0xff]   ;;  %v11191_v37 = vld [vmem:[%s12135_s19] sm:$0xff]  }
 0x8b6   : > { %v12556_v29 = vpop.f32.mrf.mxu0 }
 0x8b7   : > { %v3098_v31 = vmax.f32 %v3090_v54, 0.0  ;;  %v11179_v54 = vld [vmem:[%s12125_s8 + $0xa0] sm:$0xff]  }
 0x8b8   : > { %v3067_v13 = vpop.f32.mrf.mxu0 }
 0x8b9   : > { %v3091_v48 = vadd.f32 %v9588_v16, %v3067_v13 }
 0x8ba   : > { %v12558_v14 = vpop.f32.mrf.mxu0 }
 0x8bb   : > { %v3099_v18 = vmax.f32 %v3091_v48, 0.0  ;;  %v3569_v43 = vpack.c.bf16 %v12558_v14, %v12556_v29  ;;  %v11177_v14 = vld [vmem:[%s12125_s8 + $0xb0] sm:$0xff]  }
 0x8bc   : > { %v3073_v15 = vpop.f32.mrf.mxu0 }
 0x8bd   : > { %v3092_v49 = vadd.f32 %v9588_v16, %v3073_v15  ;;  %v3104_v35 = vpack.c.bf16 %v3099_v18, %v3098_v31  ;;  %v11182_v18 = vld [vmem:[%s12125_s8 + $0x88] sm:$0xff]   ;;  %v11185_v31 = vld [vmem:[%s12135_s19 + $0x30] sm:$0xff]  }
 0x8be   : > { %v3075_v47 = vpop.f32.mrf.mxu0 }
 0x8bf   : > { %v3100_v21 = vmax.f32 %v3092_v49, 0.0 }
 0x8c0   : > { %v3077_v51 = vpop.f32.mrf.mxu0 }
 0x8c1   : > { %v3093_v55 = vadd.f32 %v9588_v16, %v3077_v51 }
 0x8c2   : > { %v3079_v56 = vpop.f32.mrf.mxu0 }
 0x8c3   : > { %v3101_v24 = vmax.f32 %v3093_v55, 0.0  ;;  %v3570_v8 = vpack.c.bf16 %v3079_v56, %v3075_v47  ;;  %v11178_v47 = vld [vmem:[%s12125_s8 + $0xa8] sm:$0xff]   ;;  %v11180_v55 = vld [vmem:[%s12125_s8 + $0x98] sm:$0xff]  }
 0x8c5   : > { %v3105_v33 = vpack.c.bf16 %v3101_v24, %v3100_v21  ;;  %v11183_v21 = vld [vmem:[%s12125_s8 + $0x80] sm:$0xff]  }
 0x8c7   : > { %10870 = vmatprep.subr.bf16.mxu1 %v3105_v33  ;;  %10894 = vmatprep.subr.bf16.mxu0 %v3105_v33 }
 0x8c8   : > { %10871 = vmatpush3.bf16.msra.mxu1 %v3105_v33  ;;  %10895 = vmatpush3.bf16.msra.mxu0 %v3105_v33 }
 0x8c9   : > { %10872 = vmatprep.subr.bf16.mxu1 %v3104_v35  ;;  %10896 = vmatprep.subr.bf16.mxu0 %v3104_v35 }
 0x8cc   : > { %10873 = vmatpush3.bf16.msra.mxu1 %v3104_v35  ;;  %10897 = vmatpush3.bf16.msra.mxu0 %v3104_v35 }
 0x8cd   : > { %10874 = vmatprep.subr.bf16.mxu1 %v3103_v42  ;;  %10898 = vmatprep.subr.bf16.mxu0 %v3103_v42 }
 0x8d0   : > { %10875 = vmatpush3.bf16.msra.mxu1 %v3103_v42  ;;  %10899 = vmatpush3.bf16.msra.mxu0 %v3103_v42 }
 0x8d1   : > { %10876 = vmatprep.subr.bf16.mxu1 %v3102_v39  ;;  %10900 = vmatprep.subr.bf16.mxu0 %v3102_v39 }
 0x8d4   : > { %10877 = vmatpush3.bf16.msra.mxu1 %v3102_v39  ;;  %10901 = vmatpush3.bf16.msra.mxu0 %v3102_v39 }
 0x8d5   : > { %10882 = vmatprep.subr.bf16.mxu1 %v3105_v33  ;;  %10430 = vmatprep.subr.bf16.mxu0 %v11160_v40 }
 0x8d7   : > { %10879 = vmatmul.mubr.msk.bf16.vlgmr.msra.gmra.mxu1 %vm1099_vm1, %v11155_v41  ;;  %10903 = vmatmul.mubr.msk.bf16.vlgmr.msra.gmra.mxu0 %vm1099_vm1, %v11159_v44 }
 0x8d8   : > { %10883 = vmatpush3.bf16.msra.mxu1 %v3105_v33  ;;  %10890 = vmatprep.mubr.msk.bf16.mxu1 %vm1099_vm1, %v11156_v53  ;;  %v11186_v33 = vld [vmem:[%s12135_s19 + $0x28] sm:$0xff]  }
 0x8d9   : > { %10884 = vmatprep.subr.bf16.mxu1 %v3104_v35  ;;  %10431 = vmatpush3.bf16.msra.mxu0 %v11161_v5 }
 0x8da   : > { %10432 = vmatprep.subr.bf16.mxu0 %v11162_v45 }
 0x8dc   : > { %10885 = vmatpush3.bf16.msra.mxu1 %v3104_v35  ;;  %v11189_v35 = vld [vmem:[%s12135_s19 + $0x10] sm:$0xff]  }
 0x8dd   : > { %10886 = vmatprep.subr.bf16.mxu1 %v3103_v42  ;;  %10433 = vmatpush3.bf16.msra.mxu0 %v11163_v50 }
 0x8de   : > { %10434 = vmatprep.subr.bf16.mxu0 %v11164_v10  ;;  %v9634_v10 = vld [vmem:[%s12130_s14 + $0x2] ss:$0 sm:$0xff] }
 0x8e0   : > { %10887 = vmatpush3.bf16.msra.mxu1 %v3103_v42 }
 0x8e1   : > { %10888 = vmatprep.subr.bf16.mxu1 %v3102_v39  ;;  %10435 = vmatpush3.bf16.msra.mxu0 %v11165_v58 }
 0x8e2   : > { %10436 = vmatprep.subr.bf16.mxu0 %v11166_v61 }
 0x8e4   : > { %10889 = vmatpush3.bf16.msra.mxu1 %v3102_v39 }
 0x8e5   : > { %10926 = vmatprep.subr.bf16.mxu1 %v3570_v8  ;;  %10437 = vmatpush3.bf16.msra.mxu0 %v11167_v62 }
 0x8e6   : > { %10438 = vmatprep.subr.bf16.mxu0 %v11168_v0 }
 0x8e7   : > { %10891 = vmatmul.mubr.msk.bf16.vlgmr.msra.gmra.mxu1 %vm1099_vm1, %v11157_v57 }
 0x8e8   : > { %10927 = vmatpush3.bf16.msra.mxu1 %v3570_v8  ;;  %10934 = vmatprep.mubr.msk.bf16.mxu1 %vm1099_vm1, %v11156_v53  ;;  %v9609_v8 = vld [vmem:[%s12130_s14 + $0x1] ss:$0 sm:$0xff] }
 0x8e9   : > { %10928 = vmatprep.subr.bf16.mxu1 %v3569_v43  ;;  %10439 = vmatpush3.bf16.msra.mxu0 %v11169_v2 }
 0x8ea   : > { %10440 = vmatprep.subr.bf16.mxu0 %v11170_v63 }
 0x8ec   : > { %10929 = vmatpush3.bf16.msra.mxu1 %v3569_v43 }
 0x8ed   : > { %10930 = vmatprep.subr.bf16.mxu1 %v3568_v59  ;;  %10441 = vmatpush3.bf16.msra.mxu0 %v11171_v12 }
 0x8ee   : > { %10442 = vmatprep.subr.bf16.mxu0 %v11172_v6 }
 0x8f0   : > { %10931 = vmatpush3.bf16.msra.mxu1 %v3568_v59 }
 0x8f1   : > { %10932 = vmatprep.subr.bf16.mxu1 %v3567_v46  ;;  %10443 = vmatpush3.bf16.msra.mxu0 %v11173_v20 }
 0x8f2   : > { %10444 = vmatprep.subr.bf16.mxu0 %v11174_v26 }
 0x8f4   : > { %10933 = vmatpush3.bf16.msra.mxu1 %v3567_v46 }
 0x8f5   : > { %10445 = vmatpush3.bf16.msra.mxu0 %v11175_v9 }
 0x8f6   : > { %10906 = vmatprep.subr.bf16.mxu0 %v11176_v1 }
 0x8f7   : > { %10935 = vmatmul.mubr.msk.bf16.vlgmr.msra.gmra.mxu1 %vm1099_vm1, %v11157_v57 }
 0x997   : > { %v10880_v3 = vpop.f32.mrf.mxu1  ;;  %v10904_v4 = vpop.f32.mrf.mxu0 }
 0x999   : > { %v3160_v7 = vpop.f32.mrf.mxu1  ;;  %v3304_v25 = vpop.f32.mrf.mxu0 }
 0x99b   : > { %v10881_v19 = vpop.f32.mrf.mxu1  ;;  %v10905_v15 = vpop.f32.mrf.mxu0 }
 0x99c   : > { %v3176_v51 = vpack.c.bf16 %v10881_v19, %v10880_v3  ;;  %v3320_v24 = vpack.c.bf16 %v10905_v15, %v10904_v4 }
 0x99d   : > { %v3163_v23 = vpop.f32.mrf.mxu1  ;;  %v3307_v48 = vpop.f32.mrf.mxu0 }
 0x99e   : > { %v3175_v13 = vpack.c.bf16 %v3163_v23, %v3160_v7  ;;  %v3319_v49 = vpack.c.bf16 %v3307_v48, %v3304_v25  ;;  %v11205_v48 = vld [vmem:[%s12135_s19 + $0xf0] sm:$0xff]  }
 0x9a7   : > { %v10892_v27 = vpop.f32.mrf.mxu1 }
 0x9a9   : > { %v3232_v11 = vpop.f32.mrf.mxu1 }
 0x9ab   : > { %v10893_v22 = vpop.f32.mrf.mxu1 }
 0x9ac   : > { %v3248_v16 = vpack.c.bf16 %v10893_v22, %v10892_v27 }
 0x9ad   : > { %v3235_v28 = vpop.f32.mrf.mxu1 }
 0x9ae   : > { %v3247_v29 = vpack.c.bf16 %v3235_v28, %v3232_v11 }
 0x9b0   : > { %3501 = vmatprep.mubr.bf16.mxu0 %v3247_v29 }
 0x9b1   : > { %3502 = vmatmul.mubr.bf16.vlgmr.msra.gmra.mxu0 %v3175_v13 }
 0x9b2   : > { %10907 = vmatpush3.bf16.msra.mxu0 %v11176_v1  ;;  %3509 = vmatprep.mubr.bf16.mxu0 %v3248_v16  ;;  %v11192_v16 = vld [vmem:[%s12210_s4] sm:$0xff]  }
 0x9b3   : > { %10908 = vmatprep.subr.bf16.mxu0 %v11177_v14  ;;  %10962 = vmatprep.mubr.msk.bf16.mxu1 %vm981_vm0, %v11192_v16 }
 0x9b6   : > { %10909 = vmatpush3.bf16.msra.mxu0 %v11177_v14 }
 0x9b7   : > { %10910 = vmatprep.subr.bf16.mxu0 %v11178_v47  ;;  %v10936_v53 = vpop.f32.mrf.mxu1 }
 0x9b8   : > { %v3618_v63 = vadd.f32 %v10936_v53, %v9634_v10  ;;  %v11199_v53 = vld [vmem:[%s12135_s19 + $0x70] sm:$0xff]  }
 0x9b9   : > { %3510 = vmatmul.mubr.bf16.gmra.mxu0 %v3176_v51  ;;  %v3609_v45 = vpop.f32.mrf.mxu1  ;;  %v11211_v51 = vld [vmem:[%s12135_s19 + $0xe0] sm:$0xff]  }
 0x9ba   : > { %10911 = vmatpush3.bf16.msra.mxu0 %v11178_v47  ;;  %10922 = vmatprep.mubr.bf16.mxu0 %v3319_v49  ;;  %v3610_v26 = vadd.f32 %v9634_v10, %v3609_v45  ;;  %v11202_v47 = vld [vmem:[%s12135_s19 + $0xf8] sm:$0xff]   ;;  %v11208_v49 = vld [vmem:[%s12135_s19 + $0xe8] sm:$0xff]  }
 0x9bb   : > { %10912 = vmatprep.subr.bf16.mxu0 %v11179_v54  ;;  %v10937_v43 = vpop.f32.mrf.mxu1  ;;  %v11201_v45 = vld [vmem:[%s12135_s19 + $0x68] sm:$0xff]  }
 0x9bc   : > { %v3621_v9 = vadd.f32 %v10937_v43, %v9634_v10  ;;  %v11209_v43 = vld [vmem:[%s12135_s19 + $0x90] sm:$0xff]  }
 0x9bd   : > { %v3612_v6 = vpop.f32.mrf.mxu1 }
 0x9be   : > { %10913 = vmatpush3.bf16.msra.mxu0 %v11179_v54  ;;  %v3613_v19 = vadd.f32 %v9634_v10, %v3612_v6  ;;  %v11213_v10 = vld [vmem:[%s12135_s19 + $0x48] sm:$0xff]  }
 0x9bf   : > { %10914 = vmatprep.subr.bf16.mxu0 %v11180_v55 }
 0x9c2   : > { %10915 = vmatpush3.bf16.msra.mxu0 %v11180_v55  ;;  %v9637_v55 = vld [vmem:[%s13529_s16] ss:$0 sm:$0xff] }
 0x9c3   : > { %10916 = vmatprep.subr.bf16.mxu0 %v11181_v17 }
 0x9c6   : > { %10917 = vmatpush3.bf16.msra.mxu0 %v11181_v17 }
 0x9c7   : > { %10918 = vmatprep.subr.bf16.mxu0 %v11182_v18 }
 0x9ca   : > { %10919 = vmatpush3.bf16.msra.mxu0 %v11182_v18 }
 0x9cb   : > { %10920 = vmatprep.subr.bf16.mxu0 %v11183_v21 }
 0x9ce   : > { %10921 = vmatpush3.bf16.msra.mxu0 %v11183_v21 }
 0x9cf   : > { %10938 = vmatprep.subr.bf16.mxu0 %v11184_v30 }
 0x9d1   : > { %10923 = vmatmul.mubr.bf16.vlgmr.msra.gmra.mxu0 %v3320_v24 }
 0x9d2   : > { %10939 = vmatpush3.bf16.msra.mxu0 %v11184_v30 }
 0x9d3   : > { %10940 = vmatprep.subr.bf16.mxu0 %v11185_v31 }
 0x9d6   : > { %10941 = vmatpush3.bf16.msra.mxu0 %v11185_v31 }
 0x9d7   : > { %10942 = vmatprep.subr.bf16.mxu0 %v11186_v33 }
 0x9da   : > { %10943 = vmatpush3.bf16.msra.mxu0 %v11186_v33 }
 0x9db   : > { %10944 = vmatprep.subr.bf16.mxu0 %v11187_v32 }
 0x9de   : > { %10945 = vmatpush3.bf16.msra.mxu0 %v11187_v32 }
 0x9df   : > { %10946 = vmatprep.subr.bf16.mxu0 %v11188_v34 }
 0x9e2   : > { %10947 = vmatpush3.bf16.msra.mxu0 %v11188_v34 }
 0x9e3   : > { %10948 = vmatprep.subr.bf16.mxu0 %v11189_v35 }
 0x9e6   : > { %10949 = vmatpush3.bf16.msra.mxu0 %v11189_v35 }
 0x9e7   : > { %10950 = vmatprep.subr.bf16.mxu0 %v11190_v36 }
 0x9ea   : > { %10951 = vmatpush3.bf16.msra.mxu0 %v11190_v36 }
 0x9eb   : > { %10952 = vmatprep.subr.bf16.mxu0 %v11191_v37 }
 0x9ee   : > { %10953 = vmatpush3.bf16.msra.mxu0 %v11191_v37 }
 0x9ef   : > { %10974 = vmatprep.subr.bf16.mxu0 %v11202_v47 }
 0xa71   : > { %v10446_v38 = vpop.f32.mrf.mxu0 }
 0xa73   : > { %v10447_v42 = vpop.f32.mrf.mxu0 }
 0xa74   : > { %v10448_v50 = vadd.f32 %v10447_v42, %v10446_v38  ;;  %v11193_v42 = vld [vmem:[%s12210_s4 + $0x8] sm:$0xff]  }
 0xa75   : > { %v10449_v60 = vpop.f32.mrf.mxu0 }
 0xa76   : > { %v3504_v58 = vadd.f32 %v10448_v50, %v9609_v8  ;;  %v11203_v50 = vld [vmem:[%s12135_s19 + $0xa0] sm:$0xff]  }
 0xa77   : > { %v10450_v39 = vpop.f32.mrf.mxu0 }
 0xa78   : > { %v10451_v46 = vadd.f32 %v10450_v39, %v10449_v60  ;;  %v11194_v60 = vld [vmem:[%s12210_s4 + $0x20] sm:$0xff]   ;;  %v11196_v39 = vld [vmem:[%s12135_s19 + $0xb8] sm:$0xff]  }
 0xa79   : > { %v10452_v40 = vpop.f32.mrf.mxu0 }
 0xa7a   : > { %v3507_v3 = vadd.f32 %v10451_v46, %v9609_v8  ;;  %v11212_v46 = vld [vmem:[%s12135_s19 + $0x88] sm:$0xff]  }
 0xa7b   : > { %v10453_v41 = vpop.f32.mrf.mxu0 }
 0xa7c   : > { %v10454_v56 = vadd.f32 %v10453_v41, %v10452_v40  ;;  %v11195_v40 = vld [vmem:[%s12210_s4 + $0x28] sm:$0xff]   ;;  %v11197_v41 = vld [vmem:[%s12135_s19 + $0x78] sm:$0xff]  }
 0xa7d   : > { %v10455_v44 = vpop.f32.mrf.mxu0 }
 0xa7e   : > { %v3512_v61 = vadd.f32 %v10454_v56, %v9609_v8  ;;  %v11204_v56 = vld [vmem:[%s12135_s19 + $0x60] sm:$0xff]  }
 0xa7f   : > { %v10456_v5 = vpop.f32.mrf.mxu0 }
 0xa80   : > { %v10457_v57 = vadd.f32 %v10456_v5, %v10455_v44  ;;  %v11198_v44 = vld [vmem:[%s12135_s19 + $0xb0] sm:$0xff]   ;;  %v11200_v5 = vld [vmem:[%s12135_s19 + $0xa8] sm:$0xff]  }
 0xa82   : > { %v3515_v2 = vadd.f32 %v10457_v57, %v9609_v8  ;;  %v11206_v8 = vld [vmem:[%s12135_s19 + $0x98] sm:$0xff]  }
 0xa83   : > { %v11207_v57 = vld [vmem:[%s12135_s19 + $0x58] sm:$0xff]  }
 0xa91   : > { %v10924_v59 = vpop.f32.mrf.mxu0 }
 0xa92   : > { %v3561_v12 = vadd.f32 %v10924_v59, %v3512_v61  ;;  %v11210_v59 = vld [vmem:[%s12135_s19 + $0x50] sm:$0xff]   ;;  %v11215_v61 = vld [vmem:[%s12135_s19 + $0x80] sm:$0xff]  }
 0xa93   : > { %v3552_v62 = vpop.f32.mrf.mxu0 }
 0xa94   : > { %v3553_v0 = vadd.f32 %v3552_v62, %v3504_v58  ;;  %v12615_v11 = vadd.f32 %v3618_v63, %v3561_v12  ;;  %v11214_v58 = vld [vmem:[%s12135_s19 + $0xd8] sm:$0xff]   ;;  %v11216_v62 = vld [vmem:[%s12135_s19 + $0x40] sm:$0xff]  }
 0xa95   : > { %v10925_v20 = vpop.f32.mrf.mxu0  ;;  %v11219_v63 = vld [vmem:[%s12135_s19 + $0xc0] sm:$0xff]   ;;  %v11220_v12 = vld [vmem:[%s13530_s18 + $0x38] sm:$0xff]  }
 0xa96   : > { %v3564_v1 = vadd.f32 %v10925_v20, %v3515_v2  ;;  %v12611_v23 = vadd.f32 %v3610_v26, %v3553_v0  ;;  %v3630_v13 = vmax.f32 %v12615_v11, 0.0  ;;  %v11217_v0 = vld [vmem:[%s12135_s19 + $0xd0] sm:$0xff]   ;;  %v11218_v2 = vld [vmem:[%s12135_s19 + $0xc8] sm:$0xff]  }
 0xa97   : > { %v3555_v7 = vpop.f32.mrf.mxu0 }
 0xa98   : > { %v12613_v27 = vadd.f32 %v3621_v9, %v3564_v1  ;;  %v3556_v4 = vadd.f32 %v3555_v7, %v3507_v3  ;;  %v3628_v28 = vmax.f32 %v12611_v23, 0.0  ;;  %v11221_v3 = vld [vmem:[%s13530_s18 + $0x30] sm:$0xff]  }
 0xa9a   : > { %v12617_v22 = vadd.f32 %v3613_v19, %v3556_v4  ;;  %v3631_v25 = vmax.f32 %v12613_v27, 0.0  ;;  %v11238_v27 = vld [vmem:[%s13530_s18 + $0xf8] sm:$0xff]  }
 0xa9c   : > { %v3629_v29 = vmax.f32 %v12617_v22, 0.0  ;;  %v3699_v15 = vpack.c.bf16 %v3631_v25, %v3630_v13 }
 0xa9e   : > { %v3698_v14 = vpack.c.bf16 %v3629_v29, %v3628_v28 }
 0xaa0   : > { %10954 = vmatprep.mubr.bf16.mxu0 %v3698_v14 }
 0xaa1   : > { %10955 = vmatmul.mubr.bf16.vlgmr.msra.gmra.mxu0 %v3699_v15 }
 0xaa2   : > { %10975 = vmatpush3.bf16.msra.mxu0 %v11202_v47 }
 0xaa3   : > { %10976 = vmatprep.subr.bf16.mxu0 %v11205_v48 }
 0xaa6   : > { %10977 = vmatpush3.bf16.msra.mxu0 %v11205_v48  ;;  %v11222_v48 = vld [vmem:[%s13530_s18 + $0x28] sm:$0xff]  }
 0xaa7   : > { %10978 = vmatprep.subr.bf16.mxu0 %v11208_v49 }
 0xaaa   : > { %10979 = vmatpush3.bf16.msra.mxu0 %v11208_v49  ;;  %v11223_v49 = vld [vmem:[%s13530_s18 + $0x20] sm:$0xff]  }
 0xaab   : > { %10980 = vmatprep.subr.bf16.mxu0 %v11211_v51 }
 0xaae   : > { %10981 = vmatpush3.bf16.msra.mxu0 %v11211_v51  ;;  %v11224_v51 = vld [vmem:[%s13530_s18 + $0x18] sm:$0xff]  }
 0xaaf   : > { %10982 = vmatprep.subr.bf16.mxu0 %v11214_v58 }
 0xab2   : > { %10983 = vmatpush3.bf16.msra.mxu0 %v11214_v58  ;;  %v11228_v58 = vld [vmem:[%s12210_s4] sm:$0xff]  }
 0xab3   : > { %10984 = vmatprep.subr.bf16.mxu0 %v11217_v0 }
 0xab6   : > { %10985 = vmatpush3.bf16.msra.mxu0 %v11217_v0 }
 0xab7   : > { %10986 = vmatprep.subr.bf16.mxu0 %v11218_v2 }
 0xaba   : > { %10987 = vmatpush3.bf16.msra.mxu0 %v11218_v2  ;;  %v9683_v2 = vld [vmem:[%s13531_s28] ss:$0 sm:$0xff] }
 0xabb   : > { %10988 = vmatprep.subr.bf16.mxu0 %v11219_v63 }
 0xabe   : > { %10989 = vmatpush3.bf16.msra.mxu0 %v11219_v63 }
 0xb61   : > { %v10956_v54 = vpop.f32.mrf.mxu0 }
 0xb62   : > { %v3795_v18 = vadd.f32 %v10956_v54, %v9637_v55  ;;  %v11225_v54 = vld [vmem:[%s13530_s18 + $0x10] sm:$0xff]  }
 0xb63   : > { %v3786_v17 = vpop.f32.mrf.mxu0 }
 0xb64   : > { %v3787_v24 = vadd.f32 %v9637_v55, %v3786_v17  ;;  %v3803_v33 = vmax.f32 %v3795_v18, 0.0  ;;  %v11227_v17 = vld [vmem:[%s13530_s18] sm:$0xff]  }
 0xb65   : > { %v10957_v21 = vpop.f32.mrf.mxu0 }
 0xb66   : > { %v3798_v30 = vadd.f32 %v10957_v21, %v9637_v55  ;;  %v3801_v35 = vmax.f32 %v3787_v24, 0.0 }
 0xb67   : > { %v3789_v31 = vpop.f32.mrf.mxu0 }
 0xb68   : > { %v3804_v32 = vmax.f32 %v3798_v30, 0.0  ;;  %v3790_v34 = vadd.f32 %v9637_v55, %v3789_v31  ;;  %v11226_v55 = vld [vmem:[%s13530_s18 + $0x8] sm:$0xff]  }
 0xb6a   : > { %v12638_v36 = vpack.c.bf16 %v3804_v32, %v3803_v33  ;;  %v3802_v37 = vmax.f32 %v3790_v34, 0.0  ;;  %v9658_v33 = vld [vmem:[%s13529_s16 + $0x1] ss:$0 sm:$0xff] }
 0xb6c   : > { %v3805_v38 = vpack.c.bf16 %v3802_v37, %v3801_v35  ;;  %10958 = vmatprep.subr.bf16.mxu1 %v12638_v36 }
 0xb6d   : > { %10959 = vmatpush3.bf16.msra.mxu1 %v12638_v36 }
 0xb6e   : > { %10960 = vmatprep.subr.bf16.mxu1 %v3805_v38 }
 0xb71   : > { %10961 = vmatpush3.bf16.msra.mxu1 %v3805_v38 }
 0xb72   : > { %10966 = vmatprep.subr.bf16.mxu1 %v12638_v36 }
 0xb74   : > { %10963 = vmatmul.mubr.msk.bf16.vlgmr.msra.gmra.mxu1 %vm981_vm0, %v11193_v42 }
 0xb75   : > { %10967 = vmatpush3.bf16.msra.mxu1 %v12638_v36  ;;  %10970 = vmatprep.mubr.msk.bf16.mxu1 %vm981_vm0, %v11194_v60 }
 0xb76   : > { %10968 = vmatprep.subr.bf16.mxu1 %v3805_v38 }
 0xb79   : > { %10969 = vmatpush3.bf16.msra.mxu1 %v3805_v38 }
 0xb7a   : > { %10492 = vmatprep.subr.bf16.mxu1 %v11196_v39 }
 0xb7c   : > { %10971 = vmatmul.mubr.msk.bf16.vlgmr.msra.gmra.mxu1 %vm981_vm0, %v11195_v40 }
 0xb7d   : > { %4130 = vmatprep.mubr.bf16.mxu1 %v3805_v38  ;;  %10493 = vmatpush3.bf16.msra.mxu1 %v11197_v41 }
 0xb7e   : > { %10494 = vmatprep.subr.bf16.mxu1 %v11198_v44 }
 0xb81   : > { %10495 = vmatpush3.bf16.msra.mxu1 %v11199_v53 }
 0xb82   : > { %10496 = vmatprep.subr.bf16.mxu1 %v11200_v5 }
 0xb85   : > { %10497 = vmatpush3.bf16.msra.mxu1 %v11201_v45 }
 0xb86   : > { %10498 = vmatprep.subr.bf16.mxu1 %v11203_v50 }
 0xb89   : > { %10499 = vmatpush3.bf16.msra.mxu1 %v11204_v56 }
 0xb8a   : > { %10500 = vmatprep.subr.bf16.mxu1 %v11206_v8 }
 0xb8d   : > { %10501 = vmatpush3.bf16.msra.mxu1 %v11207_v57 }
 0xb8e   : > { %10502 = vmatprep.subr.bf16.mxu1 %v11209_v43 }
 0xb91   : > { %10503 = vmatpush3.bf16.msra.mxu1 %v11210_v59 }
 0xb92   : > { %10504 = vmatprep.subr.bf16.mxu1 %v11212_v46 }
 0xb95   : > { %10505 = vmatpush3.bf16.msra.mxu1 %v11213_v10 }
 0xb96   : > { %10506 = vmatprep.subr.bf16.mxu1 %v11215_v61  ;;  %v11244_v61 = vld [vmem:[%s13530_s18 + $0xe8] sm:$0xff]  }
 0xb99   : > { %10507 = vmatpush3.bf16.msra.mxu1 %v11216_v62  ;;  %v11247_v62 = vld [vmem:[%s13530_s18 + $0xe0] sm:$0xff]  }
 0xb9a   : > { %10994 = vmatprep.subr.bf16.mxu1 %v11220_v12 }
 0xc34   : > { %v10964_v6 = vpop.f32.mrf.mxu1 }
 0xc36   : > { %v3861_v20 = vpop.f32.mrf.mxu1 }
 0xc38   : > { %v10965_v26 = vpop.f32.mrf.mxu1 }
 0xc39   : > { %v3877_v15 = vpack.c.bf16 %v10965_v26, %v10964_v6 }
 0xc3a   : > { %v3864_v9 = vpop.f32.mrf.mxu1 }
 0xc3b   : > { %v3876_v1 = vpack.c.bf16 %v3864_v9, %v3861_v20 }
 0xc3c   : > { %v10972_v7 = vpop.f32.mrf.mxu1 }
 0xc3d   : > { %4131 = vmatmul.mubr.bf16.vlgmr.msra.gmra.mxu1 %v3876_v1 }
 0xc3e   : > { %v3933_v19 = vpop.f32.mrf.mxu1  ;;  %4138 = vmatprep.mubr.bf16.mxu1 %v12638_v36  ;;  %10995 = vmatpush3.bf16.msra.mxu1 %v11220_v12 }
 0xc3f   : > { %10996 = vmatprep.subr.bf16.mxu1 %v11221_v3 }
 0xc40   : > { %v10973_v4 = vpop.f32.mrf.mxu1 }
 0xc41   : > { %v3949_v47 = vpack.c.bf16 %v10973_v4, %v10972_v7 }
 0xc42   : > { %v3936_v14 = vpop.f32.mrf.mxu1  ;;  %10997 = vmatpush3.bf16.msra.mxu1 %v11221_v3 }
 0xc43   : > { %v3948_v16 = vpack.c.bf16 %v3936_v14, %v3933_v19  ;;  %10998 = vmatprep.subr.bf16.mxu1 %v11222_v48 }
 0xc45   : > { %4139 = vmatmul.mubr.bf16.gmra.mxu1 %v3877_v15  ;;  %10990 = vmatprep.mubr.bf16.mxu0 %v3948_v16  ;;  %v11229_v16 = vld [vmem:[%s12210_s4 + $0x8] sm:$0xff]  }
 0xc46   : > { %10991 = vmatmul.mubr.bf16.vlgmr.msra.gmra.mxu0 %v3949_v47  ;;  %10999 = vmatpush3.bf16.msra.mxu1 %v11222_v48  ;;  %v11230_v47 = vld [vmem:[%s12210_s4 + $0x20] sm:$0xff]   ;;  %v11232_v48 = vld [vmem:[%s13530_s18 + $0xb8] sm:$0xff]  }
 0xc47   : > { %11000 = vmatprep.subr.bf16.mxu1 %v11223_v49  ;;  %11018 = vmatprep.mubr.msk.bf16.mxu0 %vm981_vm0, %v11228_v58  ;;  %v11259_v58 = vld [vmem:[%s13532_s1 + $0xe8] ss:$16 sps:$4 sm:$0xff]  }
 0xc4a   : > { %11001 = vmatpush3.bf16.msra.mxu1 %v11223_v49  ;;  %v11231_v49 = vld [vmem:[%s12210_s4 + $0x28] sm:$0xff]  }
 0xc4b   : > { %11002 = vmatprep.subr.bf16.mxu1 %v11224_v51 }
 0xc4e   : > { %11003 = vmatpush3.bf16.msra.mxu1 %v11224_v51  ;;  %v11233_v51 = vld [vmem:[%s13530_s18 + $0x78] sm:$0xff]  }
 0xc4f   : > { %11004 = vmatprep.subr.bf16.mxu1 %v11225_v54 }
 0xc52   : > { %11005 = vmatpush3.bf16.msra.mxu1 %v11225_v54  ;;  %v11234_v54 = vld [vmem:[%s13530_s18 + $0xb0] sm:$0xff]  }
 0xc53   : > { %11006 = vmatprep.subr.bf16.mxu1 %v11226_v55 }
 0xc56   : > { %11007 = vmatpush3.bf16.msra.mxu1 %v11226_v55  ;;  %v11235_v55 = vld [vmem:[%s13530_s18 + $0x70] sm:$0xff]  }
 0xc57   : > { %11008 = vmatprep.subr.bf16.mxu1 %v11227_v17 }
 0xc5a   : > { %11009 = vmatpush3.bf16.msra.mxu1 %v11227_v17  ;;  %v11236_v17 = vld [vmem:[%s13530_s18 + $0xa8] sm:$0xff]  }
 0xc5b   : > { %11030 = vmatprep.subr.bf16.mxu1 %v11238_v27 }
 0xcfd   : > { %v10508_v18 = vpop.f32.mrf.mxu1 }
 0xcff   : > { %v10509_v21 = vpop.f32.mrf.mxu1 }
 0xd00   : > { %v10510_v30 = vadd.f32 %v10509_v21, %v10508_v18  ;;  %v11237_v18 = vld [vmem:[%s13530_s18 + $0x68] sm:$0xff]   ;;  %v11239_v21 = vld [vmem:[%s13530_s18 + $0xa0] sm:$0xff]  }
 0xd01   : > { %v10511_v24 = vpop.f32.mrf.mxu1 }
 0xd02   : > { %v4133_v37 = vadd.f32 %v10510_v30, %v9658_v33  ;;  %v11242_v30 = vld [vmem:[%s13530_s18 + $0x98] sm:$0xff]  }
 0xd03   : > { %v10512_v31 = vpop.f32.mrf.mxu1 }
 0xd04   : > { %v10513_v35 = vadd.f32 %v10512_v31, %v10511_v24  ;;  %v11240_v24 = vld [vmem:[%s13530_s18 + $0x60] sm:$0xff]   ;;  %v11243_v31 = vld [vmem:[%s13530_s18 + $0x58] sm:$0xff]  }
 0xd05   : > { %v10514_v32 = vpop.f32.mrf.mxu1 }
 0xd06   : > { %v10992_v34 = vpop.f32.mrf.mxu0  ;;  %v4136_v5 = vadd.f32 %v10513_v35, %v9658_v33  ;;  %v11249_v35 = vld [vmem:[%s13530_s18 + $0x48] sm:$0xff]  }
 0xd07   : > { %v10515_v36 = vpop.f32.mrf.mxu1 }
 0xd08   : > { %v10516_v38 = vadd.f32 %v10515_v36, %v10514_v32  ;;  %v4181_v42 = vpop.f32.mrf.mxu0  ;;  %v11246_v32 = vld [vmem:[%s13530_s18 + $0x50] sm:$0xff]   ;;  %v11250_v36 = vld [vmem:[%s13530_s18 + $0xd8] sm:$0xff]  }
 0xd09   : > { %v4182_v60 = vadd.f32 %v4181_v42, %v4133_v37  ;;  %v10517_v39 = vpop.f32.mrf.mxu1  ;;  %v11251_v37 = vld [vmem:[%s13530_s18 + $0x80] sm:$0xff]   ;;  %v11253_v42 = vld [vmem:[%s13530_s18 + $0xd0] sm:$0xff]  }
 0xd0a   : > { %v4141_v40 = vadd.f32 %v10516_v38, %v9658_v33  ;;  %v10993_v41 = vpop.f32.mrf.mxu0  ;;  %v11252_v38 = vld [vmem:[%s13530_s18 + $0x40] sm:$0xff]  }
 0xd0b   : > { %v4196_v44 = vadd.f32 %v4182_v60, %v3628_v28  ;;  %v10518_v53 = vpop.f32.mrf.mxu1  ;;  %v11254_v60 = vld [vmem:[%s13530_s18 + $0xc8] sm:$0xff]  }
 0xd0c   : > { %v4190_v45 = vadd.f32 %v10992_v34, %v4141_v40  ;;  %v10519_v50 = vadd.f32 %v10518_v53, %v10517_v39  ;;  %v4184_v56 = vpop.f32.mrf.mxu0  ;;  %v11248_v34 = vld [vmem:[%s13530_s18 + $0x88] sm:$0xff]   ;;  %v11255_v39 = vld [vmem:[%s13530_s18 + $0xc0] sm:$0xff]  }
 0xd0d   : > { %v12684_v8 = vmax.f32 %v4196_v44, 0.0  ;;  %v4185_v57 = vadd.f32 %v4184_v56, %v4136_v5  ;;  %v11258_v40 = vld [vmem:[%s13532_s1 + $0xe4] ss:$16 sps:$4 sm:$0xff]  }
 0xd0e   : > { %v4198_v43 = vadd.f32 %v4190_v45, %v3630_v13  ;;  %v4144_v59 = vadd.f32 %v10519_v50, %v9658_v33  ;;  %v11245_v33 = vld [vmem:[%s13530_s18 + $0x90] sm:$0xff]  }
 0xd0f   : > { %4204 = vst [vmem:[%s913_s26] sm:$0xff] %v12684_v8  ;;  %v4197_v23 = vadd.f32 %v4185_v57, %v3629_v29  ;;  %v11256_v50 = vld [vmem:[%s13532_s1 + $0xe0] ss:$16 sps:$4 sm:$0xff]   ;;  %v11264_v57 = vld [vmem:[%s13532_s1 + $0xc4] ss:$16 sps:$4 sm:$0xff]  }
 0xd10   : > { %v12691_v28 = vmax.f32 %v4198_v43, 0.0  ;;  %v4193_v46 = vadd.f32 %v10993_v41, %v4144_v59  ;;  %v11261_v41 = vld [vmem:[%s13532_s1 + $0xec] ss:$16 sps:$4 sm:$0xff]  }
 0xd11   : > { %v12693_v10 = vmax.f32 %v4197_v23, 0.0  ;;  %v11262_v23 = vld [vmem:[%s13532_s1 + $0xc0] ss:$16 sps:$4 sm:$0xff]  }
 0xd12   : > { %4206 = vst [vmem:[%s913_s26 + $0x10] sm:$0xff] %v12691_v28  ;;  %v4199_v11 = vadd.f32 %v4193_v46, %v3631_v25  ;;  %v11241_v25 = vld [vmem:[%s13530_s18 + $0xf0] sm:$0xff]  }
 0xd13   : > { %4205 = vst [vmem:[%s913_s26 + $0x8] sm:$0xff] %v12693_v10  ;;  %v4274_v13 = vpack.c.bf16 %v12693_v10, %v12684_v8 }
 0xd14   : > { %v12701_v22 = vmax.f32 %v4199_v11, 0.0 }
 0xd15   : > { %11010 = vmatprep.mubr.bf16.mxu1 %v4274_v13 }
 0xd16   : > { %4207 = vst [vmem:[%s913_s26 + $0x18] sm:$0xff] %v12701_v22  ;;  %v4275_v29 = vpack.c.bf16 %v12701_v22, %v12691_v28  ;;  %s13539_s26 = sld [smem:[#allocation12_spill]] }
 0xd18   : > { %11011 = vmatmul.mubr.bf16.vlgmr.msra.gmra.mxu1 %v4275_v29 }
 0xd19   : > { %11031 = vmatpush3.bf16.msra.mxu1 %v11238_v27 }
 0xd1a   : > { %11032 = vmatprep.subr.bf16.mxu1 %v11241_v25 }
 0xd1d   : > { %11033 = vmatpush3.bf16.msra.mxu1 %v11241_v25  ;;  %v11267_v25 = vld [vmem:[%s13532_s1 + $0xcc] ss:$16 sps:$4 sm:$0xff]  }
 0xd1e   : > { %11034 = vmatprep.subr.bf16.mxu1 %v11244_v61 }
 0xd21   : > { %11035 = vmatpush3.bf16.msra.mxu1 %v11244_v61  ;;  %v11265_v61 = vld [vmem:[%s13532_s1 + $0xc8] ss:$16 sps:$4 sm:$0xff]  }
 0xd22   : > { %11036 = vmatprep.subr.bf16.mxu1 %v11247_v62 }
 0xd25   : > { %11037 = vmatpush3.bf16.msra.mxu1 %v11247_v62  ;;  %v11270_v62 = vld [vmem:[%s13532_s1 + $0xa4] ss:$16 sps:$4 sm:$0xff]  }
 0xd26   : > { %11038 = vmatprep.subr.bf16.mxu1 %v11250_v36 }
 0xd29   : > { %11039 = vmatpush3.bf16.msra.mxu1 %v11250_v36 }
 0xd2a   : > { %11040 = vmatprep.subr.bf16.mxu1 %v11253_v42 }
 0xd2d   : > { %11041 = vmatpush3.bf16.msra.mxu1 %v11253_v42 }
 0xd2e   : > { %11042 = vmatprep.subr.bf16.mxu1 %v11254_v60 }
 0xd31   : > { %11043 = vmatpush3.bf16.msra.mxu1 %v11254_v60 }
 0xd32   : > { %11044 = vmatprep.subr.bf16.mxu1 %v11255_v39 }
 0xd35   : > { %11045 = vmatpush3.bf16.msra.mxu1 %v11255_v39 }
 0xd36   : > { %5127 = vmatprep.subr.bf16.mxu1 %v11261_v41 }
 0xdd8   : > { %v11012_v0 = vpop.f32.mrf.mxu1 }
 0xdd9   : > { %v4371_v12 = vadd.f32 %v11012_v0, %v9683_v2  ;;  %v11273_v0 = vld [vmem:[%s13532_s1 + $0xac] ss:$16 sps:$4 sm:$0xff]  }
 0xdda   : > { %v4362_v63 = vpop.f32.mrf.mxu1 }
 0xddb   : > { %v4363_v20 = vadd.f32 %v9683_v2, %v4362_v63  ;;  %v4379_v1 = vmax.f32 %v4371_v12, 0.0  ;;  %v11271_v63 = vld [vmem:[%s13532_s1 + $0xa8] ss:$16 sps:$4 sm:$0xff]   ;;  %v11276_v12 = vld [vmem:[%s13532_s1 + $0x84] ss:$16 sps:$4 sm:$0xff]  }
 0xddc   : > { %v11013_v6 = vpop.f32.mrf.mxu1 }
 0xddd   : > { %v4374_v26 = vadd.f32 %v11013_v6, %v9683_v2  ;;  %v4377_v19 = vmax.f32 %v4363_v20, 0.0  ;;  %v11279_v6 = vld [vmem:[%s13532_s1 + $0x8c] ss:$16 sps:$4 sm:$0xff]   ;;  %v11274_v20 = vld [vmem:[%s13532_s1 + $0x80] ss:$16 sps:$4 sm:$0xff]  }
 0xdde   : > { %v4365_v9 = vpop.f32.mrf.mxu1 }
 0xddf   : > { %v4380_v3 = vmax.f32 %v4374_v26, 0.0  ;;  %v4366_v7 = vadd.f32 %v9683_v2, %v4365_v9  ;;  %v11268_v2 = vld [vmem:[%s13532_s1 + $0xa0] ss:$16 sps:$4 sm:$0xff]   ;;  %v11277_v26 = vld [vmem:[%s13532_s1 + $0x88] ss:$16 sps:$4 sm:$0xff]  }
 0xde0   : > { %v11282_v9 = vld [vmem:[%s13532_s1 + $0x64] ss:$16 sps:$4 sm:$0xff]  }
 0xde1   : > { %v12713_v4 = vpack.c.bf16 %v4380_v3, %v4379_v1  ;;  %v4378_v14 = vmax.f32 %v4366_v7, 0.0  ;;  %v11285_v1 = vld [vmem:[%s13532_s1 + $0x6c] ss:$16 sps:$4 sm:$0xff]   ;;  %v11280_v3 = vld [vmem:[%s13532_s1 + $0x60] ss:$16 sps:$4 sm:$0xff]  }
 0xde2   : > { %v11283_v7 = vld [vmem:[%s13532_s1 + $0x68] ss:$16 sps:$4 sm:$0xff]  }
 0xde3   : > { %v4381_v15 = vpack.c.bf16 %v4378_v14, %v4377_v19  ;;  %11014 = vmatprep.subr.bf16.mxu0 %v12713_v4  ;;  %v11288_v19 = vld [vmem:[%s13532_s1 + $0x44] ss:$16 sps:$4 sm:$0xff]   ;;  %v11286_v14 = vld [vmem:[%s13532_s1 + $0x40] ss:$16 sps:$4 sm:$0xff]  }
 0xde4   : > { %11015 = vmatpush3.bf16.msra.mxu0 %v12713_v4 }
 0xde5   : > { %11016 = vmatprep.subr.bf16.mxu0 %v4381_v15 }
 0xde8   : > { %11017 = vmatpush3.bf16.msra.mxu0 %v4381_v15 }
 0xde9   : > { %11022 = vmatprep.subr.bf16.mxu0 %v12713_v4 }
 0xdeb   : > { %11019 = vmatmul.mubr.msk.bf16.vlgmr.msra.gmra.mxu0 %vm981_vm0, %v11229_v16  ;;  %v11294_v16 = vld [vmem:[%s13532_s1 + $0x24] ss:$16 sps:$4 sm:$0xff]  }
 0xdec   : > { %11023 = vmatpush3.bf16.msra.mxu0 %v12713_v4  ;;  %11026 = vmatprep.mubr.msk.bf16.mxu0 %vm981_vm0, %v11230_v47  ;;  %v11297_v47 = vld [vmem:[%s13532_s1 + $0x2c] ss:$16 sps:$4 sm:$0xff]  }
 0xded   : > { %11024 = vmatprep.subr.bf16.mxu0 %v4381_v15 }
 0xdf0   : > { %11025 = vmatpush3.bf16.msra.mxu0 %v4381_v15 }
 0xdf1   : > { %10548 = vmatprep.subr.bf16.mxu0 %v11232_v48  ;;  %v11292_v48 = vld [vmem:[%s13532_s1 + $0x20] ss:$16 sps:$4 sm:$0xff]  }
 0xdf3   : > { %11027 = vmatmul.mubr.msk.bf16.vlgmr.msra.gmra.mxu0 %vm981_vm0, %v11231_v49  ;;  %v11295_v49 = vld [vmem:[%s13532_s1 + $0x28] ss:$16 sps:$4 sm:$0xff]  }
 0xdf4   : > { %4705 = vmatprep.mubr.bf16.mxu0 %v4381_v15  ;;  %10549 = vmatpush3.bf16.msra.mxu0 %v11233_v51  ;;  %v11289_v15 = vld [vmem:[%s13532_s1 + $0x48] ss:$16 sps:$4 sm:$0xff]   ;;  %v11300_v51 = vld [vmem:[%s13532_s1 + $0x4] ss:$16 sps:$4 sm:$0xff]  }
 0xdf5   : > { %10550 = vmatprep.subr.bf16.mxu0 %v11234_v54  ;;  %v11303_v54 = vld [vmem:[%s13532_s1 + $0xc] ss:$16 sps:$4 sm:$0xff]  }
 0xdf8   : > { %10551 = vmatpush3.bf16.msra.mxu0 %v11235_v55  ;;  %v11298_v55 = vld [vmem:[%s13532_s1] ss:$16 sps:$4 sm:$0xff]  }
 0xdf9   : > { %10552 = vmatprep.subr.bf16.mxu0 %v11236_v17  ;;  %v11301_v17 = vld [vmem:[%s13532_s1 + $0x8] ss:$16 sps:$4 sm:$0xff]  }
 0xdfc   : > { %10553 = vmatpush3.bf16.msra.mxu0 %v11237_v18 }
 0xdfd   : > { %10554 = vmatprep.subr.bf16.mxu0 %v11239_v21 }
 0xe00   : > { %10555 = vmatpush3.bf16.msra.mxu0 %v11240_v24 }
 0xe01   : > { %10556 = vmatprep.subr.bf16.mxu0 %v11242_v30 }
 0xe04   : > { %10557 = vmatpush3.bf16.msra.mxu0 %v11243_v31 }
 0xe05   : > { %10558 = vmatprep.subr.bf16.mxu0 %v11245_v33  ;;  %v9704_v33 = vld [vmem:[%s13531_s28 + $0x1] ss:$0 sm:$0xff] }
 0xe08   : > { %10559 = vmatpush3.bf16.msra.mxu0 %v11246_v32 }
 0xe09   : > { %10560 = vmatprep.subr.bf16.mxu0 %v11248_v34 }
 0xe0c   : > { %10561 = vmatpush3.bf16.msra.mxu0 %v11249_v35 }
 0xe0d   : > { %10562 = vmatprep.subr.bf16.mxu0 %v11251_v37 }
 0xe10   : > { %10563 = vmatpush3.bf16.msra.mxu0 %v11252_v38 }
 0xe11   : > { %5074 = vmatprep.subr.bf16.mxu0 %v11258_v40 }
 0xeab   : > { %v11020_v44 = vpop.f32.mrf.mxu0 }
 0xead   : > { %v4437_v53 = vpop.f32.mrf.mxu0 }
 0xeaf   : > { %v11021_v5 = vpop.f32.mrf.mxu0 }
 0xeb0   : > { %v4453_v13 = vpack.c.bf16 %v11021_v5, %v11020_v44 }
 0xeb1   : > { %v4440_v45 = vpop.f32.mrf.mxu0 }
 0xeb2   : > { %v4452_v56 = vpack.c.bf16 %v4440_v45, %v4437_v53 }
 0xeb3   : > { %v11028_v43 = vpop.f32.mrf.mxu0 }
 0xeb4   : > { %4706 = vmatmul.mubr.bf16.vlgmr.msra.gmra.mxu0 %v4452_v56 }
 0xeb5   : > { %v4508_v59 = vpop.f32.mrf.mxu0  ;;  %4713 = vmatprep.mubr.bf16.mxu0 %v12713_v4  ;;  %5075 = vmatpush1.bf16.msra.mxu0 %v11256_v50  ;;  %v11291_v4 = vld [vmem:[%s13532_s1 + $0x4c] ss:$16 sps:$4 sm:$0xff]   ;;  %s9433_s1 = sshll.u32 %s12238_s10, 1 }
 0xeb6   : > { %5076 = vmatprep.subr.bf16.mxu0 %v11264_v57  ;;  %p916_p5 = scmp.lt.s32.totalorder %s9433_s1, 3 }
 0xeb7   : > { %v11029_v46 = vpop.f32.mrf.mxu0 }
 0xeb8   : > { %v4524_v27 = vpack.c.bf16 %v11029_v46, %v11028_v43  ;;  %s13546_s1 = smov (!%p916_p5, %s9433_s1), 3 }
 0xeb9   : > { %v4511_v11 = vpop.f32.mrf.mxu0  ;;  %5077 = vmatpush1.bf16.msra.mxu0 %v11262_v23 }
 0xeba   : > { %v4523_v29 = vpack.c.bf16 %v4511_v11, %v4508_v59  ;;  %5078 = vmatprep.subr.bf16.mxu0 %v11270_v62 }
 0xebc   : > { %4714 = vmatmul.mubr.bf16.gmra.mxu0 %v4453_v13  ;;  %11046 = vmatprep.mubr.bf16.mxu1 %v4523_v29 }
 0xebd   : > { %11047 = vmatmul.mubr.bf16.vlgmr.msra.gmra.mxu1 %v4524_v27  ;;  %5106 = vmatprep.mubr.bf16.mxu0 %v12076_v52 }
 0xebe   : > { %5128 = vmatpush1.bf16.msra.mxu1 %v11259_v58  ;;  %5159 = vmatprep.mubr.bf16.mxu1 %v12076_v52 }
 0xebf   : > { %5129 = vmatprep.subr.bf16.mxu1 %v11267_v25  ;;  %5079 = vmatpush1.bf16.msra.mxu0 %v11268_v2 }
 0xec0   : > { %5080 = vmatprep.subr.bf16.mxu0 %v11276_v12 }
 0xec2   : > { %5130 = vmatpush1.bf16.msra.mxu1 %v11265_v61 }
 0xec3   : > { %5131 = vmatprep.subr.bf16.mxu1 %v11273_v0  ;;  %5081 = vmatpush1.bf16.msra.mxu0 %v11274_v20 }
 0xec4   : > { %5082 = vmatprep.subr.bf16.mxu0 %v11282_v9 }
 0xec6   : > { %5132 = vmatpush1.bf16.msra.mxu1 %v11271_v63 }
 0xec7   : > { %5133 = vmatprep.subr.bf16.mxu1 %v11279_v6  ;;  %5083 = vmatpush1.bf16.msra.mxu0 %v11280_v3  ;;  %v4907_v3 = vld [vmem:[%s13533_s2] ss:$4 sm:$0x3] }
 0xec8   : > { %5084 = vmatprep.subr.bf16.mxu0 %v11288_v19 }
 0xeca   : > { %5134 = vmatpush1.bf16.msra.mxu1 %v11277_v26 }
 0xecb   : > { %5135 = vmatprep.subr.bf16.mxu1 %v11285_v1  ;;  %5085 = vmatpush1.bf16.msra.mxu0 %v11286_v14 }
 0xecc   : > { %5086 = vmatprep.subr.bf16.mxu0 %v11294_v16 }
 0xece   : > { %5136 = vmatpush1.bf16.msra.mxu1 %v11283_v7 }
 0xecf   : > { %5137 = vmatprep.subr.bf16.mxu1 %v11291_v4  ;;  %5087 = vmatpush1.bf16.msra.mxu0 %v11292_v48 }
 0xed0   : > { %5088 = vmatprep.subr.bf16.mxu0 %v11300_v51 }
 0xed2   : > { %5138 = vmatpush1.bf16.msra.mxu1 %v11289_v15 }
 0xed3   : > { %5139 = vmatprep.subr.bf16.mxu1 %v11297_v47  ;;  %5089 = vmatpush1.bf16.msra.mxu0 %v11298_v55 }
 0xed6   : > { %5140 = vmatpush1.bf16.msra.mxu1 %v11295_v49 }
 0xed7   : > { %5141 = vmatprep.subr.bf16.mxu1 %v11303_v54 }
 0xeda   : > { %5142 = vmatpush1.bf16.msra.mxu1 %v11301_v17 }
 0xf74   : > { %v10564_v18 = vpop.f32.mrf.mxu0 }
 0xf76   : > { %v10565_v21 = vpop.f32.mrf.mxu0 }
 0xf77   : > { %v10566_v30 = vadd.f32 %v10565_v21, %v10564_v18 }
 0xf78   : > { %v10567_v24 = vpop.f32.mrf.mxu0 }
 0xf79   : > { %v4708_v37 = vadd.f32 %v10566_v30, %v9704_v33 }
 0xf7a   : > { %v10568_v31 = vpop.f32.mrf.mxu0 }
 0xf7b   : > { %v10569_v35 = vadd.f32 %v10568_v31, %v10567_v24 }
 0xf7c   : > { %v10570_v32 = vpop.f32.mrf.mxu0 }
 0xf7d   : > { %v11048_v34 = vpop.f32.mrf.mxu1  ;;  %v4711_v44 = vadd.f32 %v10569_v35, %v9704_v33 }
 0xf7e   : > { %v10571_v36 = vpop.f32.mrf.mxu0 }
 0xf7f   : > { %v4756_v38 = vpop.f32.mrf.mxu1  ;;  %v10572_v42 = vadd.f32 %v10571_v36, %v10570_v32 }
 0xf80   : > { %v4757_v60 = vadd.f32 %v4756_v38, %v4708_v37  ;;  %v10573_v39 = vpop.f32.mrf.mxu0 }
 0xf81   : > { %v11049_v40 = vpop.f32.mrf.mxu1  ;;  %v4716_v45 = vadd.f32 %v10572_v42, %v9704_v33 }
 0xf82   : > { %v10574_v41 = vpop.f32.mrf.mxu0  ;;  %v4771_v50 = vadd.f32 %v4757_v60, %v12684_v8 }
 0xf83   : > { %v10575_v53 = vadd.f32 %v10574_v41, %v10573_v39  ;;  %v4759_v5 = vpop.f32.mrf.mxu1  ;;  %v4765_v23 = vadd.f32 %v11048_v34, %v4716_v45  ;;  %v11307_v41 = vld [vmem:[%s13534_s0 + $0x174] ss:$8 sps:$4 sm:$0xff]   ;;  %v11305_v45 = vld [vmem:[%s13534_s0 + $0x170] ss:$8 sps:$4 sm:$0xff]  }
 0xf84   : > { %v4760_v56 = vadd.f32 %v4759_v5, %v4711_v44  ;;  %v4775_v46 = vmax.f32 %v4771_v50, 0.0  ;;  %v11308_v5 = vld [vmem:[%s12215_s12 + $0x10] sm:$0xff]   ;;  %v11311_v50 = vld [vmem:[%s13534_s0 + $0x164] ss:$8 sps:$4 sm:$0xff]  }
 0xf85   : > { %v4719_v57 = vadd.f32 %v10575_v53, %v9704_v33  ;;  %v4773_v58 = vadd.f32 %v4765_v23, %v12691_v28  ;;  %v11304_v53 = vld [vmem:[%s12215_s12] sm:$0xff]   ;;  %v11313_v23 = vld [vmem:[%s13534_s0 + $0x150] ss:$8 sps:$4 sm:$0xff]  }
 0xf86   : > { %v4772_v43 = vadd.f32 %v4760_v56, %v12693_v10  ;;  %v5181_v10 = vlaneseq  ;;  %v11309_v56 = vld [vmem:[%s13534_s0 + $0x160] ss:$8 sps:$4 sm:$0xff]  }
 0xf87   : > { %v4768_v59 = vadd.f32 %v11049_v40, %v4719_v57  ;;  %v4777_v27 = vmax.f32 %v4773_v58, 0.0  ;;  %v11315_v57 = vld [vmem:[%s13534_s0 + $0x154] ss:$8 sps:$4 sm:$0xff]   ;;  %v11358_v58 = vld [vmem:[%s13534_s0 + $0x60] ss:$8 sps:$4 sm:$0xff]  }
 0xf88   : > { %v4776_v11 = vmax.f32 %v4772_v43, 0.0  ;;  %v5182_v0 = vshrl.u32 %v5181_v10, 7  ;;  %v11357_v43 = vld [vmem:[%s13534_s0 + $0x74] ss:$8 sps:$4 sm:$0xff]   ;;  %v11361_v10 = vld [vmem:[%s13534_s0 + $0x50] ss:$8 sps:$4 sm:$0xff]  }
 0xf89   : > { %v4774_v13 = vadd.f32 %v4768_v59, %v12701_v22  ;;  %v12828_v59 = vld [vmem:[%s12215_s12 + $0x8] sm:$0xff]  }
 0xf8a   : > { %v4912_v29 = vpack.c.bf16 %v4776_v11, %v4775_v46  ;;  %v12799_v26 = vsub.s32 0, %v5182_v0  ;;  %v12801_v9 = vsub.s32 1, %v5182_v0  ;;  %v11355_v46 = vld [vmem:[%s13534_s0 + $0x70] ss:$8 sps:$4 sm:$0xff]   ;;  %v11318_v11 = vld [vmem:[%s13534_s0 + $0x144] ss:$8 sps:$4 sm:$0xff]  }
 0xf8b   : > { %v4778_v8 = vmax.f32 %v4774_v13, 0.0  ;;  %v11360_v13 = vld [vmem:[%s13534_s0 + $0x64] ss:$8 sps:$4 sm:$0xff]   ;;  %v11322_v0 = vld [vmem:[%s13534_s0 + $0x120] ss:$8 sps:$4 sm:$0xff]  }
 0xf8c   : > { %5107 = vmatmul.mubr.bf16.vlgmr.msra.gmra.mxu0 %v4912_v29  ;;  %5160 = vmatmul.mubr.bf16.vlgmr.msra.gmra.mxu1 %v4912_v29  ;;  %v5184_v15 = vrot.slane %v4907_v3, %v12799_v26  ;;  %v5188_v16 = vrot.slane %v4907_v3, %v12801_v9  ;;  %v11316_v29 = vld [vmem:[%s13534_s0 + $0x140] ss:$8 sps:$4 sm:$0xff]   ;;  %v11369_v3 = vld [vmem:[%s13534_s0 + $0x34] ss:$8 sps:$4 sm:$0xff]  }
 0xf8d   : > { %5116 = vmatprep.mubr.bf16.mxu0 %v12076_v52  ;;  %5169 = vmatprep.mubr.bf16.mxu1 %v12076_v52  ;;  %v4913_v25 = vpack.c.bf16 %v4778_v8, %v4777_v27  ;;  %v11321_v8 = vld [vmem:[%s13534_s0 + $0x134] ss:$8 sps:$4 sm:$0xff]  }
 0xf8e   : > { %v11363_v27 = vld [vmem:[%s13534_s0 + $0x54] ss:$8 sps:$4 sm:$0xff]  }
 0xf94   : > { %5117 = vmatmul.mubr.bf16.gmra.mxu0 %v4913_v25  ;;  %5170 = vmatmul.mubr.bf16.gmra.mxu1 %v4913_v25  ;;  %v11319_v25 = vld [vmem:[%s13534_s0 + $0x130] ss:$8 sps:$4 sm:$0xff]  }
 0xf95   : > { %5253 = vmatprep.mubr.bf16.mxu0 %v12076_v52  ;;  %5365 = vmatprep.mubr.bf16.mxu1 %v12076_v52 }
0x104c   : > { %v5108_v22 = vpop.f32.mrf.mxu0  ;;  %v12789_v61 = vpop.f32.mrf.mxu1 }
0x104d   : > { %v5191_v35 = vadd.f32 %v5184_v15, %v5108_v22  ;;  %v11324_v22 = vld [vmem:[%s13534_s0 + $0x124] ss:$8 sps:$4 sm:$0xff]  }
0x104e   : > { %v5110_v28 = vpop.f32.mrf.mxu0  ;;  %v12791_v62 = vpop.f32.mrf.mxu1 }
0x104f   : > { %v5192_v21 = vadd.f32 %v5188_v16, %v5110_v28  ;;  %v5199_v40 = vmax.f32 %v5191_v35, 0.0  ;;  %v11366_v28 = vld [vmem:[%s13534_s0 + $0x44] ss:$8 sps:$4 sm:$0xff]   ;;  %v11379_v35 = vld [vmem:[%s13534_s0 + $0xf0] ss:$8 sps:$4 sm:$0xff]  }
0x1050   : > { %v5112_v2 = vpop.f32.mrf.mxu0  ;;  %v12793_v63 = vpop.f32.mrf.mxu1 }
0x1051   : > { %v5998_v12 = vpack.c.bf16 %v12793_v63, %v12789_v61  ;;  %v5193_v30 = vadd.f32 %v5184_v15, %v5112_v2  ;;  %v5200_v37 = vmax.f32 %v5192_v21, 0.0  ;;  %v11364_v2 = vld [vmem:[%s13534_s0 + $0x40] ss:$8 sps:$4 sm:$0xff]   ;;  %v11336_v21 = vld [vmem:[%s13534_s0 + $0x1e4] ss:$8 sps:$4 sm:$0xff]  }
0x1052   : > { %v5114_v6 = vpop.f32.mrf.mxu0  ;;  %v12797_v20 = vpop.f32.mrf.mxu1  ;;  %v11426_v61 = vld [vmem:[%s13534_s0 + $0x204] ss:$8 sps:$4 sm:$0xff]   ;;  %v11424_v63 = vld [vmem:[%s13534_s0 + $0x200] ss:$8 sps:$4 sm:$0xff]  }
0x1053   : > { %v5999_v1 = vpack.c.bf16 %v12797_v20, %v12791_v62  ;;  %v5194_v49 = vadd.f32 %v5188_v16, %v5114_v6  ;;  %v5201_v42 = vmax.f32 %v5193_v30, 0.0  ;;  %v11327_v6 = vld [vmem:[%s13534_s0 + $0x114] ss:$8 sps:$4 sm:$0xff]   ;;  %v11334_v30 = vld [vmem:[%s13534_s0 + $0x1e0] ss:$8 sps:$4 sm:$0xff]  }
0x1054   : > { %v5118_v7 = vpop.f32.mrf.mxu0  ;;  %v12806_v19 = vpop.f32.mrf.mxu1  ;;  %v11418_v62 = vld [vmem:[%s13534_s0 + $0x220] ss:$8 sps:$4 sm:$0xff]   ;;  %v11423_v20 = vld [vmem:[%s13534_s0 + $0x214] ss:$8 sps:$4 sm:$0xff]  }
0x1055   : > { %v5195_v17 = vadd.f32 %v5184_v15, %v5118_v7  ;;  %v5202_v33 = vmax.f32 %v5194_v49, 0.0  ;;  %v5207_v44 = vpack.c.bf16 %v5201_v42, %v5199_v40  ;;  %v11325_v7 = vld [vmem:[%s13534_s0 + $0x110] ss:$8 sps:$4 sm:$0xff]   ;;  %v11370_v49 = vld [vmem:[%s13534_s0 + $0x20] ss:$8 sps:$4 sm:$0xff]  }
0x1056   : > { %v5120_v4 = vpop.f32.mrf.mxu0  ;;  %v12808_v14 = vpop.f32.mrf.mxu1  ;;  %v11382_v42 = vld [vmem:[%s13534_s0 + $0xe0] ss:$8 sps:$4 sm:$0xff]   ;;  %v11343_v40 = vld [vmem:[%s13534_s0 + $0x1b0] ss:$8 sps:$4 sm:$0xff]  }
0x1057   : > { %v5196_v51 = vadd.f32 %v5188_v16, %v5120_v4  ;;  %v5203_v36 = vmax.f32 %v5195_v17, 0.0  ;;  %v5208_v39 = vpack.c.bf16 %v5202_v33, %v5200_v37  ;;  %v11367_v4 = vld [vmem:[%s13534_s0 + $0x30] ss:$8 sps:$4 sm:$0xff]   ;;  %v11339_v33 = vld [vmem:[%s13534_s0 + $0x1d4] ss:$8 sps:$4 sm:$0xff]  }
0x1058   : > { %v5122_v47 = vpop.f32.mrf.mxu0  ;;  %v12812_v48 = vpop.f32.mrf.mxu1  ;;  %v11331_v17 = vld [vmem:[%s13534_s0 + $0x1f0] ss:$8 sps:$4 sm:$0xff]   ;;  %v11384_v37 = vld [vmem:[%s13534_s0 + $0xe4] ss:$8 sps:$4 sm:$0xff]  }
0x1059   : > { %v5197_v54 = vadd.f32 %v5184_v15, %v5122_v47  ;;  %v6000_v55 = vpack.c.bf16 %v12812_v48, %v12806_v19  ;;  %v5204_v32 = vmax.f32 %v5196_v51, 0.0  ;;  %v11330_v15 = vld [vmem:[%s13534_s0 + $0x104] ss:$8 sps:$4 sm:$0xff]   ;;  %v11328_v47 = vld [vmem:[%s13534_s0 + $0x100] ss:$8 sps:$4 sm:$0xff]  }
0x105a   : > { %v5124_v18 = vpop.f32.mrf.mxu0  ;;  %v11333_v51 = vld [vmem:[%s13534_s0 + $0x1f4] ss:$8 sps:$4 sm:$0xff]   ;;  %v11415_v19 = vld [vmem:[%s13534_s0 + $0x230] ss:$8 sps:$4 sm:$0xff]   ;;  %v11420_v48 = vld [vmem:[%s13534_s0 + $0x224] ss:$8 sps:$4 sm:$0xff]  }
0x105b   : > { %v5198_v24 = vadd.f32 %v5188_v16, %v5124_v18  ;;  %v5205_v31 = vmax.f32 %v5197_v54, 0.0  ;;  %v11372_v16 = vld [vmem:[%s13534_s0 + $0x24] ss:$8 sps:$4 sm:$0xff]   ;;  %v11375_v54 = vld [vmem:[%s13534_s0 + $0x14] ss:$8 sps:$4 sm:$0xff]  }
0x105c   : > { %v11373_v18 = vld [vmem:[%s13534_s0 + $0x10] ss:$8 sps:$4 sm:$0xff]  }
0x105d   : > { %v5206_v34 = vmax.f32 %v5198_v24, 0.0  ;;  %v5209_v60 = vpack.c.bf16 %v5205_v31, %v5203_v36  ;;  %v11378_v24 = vld [vmem:[%s13534_s0 + $0x4] ss:$8 sps:$4 sm:$0xff]   ;;  %v11376_v31 = vld [vmem:[%s13534_s0] ss:$8 sps:$4 sm:$0xff]  }
0x105e   : > { %v11342_v36 = vld [vmem:[%s13534_s0 + $0x1c4] ss:$8 sps:$4 sm:$0xff]  }
0x105f   : > { %v5210_v38 = vpack.c.bf16 %v5206_v34, %v5204_v32  ;;  %v11381_v32 = vld [vmem:[%s13534_s0 + $0xf4] ss:$8 sps:$4 sm:$0xff]   ;;  %v11337_v34 = vld [vmem:[%s13534_s0 + $0x1d0] ss:$8 sps:$4 sm:$0xff]  }
0x1061   : > { %5233 = vmatprep.subr.bf16.mxu0 %v5210_v38  ;;  %5345 = vmatprep.subr.bf16.mxu1 %v5210_v38 }
0x1062   : > { %5234 = vmatpush1.bf16.msra.mxu0 %v5209_v60  ;;  %5346 = vmatpush1.bf16.msra.mxu1 %v5209_v60 }
0x1063   : > { %5235 = vmatprep.subr.bf16.mxu0 %v5208_v39  ;;  %5347 = vmatprep.subr.bf16.mxu1 %v5208_v39 }
0x1066   : > { %5236 = vmatpush1.bf16.msra.mxu0 %v5207_v44  ;;  %5348 = vmatpush1.bf16.msra.mxu1 %v5207_v44 }
0x1067   : > { %5289 = vmatprep.subr.bf16.mxu0 %v5210_v38  ;;  %5912 = vmatprep.subr.bf16.mxu1 %v11307_v41  ;;  %v11340_v38 = vld [vmem:[%s13534_s0 + $0x1c0] ss:$8 sps:$4 sm:$0xff]   ;;  %v11385_v41 = vld [vmem:[%s13534_s0 + $0xd0] ss:$8 sps:$4 sm:$0xff]  }
0x1069   : > { %9764 = vmatmul.mubr.msk.bf16.vlgmr.msra.gmra.mxu0 %vm981_vm0, %v11304_v53  ;;  %9772 = vmatmul.mubr.msk.bf16.vlgmr.msra.gmra.mxu1 %vm981_vm0, %v11308_v5  ;;  %v11390_v53 = vld [vmem:[%s13534_s0 + $0xc4] ss:$8 sps:$4 sm:$0xff]   ;;  %v11346_v5 = vld [vmem:[%s13534_s0 + $0x1a0] ss:$8 sps:$4 sm:$0xff]  }
0x106a   : > { %5290 = vmatpush1.bf16.msra.mxu0 %v5209_v60  ;;  %5913 = vmatpush1.bf16.msra.mxu1 %v11305_v45  ;;  %v11345_v60 = vld [vmem:[%s13534_s0 + $0x1b4] ss:$8 sps:$4 sm:$0xff]   ;;  %v11388_v45 = vld [vmem:[%s13534_s0 + $0xc0] ss:$8 sps:$4 sm:$0xff]  }
0x106b   : > { %5291 = vmatprep.subr.bf16.mxu0 %v5208_v39  ;;  %5914 = vmatprep.subr.bf16.mxu1 %v11311_v50  ;;  %v11387_v39 = vld [vmem:[%s13534_s0 + $0xd4] ss:$8 sps:$4 sm:$0xff]  }
0x106c   : > { %5309 = vmatprep.mubr.bf16.mxu0 %v12076_v52  ;;  %v11351_v50 = vld [vmem:[%s13534_s0 + $0x194] ss:$8 sps:$4 sm:$0xff]  }
0x106e   : > { %5292 = vmatpush1.bf16.msra.mxu0 %v5207_v44  ;;  %5915 = vmatpush1.bf16.msra.mxu1 %v11309_v56  ;;  %v11348_v44 = vld [vmem:[%s13534_s0 + $0x1a4] ss:$8 sps:$4 sm:$0xff]   ;;  %v11393_v56 = vld [vmem:[%s13534_s0 + $0xb4] ss:$8 sps:$4 sm:$0xff]  }
0x106f   : > { %5916 = vmatprep.subr.bf16.mxu1 %v11315_v57  ;;  %5869 = vmatprep.subr.bf16.mxu0 %v11357_v43  ;;  %v11349_v57 = vld [vmem:[%s13534_s0 + $0x190] ss:$8 sps:$4 sm:$0xff]  }
0x1070   : > { %v11391_v43 = vld [vmem:[%s13534_s0 + $0xb0] ss:$8 sps:$4 sm:$0xff]  }
0x1071   : > { %9768 = vmatmul.mubr.msk.bf16.vlgmr.msra.gmra.mxu0 %vm981_vm0, %v12828_v59 }
0x1072   : > { %5917 = vmatpush1.bf16.msra.mxu1 %v11313_v23  ;;  %5870 = vmatpush1.bf16.msra.mxu0 %v11355_v46  ;;  %v11354_v23 = vld [vmem:[%s13534_s0 + $0x184] ss:$8 sps:$4 sm:$0xff]  }
0x1073   : > { %5918 = vmatprep.subr.bf16.mxu1 %v11318_v11  ;;  %5871 = vmatprep.subr.bf16.mxu0 %v11360_v13  ;;  %v11396_v46 = vld [vmem:[%s13534_s0 + $0xa4] ss:$8 sps:$4 sm:$0xff]   ;;  %v5177_v11 = vpop.f32.mrf.mxu1  ;;  %v11352_v13 = vld [vmem:[%s13534_s0 + $0x180] ss:$8 sps:$4 sm:$0xff]  }
0x1076   : > { %5919 = vmatpush1.bf16.msra.mxu1 %v11316_v29  ;;  %5872 = vmatpush1.bf16.msra.mxu0 %v11358_v58  ;;  %v11394_v29 = vld [vmem:[%s13534_s0 + $0xa0] ss:$8 sps:$4 sm:$0xff]   ;;  %v6001_v58 = vpack.c.bf16 %v5177_v11, %v12808_v14 }
0x1077   : > { %5920 = vmatprep.subr.bf16.mxu1 %v11321_v8  ;;  %5873 = vmatprep.subr.bf16.mxu0 %v11363_v27  ;;  %v11399_v8 = vld [vmem:[%s13534_s0 + $0x94] ss:$8 sps:$4 sm:$0xff]   ;;  %v11397_v27 = vld [vmem:[%s13534_s0 + $0x90] ss:$8 sps:$4 sm:$0xff]   ;;  %v11454_v11 = vld [vmem:[%s13535_s11 + $0x60] ss:$8 sps:$4 sm:$0xff]  }
0x107a   : > { %5921 = vmatpush1.bf16.msra.mxu1 %v11319_v25  ;;  %5874 = vmatpush1.bf16.msra.mxu0 %v11361_v10  ;;  %v11402_v25 = vld [vmem:[%s13534_s0 + $0x84] ss:$8 sps:$4 sm:$0xff]   ;;  %v11400_v10 = vld [vmem:[%s13534_s0 + $0x80] ss:$8 sps:$4 sm:$0xff]  }
0x107b   : > { %5922 = vmatprep.subr.bf16.mxu1 %v11324_v22  ;;  %5875 = vmatprep.subr.bf16.mxu0 %v11366_v28  ;;  %v11405_v22 = vld [vmem:[%s13534_s0 + $0x274] ss:$8 sps:$4 sm:$0xff]  }
0x107e   : > { %5923 = vmatpush1.bf16.msra.mxu1 %v11322_v0  ;;  %5876 = vmatpush1.bf16.msra.mxu0 %v11364_v2 }
0x107f   : > { %5924 = vmatprep.subr.bf16.mxu1 %v11327_v6  ;;  %5877 = vmatprep.subr.bf16.mxu0 %v11369_v3 }
0x1082   : > { %5925 = vmatpush1.bf16.msra.mxu1 %v11325_v7  ;;  %5878 = vmatpush1.bf16.msra.mxu0 %v11367_v4 }
0x1083   : > { %5926 = vmatprep.subr.bf16.mxu1 %v11330_v15  ;;  %5879 = vmatprep.subr.bf16.mxu0 %v11372_v16 }
0x1086   : > { %5927 = vmatpush1.bf16.msra.mxu1 %v11328_v47  ;;  %5880 = vmatpush1.bf16.msra.mxu0 %v11370_v49  ;;  %v11403_v47 = vld [vmem:[%s13534_s0 + $0x270] ss:$8 sps:$4 sm:$0xff]  }
0x1087   : > { %5928 = vmatprep.subr.bf16.mxu1 %v11333_v51  ;;  %5881 = vmatprep.subr.bf16.mxu0 %v11375_v54 }
0x108a   : > { %5929 = vmatpush2.bf16.msra.mxu1 %v11331_v17  ;;  %5882 = vmatpush1.bf16.msra.mxu0 %v11373_v18  ;;  %v11408_v17 = vld [vmem:[%s13534_s0 + $0x264] ss:$8 sps:$4 sm:$0xff]  }
0x108b   : > { %5930 = vmatprep.subr.bf16.mxu1 %v11336_v21  ;;  %5883 = vmatprep.subr.bf16.mxu0 %v11378_v24  ;;  %v11406_v21 = vld [vmem:[%s13534_s0 + $0x260] ss:$8 sps:$4 sm:$0xff]  }
0x108e   : > { %5931 = vmatpush2.bf16.msra.mxu1 %v11334_v30  ;;  %5884 = vmatpush1.bf16.msra.mxu0 %v11376_v31  ;;  %v11411_v30 = vld [vmem:[%s13534_s0 + $0x254] ss:$8 sps:$4 sm:$0xff]  }
0x108f   : > { %5932 = vmatprep.subr.bf16.mxu1 %v11339_v33  ;;  %5885 = vmatprep.subr.bf16.mxu0 %v11381_v32 }
0x1092   : > { %5933 = vmatpush2.bf16.msra.mxu1 %v11337_v34  ;;  %5886 = vmatpush2.bf16.msra.mxu0 %v11379_v35  ;;  %v11409_v34 = vld [vmem:[%s13534_s0 + $0x250] ss:$8 sps:$4 sm:$0xff]   ;;  %v11414_v35 = vld [vmem:[%s13534_s0 + $0x244] ss:$8 sps:$4 sm:$0xff]  }
0x1093   : > { %5934 = vmatprep.subr.bf16.mxu1 %v11342_v36  ;;  %5887 = vmatprep.subr.bf16.mxu0 %v11384_v37  ;;  %v11412_v36 = vld [vmem:[%s13534_s0 + $0x240] ss:$8 sps:$4 sm:$0xff]   ;;  %v11417_v37 = vld [vmem:[%s13534_s0 + $0x234] ss:$8 sps:$4 sm:$0xff]  }
0x1096   : > { %5935 = vmatpush2.bf16.msra.mxu1 %v11340_v38  ;;  %5888 = vmatpush2.bf16.msra.mxu0 %v11382_v42  ;;  %v11430_v38 = vld [vmem:[%s13534_s0 + $0x2e0] ss:$8 sps:$4 sm:$0xff]   ;;  %v11435_v42 = vld [vmem:[%s13534_s0 + $0x2d4] ss:$8 sps:$4 sm:$0xff]  }
0x1097   : > { %5936 = vmatprep.subr.bf16.mxu1 %v11345_v60  ;;  %5889 = vmatprep.subr.bf16.mxu0 %v11387_v39  ;;  %v11433_v60 = vld [vmem:[%s13534_s0 + $0x2d0] ss:$8 sps:$4 sm:$0xff]   ;;  %v11438_v39 = vld [vmem:[%s13534_s0 + $0x2c4] ss:$8 sps:$4 sm:$0xff]  }
0x109a   : > { %5937 = vmatpush2.bf16.msra.mxu1 %v11343_v40  ;;  %5890 = vmatpush2.bf16.msra.mxu0 %v11385_v41  ;;  %v11436_v40 = vld [vmem:[%s13534_s0 + $0x2c0] ss:$8 sps:$4 sm:$0xff]   ;;  %v11441_v41 = vld [vmem:[%s13534_s0 + $0x2b4] ss:$8 sps:$4 sm:$0xff]  }
0x109b   : > { %5938 = vmatprep.subr.bf16.mxu1 %v11348_v44  ;;  %5891 = vmatprep.subr.bf16.mxu0 %v11390_v53  ;;  %v11439_v44 = vld [vmem:[%s13534_s0 + $0x2b0] ss:$8 sps:$4 sm:$0xff]   ;;  %v11444_v53 = vld [vmem:[%s13534_s0 + $0x2a4] ss:$8 sps:$4 sm:$0xff]  }
0x109e   : > { %5939 = vmatpush2.bf16.msra.mxu1 %v11346_v5  ;;  %5892 = vmatpush2.bf16.msra.mxu0 %v11388_v45  ;;  %v11442_v5 = vld [vmem:[%s13534_s0 + $0x2a0] ss:$8 sps:$4 sm:$0xff]   ;;  %v11447_v45 = vld [vmem:[%s13534_s0 + $0x294] ss:$8 sps:$4 sm:$0xff]  }
0x109f   : > { %5940 = vmatprep.subr.bf16.mxu1 %v11351_v50  ;;  %5893 = vmatprep.subr.bf16.mxu0 %v11393_v56  ;;  %v11445_v50 = vld [vmem:[%s13534_s0 + $0x290] ss:$8 sps:$4 sm:$0xff]   ;;  %v11450_v56 = vld [vmem:[%s13534_s0 + $0x284] ss:$8 sps:$4 sm:$0xff]  }
0x10a2   : > { %5941 = vmatpush2.bf16.msra.mxu1 %v11349_v57  ;;  %5894 = vmatpush2.bf16.msra.mxu0 %v11391_v43  ;;  %v11448_v57 = vld [vmem:[%s13534_s0 + $0x280] ss:$8 sps:$4 sm:$0xff]   ;;  %v11453_v43 = vld [vmem:[%s13535_s11 + $0x74] ss:$8 sps:$4 sm:$0xff]  }
0x10a3   : > { %5942 = vmatprep.subr.bf16.mxu1 %v11354_v23  ;;  %5895 = vmatprep.subr.bf16.mxu0 %v11396_v46  ;;  %v11451_v23 = vld [vmem:[%s13535_s11 + $0x70] ss:$8 sps:$4 sm:$0xff]   ;;  %v11456_v46 = vld [vmem:[%s13535_s11 + $0x64] ss:$8 sps:$4 sm:$0xff]  }
0x10a6   : > { %5943 = vmatpush2.bf16.msra.mxu1 %v11352_v13  ;;  %5896 = vmatpush2.bf16.msra.mxu0 %v11394_v29  ;;  %v11459_v13 = vld [vmem:[%s13535_s11 + $0x54] ss:$8 sps:$4 sm:$0xff]   ;;  %v11457_v29 = vld [vmem:[%s13535_s11 + $0x50] ss:$8 sps:$4 sm:$0xff]  }
0x10a7   : > { %6025 = vmatprep.subr.bf16.mxu1 %v6001_v58  ;;  %5897 = vmatprep.subr.bf16.mxu0 %v11399_v8  ;;  %v11462_v58 = vld [vmem:[%s13535_s11 + $0x44] ss:$8 sps:$4 sm:$0xff]   ;;  %v11460_v8 = vld [vmem:[%s13535_s11 + $0x40] ss:$8 sps:$4 sm:$0xff]  }
0x10aa   : > { %5898 = vmatpush2.bf16.msra.mxu0 %v11397_v27  ;;  %v11465_v27 = vld [vmem:[%s13535_s11 + $0x34] ss:$8 sps:$4 sm:$0xff]  }
0x10ab   : > { %5899 = vmatprep.subr.bf16.mxu0 %v11402_v25  ;;  %v11463_v25 = vld [vmem:[%s13535_s11 + $0x30] ss:$8 sps:$4 sm:$0xff]  }
0x10ae   : > { %5900 = vmatpush2.bf16.msra.mxu0 %v11400_v10  ;;  %v11468_v10 = vld [vmem:[%s13535_s11 + $0x24] ss:$8 sps:$4 sm:$0xff]  }
0x10af   : > { %5955 = vmatprep.subr.bf16.mxu0 %v11405_v22  ;;  %v11466_v22 = vld [vmem:[%s13535_s11 + $0x20] ss:$8 sps:$4 sm:$0xff]  }
0x1129   : > { %v5255_v28 = vpop.f32.mrf.mxu0  ;;  %v12892_v0 = vpop.f32.mrf.mxu1 }
0x112b   : > { %v5257_v2 = vpop.f32.mrf.mxu0  ;;  %v5369_v14 = vpop.f32.mrf.mxu1 }
0x112d   : > { %v5259_v6 = vpop.f32.mrf.mxu0  ;;  %v12894_v3 = vpop.f32.mrf.mxu1 }
0x112e   : > { %v5376_v7 = vpack.c.bf16 %v12894_v3, %v12892_v0  ;;  %v5264_v51 = vpack.c.bf16 %v5259_v6, %v5255_v28  ;;  %v11471_v28 = vld [vmem:[%s13535_s11 + $0x14] ss:$8 sps:$4 sm:$0xff]   ;;  %v11469_v0 = vld [vmem:[%s13535_s11 + $0x10] ss:$8 sps:$4 sm:$0xff]  }
0x112f   : > { %v5261_v4 = vpop.f32.mrf.mxu0  ;;  %v5373_v15 = vpop.f32.mrf.mxu1  ;;  %v11477_v6 = vld [vmem:[%s13535_s11 + $0xf4] ss:$8 sps:$4 sm:$0xff]   ;;  %v11475_v3 = vld [vmem:[%s13535_s11 + $0xf0] ss:$8 sps:$4 sm:$0xff]  }
0x1130   : > { %v5265_v16 = vpack.c.bf16 %v5261_v4, %v5257_v2  ;;  %v5377_v49 = vpack.c.bf16 %v5373_v15, %v5369_v14  ;;  %v11474_v2 = vld [vmem:[%s13535_s11 + $0x4] ss:$8 sps:$4 sm:$0xff]   ;;  %v11472_v14 = vld [vmem:[%s13535_s11] ss:$8 sps:$4 sm:$0xff]   ;;  %v11483_v15 = vld [vmem:[%s13535_s11 + $0xd4] ss:$8 sps:$4 sm:$0xff]  }
0x1131   : > { %v5311_v54 = vpop.f32.mrf.mxu0  ;;  %v11478_v4 = vld [vmem:[%s13535_s11 + $0xe0] ss:$8 sps:$4 sm:$0xff]  }
0x1132   : > { %5901 = vmatprep.mubr.bf16.mxu0 %v5265_v16  ;;  %v11481_v16 = vld [vmem:[%s13535_s11 + $0xd0] ss:$8 sps:$4 sm:$0xff]  }
0x1133   : > { %v5313_v18 = vpop.f32.mrf.mxu0  ;;  %5902 = vmatmul.mubr.bf16.vlgmr.msra.gmra.mxu0 %v5264_v51  ;;  %v11489_v51 = vld [vmem:[%s13535_s11 + $0xb4] ss:$8 sps:$4 sm:$0xff]  }
0x1134   : > { %5956 = vmatpush1.bf16.msra.mxu0 %v11403_v47  ;;  %5987 = vmatprep.mubr.bf16.mxu0 %v5377_v49  ;;  %v11486_v47 = vld [vmem:[%s13535_s11 + $0xc4] ss:$8 sps:$4 sm:$0xff]   ;;  %v11484_v49 = vld [vmem:[%s13535_s11 + $0xc0] ss:$8 sps:$4 sm:$0xff]  }
0x1135   : > { %v5315_v24 = vpop.f32.mrf.mxu0  ;;  %5957 = vmatprep.subr.bf16.mxu0 %v11408_v17  ;;  %v11492_v17 = vld [vmem:[%s13535_s11 + $0xa4] ss:$8 sps:$4 sm:$0xff]  }
0x1136   : > { %v5320_v31 = vpack.c.bf16 %v5315_v24, %v5311_v54  ;;  %v11487_v54 = vld [vmem:[%s13535_s11 + $0xb0] ss:$8 sps:$4 sm:$0xff]  }
0x1137   : > { %v5317_v33 = vpop.f32.mrf.mxu0  ;;  %v11493_v24 = vld [vmem:[%s13535_s11 + $0x90] ss:$8 sps:$4 sm:$0xff]  }
0x1138   : > { %v5321_v32 = vpack.c.bf16 %v5317_v33, %v5313_v18  ;;  %5958 = vmatpush1.bf16.msra.mxu0 %v11406_v21  ;;  %v11490_v18 = vld [vmem:[%s13535_s11 + $0xa0] ss:$8 sps:$4 sm:$0xff]   ;;  %v11495_v21 = vld [vmem:[%s13535_s11 + $0x94] ss:$8 sps:$4 sm:$0xff]  }
0x1139   : > { %5959 = vmatprep.subr.bf16.mxu0 %v11411_v30  ;;  %v11498_v30 = vld [vmem:[%s13535_s11 + $0x84] ss:$8 sps:$4 sm:$0xff]  }
0x113a   : > { %5944 = vmatprep.mubr.bf16.mxu1 %v5321_v32 }
0x113b   : > { %5945 = vmatmul.mubr.bf16.vlgmr.msra.gmra.mxu1 %v5320_v31  ;;  %v11496_v31 = vld [vmem:[%s13535_s11 + $0x80] ss:$8 sps:$4 sm:$0xff]  }
0x113c   : > { %5960 = vmatpush1.bf16.msra.mxu0 %v11409_v34  ;;  %6026 = vmatpush1.bf16.msra.mxu1 %v6000_v55  ;;  %v11427_v55 = vld [vmem:[%s13534_s0 + $0x2f0] ss:$8 sps:$4 sm:$0xff]  }
0x113d   : > { %6027 = vmatprep.subr.bf16.mxu1 %v5999_v1  ;;  %5961 = vmatprep.subr.bf16.mxu0 %v11414_v35  ;;  %v11421_v1 = vld [vmem:[%s13534_s0 + $0x210] ss:$8 sps:$4 sm:$0xff]  }
0x113e   : > { %6045 = vmatprep.mubr.bf16.mxu1 %v12076_v52 }
0x1140   : > { %5962 = vmatpush1.bf16.msra.mxu0 %v11412_v36  ;;  %6028 = vmatpush1.bf16.msra.mxu1 %v5998_v12  ;;  %v11429_v12 = vld [vmem:[%s13534_s0 + $0x2f4] ss:$8 sps:$4 sm:$0xff]  }
0x1141   : > { %5963 = vmatprep.subr.bf16.mxu0 %v11417_v37  ;;  %6368 = vmatprep.subr.bf16.mxu1 %v11453_v43 }
0x1143   : > { %9869 = vmatmul.mubr.msk.bf16.vlgmr.msra.gmra.mxu1 %vm981_vm0, %v12828_v59  ;;  %v11432_v59 = vld [vmem:[%s13534_s0 + $0x2e4] ss:$8 sps:$4 sm:$0xff]   ;;  %s13540_s0 = sld [smem:[#allocation13_spill]] }
0x1144   : > { %5964 = vmatpush1.bf16.msra.mxu0 %v11415_v19  ;;  %6369 = vmatpush1.bf16.msra.mxu1 %v11451_v23 }
0x1145   : > { %5965 = vmatprep.subr.bf16.mxu0 %v11420_v48  ;;  %6370 = vmatprep.subr.bf16.mxu1 %v11456_v46  ;;  %v9729_v48 = vld [vmem:[%s13533_s2 + $0x1] ss:$4 sm:$0x3] }
0x1148   : > { %5966 = vmatpush1.bf16.msra.mxu0 %v11418_v62  ;;  %6371 = vmatpush1.bf16.msra.mxu1 %v11454_v11 }
0x1149   : > { %5967 = vmatprep.subr.bf16.mxu0 %v11423_v20  ;;  %6372 = vmatprep.subr.bf16.mxu1 %v11459_v13  ;;  %v5386_v20 = vrot.slane %v9729_v48, %v12801_v9 }
0x114c   : > { %5968 = vmatpush1.bf16.msra.mxu0 %v11421_v1  ;;  %6373 = vmatpush1.bf16.msra.mxu1 %v11457_v29  ;;  %v5382_v1 = vrot.slane %v9729_v48, %v12799_v26  ;;  %v11581_v48 = vld [vmem:[%s13535_s11 + $0x1d4] ss:$8 sps:$4 sm:$0xff]  }
0x114d   : > { %5969 = vmatprep.subr.bf16.mxu0 %v11426_v61  ;;  %6374 = vmatprep.subr.bf16.mxu1 %v11462_v58 }
0x1150   : > { %5970 = vmatpush1.bf16.msra.mxu0 %v11424_v63  ;;  %6375 = vmatpush1.bf16.msra.mxu1 %v11460_v8  ;;  %v9730_v63 = vld [vmem:[%s13533_s2 + $0x2] ss:$4 sm:$0x3] }
0x1151   : > { %5971 = vmatprep.subr.bf16.mxu0 %v11429_v12  ;;  %6376 = vmatprep.subr.bf16.mxu1 %v11465_v27 }
0x1154   : > { %5972 = vmatpush2.bf16.msra.mxu0 %v11427_v55  ;;  %6377 = vmatpush1.bf16.msra.mxu1 %v11463_v25 }
0x1155   : > { %5973 = vmatprep.subr.bf16.mxu0 %v11432_v59  ;;  %6378 = vmatprep.subr.bf16.mxu1 %v11468_v10 }
0x1158   : > { %5974 = vmatpush2.bf16.msra.mxu0 %v11430_v38  ;;  %6379 = vmatpush1.bf16.msra.mxu1 %v11466_v22  ;;  %v6006_v38 = vrot.slane %v9730_v63, %v12799_v26 }
0x1159   : > { %5975 = vmatprep.subr.bf16.mxu0 %v11435_v42  ;;  %6380 = vmatprep.subr.bf16.mxu1 %v11471_v28 }
0x115c   : > { %5976 = vmatpush2.bf16.msra.mxu0 %v11433_v60  ;;  %6381 = vmatpush1.bf16.msra.mxu1 %v11469_v0 }
0x115d   : > { %5977 = vmatprep.subr.bf16.mxu0 %v11438_v39  ;;  %6382 = vmatprep.subr.bf16.mxu1 %v11474_v2 }
0x1160   : > { %5978 = vmatpush2.bf16.msra.mxu0 %v11436_v40  ;;  %6383 = vmatpush1.bf16.msra.mxu1 %v11472_v14 }
0x1161   : > { %5979 = vmatprep.subr.bf16.mxu0 %v11441_v41  ;;  %6384 = vmatprep.subr.bf16.mxu1 %v11477_v6  ;;  %v6010_v41 = vrot.slane %v9730_v63, %v12801_v9  ;;  %v11584_v63 = vld [vmem:[%s13535_s11 + $0x1c4] ss:$8 sps:$4 sm:$0xff]  }
0x1164   : > { %5980 = vmatpush2.bf16.msra.mxu0 %v11439_v44  ;;  %6385 = vmatpush2.bf16.msra.mxu1 %v11475_v3 }
0x1165   : > { %5981 = vmatprep.subr.bf16.mxu0 %v11444_v53 }
0x1168   : > { %5982 = vmatpush2.bf16.msra.mxu0 %v11442_v5 }
0x1169   : > { %5983 = vmatprep.subr.bf16.mxu0 %v11447_v45 }
0x116c   : > { %5984 = vmatpush2.bf16.msra.mxu0 %v11445_v50 }
0x116d   : > { %5985 = vmatprep.subr.bf16.mxu0 %v11450_v56 }
0x1170   : > { %5986 = vmatpush2.bf16.msra.mxu0 %v11448_v57 }
0x1173   : > { %5988 = vmatmul.mubr.bf16.vlgmr.msra.gmra.mxu0 %v5376_v7  ;;  %v11480_v7 = vld [vmem:[%s13535_s11 + $0xe4] ss:$8 sps:$4 sm:$0xff]  }
0x1174   : > { %6460 = vmatprep.mubr.bf16.mxu0 %v12076_v52  ;;  %6386 = vmatprep.subr.bf16.mxu1 %v11480_v7 }
0x1175   : > { %6387 = vmatpush2.bf16.msra.mxu1 %v11478_v4  ;;  %v11549_v4 = vld [vmem:[%s13535_s11 + $0x170] ss:$8 sps:$4 sm:$0xff]  }
0x1176   : > { %6388 = vmatprep.subr.bf16.mxu1 %v11483_v15  ;;  %v11551_v15 = vld [vmem:[%s13535_s11 + $0x174] ss:$8 sps:$4 sm:$0xff]  }
0x1179   : > { %6389 = vmatpush2.bf16.msra.mxu1 %v11481_v16  ;;  %v11554_v16 = vld [vmem:[%s13535_s11 + $0x164] ss:$8 sps:$4 sm:$0xff]  }
0x117a   : > { %6390 = vmatprep.subr.bf16.mxu1 %v11486_v47  ;;  %v11552_v47 = vld [vmem:[%s13535_s11 + $0x160] ss:$8 sps:$4 sm:$0xff]  }
0x117d   : > { %6391 = vmatpush2.bf16.msra.mxu1 %v11484_v49  ;;  %v11557_v49 = vld [vmem:[%s13535_s11 + $0x154] ss:$8 sps:$4 sm:$0xff]  }
0x117e   : > { %6392 = vmatprep.subr.bf16.mxu1 %v11489_v51  ;;  %v11555_v51 = vld [vmem:[%s13535_s11 + $0x150] ss:$8 sps:$4 sm:$0xff]  }
0x1181   : > { %6393 = vmatpush2.bf16.msra.mxu1 %v11487_v54  ;;  %v11560_v54 = vld [vmem:[%s13535_s11 + $0x144] ss:$8 sps:$4 sm:$0xff]  }
0x1182   : > { %6394 = vmatprep.subr.bf16.mxu1 %v11492_v17  ;;  %v11558_v17 = vld [vmem:[%s13535_s11 + $0x140] ss:$8 sps:$4 sm:$0xff]  }
0x1185   : > { %6395 = vmatpush2.bf16.msra.mxu1 %v11490_v18  ;;  %v11563_v18 = vld [vmem:[%s13535_s11 + $0x134] ss:$8 sps:$4 sm:$0xff]  }
0x1186   : > { %6396 = vmatprep.subr.bf16.mxu1 %v11495_v21  ;;  %v11561_v21 = vld [vmem:[%s13535_s11 + $0x130] ss:$8 sps:$4 sm:$0xff]  }
0x1189   : > { %6397 = vmatpush2.bf16.msra.mxu1 %v11493_v24  ;;  %v11566_v24 = vld [vmem:[%s13535_s11 + $0x124] ss:$8 sps:$4 sm:$0xff]  }
0x118a   : > { %6398 = vmatprep.subr.bf16.mxu1 %v11498_v30  ;;  %v11564_v30 = vld [vmem:[%s13535_s11 + $0x120] ss:$8 sps:$4 sm:$0xff]  }
0x118d   : > { %6399 = vmatpush2.bf16.msra.mxu1 %v11496_v31  ;;  %v11569_v31 = vld [vmem:[%s13535_s11 + $0x114] ss:$8 sps:$4 sm:$0xff]  }
0x118e   : > { %7020 = vmatprep.subr.bf16.mxu1 %v11551_v15  ;;  %v11510_v15 = vld [vmem:[%s13535_s11 + $0x240] ss:$8 sps:$4 sm:$0xff]  }
0x11f3   : > { %v5903_v34 = vpop.f32.mrf.mxu0 }
0x11f4   : > { %v5904_v59 = vadd.f32 %v5903_v34, %v5382_v1  ;;  %v11570_v34 = vld [vmem:[%s13535_s11 + $0x100] ss:$8 sps:$4 sm:$0xff]  }
0x11f5   : > { %v5905_v36 = vpop.f32.mrf.mxu0 }
0x11f6   : > { %v5906_v55 = vadd.f32 %v5905_v36, %v5386_v20  ;;  %v11573_v36 = vld [vmem:[%s13535_s11 + $0x1f0] ss:$8 sps:$4 sm:$0xff]  }
0x11f7   : > { %v5907_v62 = vpop.f32.mrf.mxu0 }
0x11f8   : > { %v5908_v39 = vadd.f32 %v5907_v62, %v5382_v1  ;;  %v6192_v62 = vld [vmem:[%s13536_s15] ss:$4 sm:$0x3]  ;;  %v11579_v1 = vld [vmem:[%s13535_s11 + $0x1d0] ss:$8 sps:$4 sm:$0xff]  }
0x11f9   : > { %v5909_v12 = vpop.f32.mrf.mxu0 }
0x11fa   : > { %v5910_v5 = vadd.f32 %v5909_v12, %v5386_v20  ;;  %v6201_v12 = vrot.slane %v6192_v62, %v12799_v26 }
0x11fb   : > { %v5946_v33 = vpop.f32.mrf.mxu1 }
0x11fc   : > { %v5947_v44 = vadd.f32 %v5946_v33, %v5904_v59  ;;  %v11567_v33 = vld [vmem:[%s13535_s11 + $0x110] ss:$8 sps:$4 sm:$0xff]  }
0x11fd   : > { %v5948_v32 = vpop.f32.mrf.mxu1 }
0x11fe   : > { %v5949_v40 = vadd.f32 %v5948_v32, %v5906_v55  ;;  %v11572_v32 = vld [vmem:[%s13535_s11 + $0x104] ss:$8 sps:$4 sm:$0xff]  }
0x11ff   : > { %v5950_v35 = vpop.f32.mrf.mxu1 }
0x1200   : > { %v5951_v45 = vadd.f32 %v5950_v35, %v5908_v39  ;;  %v11575_v35 = vld [vmem:[%s13535_s11 + $0x1f4] ss:$8 sps:$4 sm:$0xff]  }
0x1201   : > { %v5952_v37 = vpop.f32.mrf.mxu1  ;;  %v11587_v39 = vld [vmem:[%s13535_s11 + $0x1b4] ss:$8 sps:$4 sm:$0xff]  }
0x1202   : > { %v5953_v46 = vadd.f32 %v5952_v37, %v5910_v5  ;;  %v11578_v37 = vld [vmem:[%s13535_s11 + $0x1e4] ss:$8 sps:$4 sm:$0xff]   ;;  %v11585_v5 = vld [vmem:[%s13535_s11 + $0x1b0] ss:$8 sps:$4 sm:$0xff]  }
0x1203   : > { %v6047_v19 = vpop.f32.mrf.mxu1 }
0x1204   : > { %v6048_v56 = vadd.f32 %v6047_v19, %v6006_v38  ;;  %v11576_v19 = vld [vmem:[%s13535_s11 + $0x1e0] ss:$8 sps:$4 sm:$0xff]  }
0x1205   : > { %v6049_v61 = vpop.f32.mrf.mxu1 }
0x1206   : > { %v6050_v11 = vadd.f32 %v6049_v61, %v6010_v41  ;;  %v6205_v61 = vrot.slane %v6192_v62, %v12801_v9  ;;  %v11540_v62 = vld [vmem:[%s13535_s11 + $0x2a0] ss:$8 sps:$4 sm:$0xff]  }
0x1207   : > { %v6051_v60 = vpop.f32.mrf.mxu1 }
0x1208   : > { %v6052_v13 = vadd.f32 %v6051_v60, %v6006_v38  ;;  %v11582_v38 = vld [vmem:[%s13535_s11 + $0x1c0] ss:$8 sps:$4 sm:$0xff]  }
0x1209   : > { %v6053_v23 = vpop.f32.mrf.mxu1 }
0x120a   : > { %v6054_v25 = vadd.f32 %v6053_v23, %v6010_v41 }
0x1233   : > { %v5989_v42 = vpop.f32.mrf.mxu0 }
0x1234   : > { %v5990_v57 = vadd.f32 %v5989_v42, %v5947_v44 }
0x1235   : > { %v5991_v53 = vpop.f32.mrf.mxu0 }
0x1236   : > { %v5992_v50 = vadd.f32 %v5991_v53, %v5949_v40  ;;  %v12987_v22 = vadd.f32 %v6048_v56, %v5990_v57  ;;  %v11590_v56 = vld [vmem:[%s13535_s11 + $0x1a4] ss:$8 sps:$4 sm:$0xff]  }
0x1237   : > { %v5993_v43 = vpop.f32.mrf.mxu0 }
0x1238   : > { %v5994_v29 = vadd.f32 %v5993_v43, %v5951_v45  ;;  %v12983_v8 = vadd.f32 %v6050_v11, %v5992_v50  ;;  %v6060_v6 = vmax.f32 %v12987_v22, 0.0  ;;  %v13037_v11 = vld [vmem:[%s12220_s6] sm:$0xff]  }
0x1239   : > { %v5995_v58 = vpop.f32.mrf.mxu0 }
0x123a   : > { %v12985_v27 = vadd.f32 %v6052_v13, %v5994_v29  ;;  %v5996_v10 = vadd.f32 %v5995_v58, %v5953_v46  ;;  %v6061_v2 = vmax.f32 %v12983_v8, 0.0  ;;  %v11588_v46 = vld [vmem:[%s13535_s11 + $0x1a0] ss:$8 sps:$4 sm:$0xff]   ;;  %v11502_v13 = vld [vmem:[%s13535_s11 + $0x274] ss:$8 sps:$4 sm:$0xff]  }
0x123b   : > { %v13046_v29 = vld [vmem:[%s12220_s6 + $0x10] sm:$0xff]  }
0x123c   : > { %v12989_v28 = vadd.f32 %v6054_v25, %v5996_v10  ;;  %v6062_v0 = vmax.f32 %v12985_v27, 0.0  ;;  %v11500_v58 = vld [vmem:[%s13535_s11 + $0x270] ss:$8 sps:$4 sm:$0xff]   ;;  %v11506_v25 = vld [vmem:[%s13535_s11 + $0x264] ss:$8 sps:$4 sm:$0xff]  }
0x123d   : > { %v11504_v10 = vld [vmem:[%s13535_s11 + $0x260] ss:$8 sps:$4 sm:$0xff]  }
0x123e   : > { %v6063_v14 = vmax.f32 %v12989_v28, 0.0  ;;  %v6195_v7 = vpack.c.bf16 %v6062_v0, %v6060_v6  ;;  %v7285_v28 = vld [vmem:[%s13538_s23] ss:$4 sm:$0x3] }
0x1240   : > { %v6196_v3 = vpack.c.bf16 %v6063_v14, %v6061_v2 }
0x1242   : > { %6400 = vmatprep.mubr.bf16.mxu1 %v6196_v3  ;;  %v11509_v3 = vld [vmem:[%s13535_s11 + $0x254] ss:$8 sps:$4 sm:$0xff]  }
0x1243   : > { %6401 = vmatmul.mubr.bf16.vlgmr.msra.gmra.mxu1 %v6195_v7  ;;  %v11507_v7 = vld [vmem:[%s13535_s11 + $0x250] ss:$8 sps:$4 sm:$0xff]  }
0x1244   : > { %7021 = vmatpush1.bf16.msra.mxu1 %v11549_v4  ;;  %v11512_v4 = vld [vmem:[%s13535_s11 + $0x244] ss:$8 sps:$4 sm:$0xff]  }
0x1245   : > { %7022 = vmatprep.subr.bf16.mxu1 %v11554_v16  ;;  %v11515_v16 = vld [vmem:[%s13535_s11 + $0x234] ss:$8 sps:$4 sm:$0xff]  }
0x1248   : > { %7023 = vmatpush1.bf16.msra.mxu1 %v11552_v47  ;;  %v11513_v47 = vld [vmem:[%s13535_s11 + $0x230] ss:$8 sps:$4 sm:$0xff]  }
0x1249   : > { %7024 = vmatprep.subr.bf16.mxu1 %v11557_v49  ;;  %v11518_v49 = vld [vmem:[%s13535_s11 + $0x224] ss:$8 sps:$4 sm:$0xff]  }
0x124c   : > { %7025 = vmatpush1.bf16.msra.mxu1 %v11555_v51  ;;  %v11516_v51 = vld [vmem:[%s13535_s11 + $0x220] ss:$8 sps:$4 sm:$0xff]  }
0x124d   : > { %7026 = vmatprep.subr.bf16.mxu1 %v11560_v54  ;;  %v11521_v54 = vld [vmem:[%s13535_s11 + $0x214] ss:$8 sps:$4 sm:$0xff]  }
0x1250   : > { %7027 = vmatpush1.bf16.msra.mxu1 %v11558_v17  ;;  %v11519_v17 = vld [vmem:[%s13535_s11 + $0x210] ss:$8 sps:$4 sm:$0xff]  }
0x1251   : > { %7028 = vmatprep.subr.bf16.mxu1 %v11563_v18  ;;  %v11524_v18 = vld [vmem:[%s13535_s11 + $0x204] ss:$8 sps:$4 sm:$0xff]  }
0x1254   : > { %7029 = vmatpush1.bf16.msra.mxu1 %v11561_v21  ;;  %v11522_v21 = vld [vmem:[%s13535_s11 + $0x200] ss:$8 sps:$4 sm:$0xff]  }
0x1255   : > { %7030 = vmatprep.subr.bf16.mxu1 %v11566_v24  ;;  %v11527_v24 = vld [vmem:[%s13535_s11 + $0x2f4] ss:$8 sps:$4 sm:$0xff]  }
0x1258   : > { %7031 = vmatpush1.bf16.msra.mxu1 %v11564_v30  ;;  %v11525_v30 = vld [vmem:[%s13535_s11 + $0x2f0] ss:$8 sps:$4 sm:$0xff]  }
0x1259   : > { %7032 = vmatprep.subr.bf16.mxu1 %v11569_v31  ;;  %v11530_v31 = vld [vmem:[%s13535_s11 + $0x2e4] ss:$8 sps:$4 sm:$0xff]  }
0x125c   : > { %7033 = vmatpush1.bf16.msra.mxu1 %v11567_v33  ;;  %v11528_v33 = vld [vmem:[%s13535_s11 + $0x2e0] ss:$8 sps:$4 sm:$0xff]  }
0x125d   : > { %7034 = vmatprep.subr.bf16.mxu1 %v11572_v32  ;;  %v11533_v32 = vld [vmem:[%s13535_s11 + $0x2d4] ss:$8 sps:$4 sm:$0xff]  }
0x1260   : > { %7035 = vmatpush1.bf16.msra.mxu1 %v11570_v34  ;;  %v11531_v34 = vld [vmem:[%s13535_s11 + $0x2d0] ss:$8 sps:$4 sm:$0xff]  }
0x1261   : > { %7036 = vmatprep.subr.bf16.mxu1 %v11575_v35  ;;  %v11536_v35 = vld [vmem:[%s13535_s11 + $0x2c4] ss:$8 sps:$4 sm:$0xff]  }
0x1264   : > { %7037 = vmatpush2.bf16.msra.mxu1 %v11573_v36  ;;  %v11534_v36 = vld [vmem:[%s13535_s11 + $0x2c0] ss:$8 sps:$4 sm:$0xff]  }
0x1265   : > { %7038 = vmatprep.subr.bf16.mxu1 %v11578_v37  ;;  %v11539_v37 = vld [vmem:[%s13535_s11 + $0x2b4] ss:$8 sps:$4 sm:$0xff]  }
0x1268   : > { %7039 = vmatpush2.bf16.msra.mxu1 %v11576_v19  ;;  %v11537_v19 = vld [vmem:[%s13535_s11 + $0x2b0] ss:$8 sps:$4 sm:$0xff]  }
0x1269   : > { %7040 = vmatprep.subr.bf16.mxu1 %v11581_v48  ;;  %v11542_v48 = vld [vmem:[%s13535_s11 + $0x2a4] ss:$8 sps:$4 sm:$0xff]  }
0x126c   : > { %7041 = vmatpush2.bf16.msra.mxu1 %v11579_v1  ;;  %v11543_v1 = vld [vmem:[%s13535_s11 + $0x290] ss:$8 sps:$4 sm:$0xff]  }
0x126d   : > { %7042 = vmatprep.subr.bf16.mxu1 %v11584_v63  ;;  %v11591_v63 = vld [vmem:[%s13535_s11 + $0x190] ss:$8 sps:$4 sm:$0xff]  }
0x1270   : > { %7043 = vmatpush2.bf16.msra.mxu1 %v11582_v38  ;;  %v11594_v38 = vld [vmem:[%s13535_s11 + $0x180] ss:$8 sps:$4 sm:$0xff]  }
0x1271   : > { %7044 = vmatprep.subr.bf16.mxu1 %v11587_v39 }
0x1274   : > { %7045 = vmatpush2.bf16.msra.mxu1 %v11585_v5 }
0x1275   : > { %7046 = vmatprep.subr.bf16.mxu1 %v11590_v56 }
0x1278   : > { %7047 = vmatpush2.bf16.msra.mxu1 %v11588_v46 }
0x1303   : > { %v6402_v20 = vpop.f32.mrf.mxu1 }
0x1304   : > { %v6403_v40 = vadd.f32 %v6402_v20, %v6201_v12  ;;  %v11545_v20 = vld [vmem:[%s13535_s11 + $0x294] ss:$8 sps:$4 sm:$0xff]  }
0x1305   : > { %v6404_v55 = vpop.f32.mrf.mxu1 }
0x1306   : > { %v6405_v42 = vadd.f32 %v6404_v55, %v6205_v61  ;;  %v6411_v57 = vmax.f32 %v6403_v40, 0.0  ;;  %v11546_v55 = vld [vmem:[%s13535_s11 + $0x280] ss:$8 sps:$4 sm:$0xff]  }
0x1307   : > { %v6406_v59 = vpop.f32.mrf.mxu1 }
0x1308   : > { %v6407_v60 = vadd.f32 %v6406_v59, %v6201_v12  ;;  %v6412_v45 = vmax.f32 %v6405_v42, 0.0  ;;  %v11593_v12 = vld [vmem:[%s13535_s11 + $0x194] ss:$8 sps:$4 sm:$0xff]   ;;  %v11596_v59 = vld [vmem:[%s13535_s11 + $0x184] ss:$8 sps:$4 sm:$0xff]  }
0x1309   : > { %v6408_v41 = vpop.f32.mrf.mxu1  ;;  %7048 = vmatprep.subr.bf16.mxu1 %v11593_v12  ;;  %v11599_v42 = vld [vmem:[%s13535_s11 + $0x374] ss:$8 sps:$4 sm:$0xff]   ;;  %v11648_v12 = vld [vmem:[%s13537_s22 + $0x60] ss:$8 sps:$4 sm:$0xff]  }
0x130a   : > { %v6409_v44 = vadd.f32 %v6408_v41, %v6205_v61  ;;  %v6413_v53 = vmax.f32 %v6407_v60, 0.0  ;;  %v11548_v61 = vld [vmem:[%s13535_s11 + $0x284] ss:$8 sps:$4 sm:$0xff]   ;;  %7049 = vmatpush2.bf16.msra.mxu1 %v11591_v63 }
0x130b   : > { %7050 = vmatprep.subr.bf16.mxu1 %v11596_v59  ;;  %v11650_v63 = vld [vmem:[%s13537_s22 + $0x64] ss:$8 sps:$4 sm:$0xff]   ;;  %v11651_v59 = vld [vmem:[%s13537_s22 + $0x50] ss:$8 sps:$4 sm:$0xff]  }
0x130c   : > { %v6414_v50 = vmax.f32 %v6409_v44, 0.0  ;;  %v13033_v23 = vpack.c.bf16 %v6413_v53, %v6411_v57  ;;  %v11597_v53 = vld [vmem:[%s13535_s11 + $0x370] ss:$8 sps:$4 sm:$0xff]   ;;  %v11600_v57 = vld [vmem:[%s13535_s11 + $0x360] ss:$8 sps:$4 sm:$0xff]  }
0x130e   : > { %v6416_v43 = vpack.c.bf16 %v6414_v50, %v6412_v45  ;;  %7051 = vmatpush2.bf16.msra.mxu1 %v11594_v38  ;;  %v11602_v45 = vld [vmem:[%s13535_s11 + $0x364] ss:$8 sps:$4 sm:$0xff]  }
0x130f   : > { %7106 = vmatprep.subr.bf16.mxu1 %v11599_v42  ;;  %v11656_v38 = vld [vmem:[%s13537_s22 + $0x44] ss:$8 sps:$4 sm:$0xff]   ;;  %v11654_v42 = vld [vmem:[%s13537_s22 + $0x40] ss:$8 sps:$4 sm:$0xff]  }
0x1310   : > { %6442 = vmatprep.subr.bf16.mxu0 %v6416_v43 }
0x1311   : > { %6443 = vmatpush1.bf16.msra.mxu0 %v13033_v23 }
0x1312   : > { %6498 = vmatprep.subr.bf16.mxu0 %v6416_v43 }
0x1314   : > { %9904 = vmatmul.mubr.msk.bf16.vlgmr.msra.gmra.mxu0 %vm6424_vm2, %v13037_v11 }
0x1315   : > { %6499 = vmatpush1.bf16.msra.mxu0 %v13033_v23  ;;  %6516 = vmatprep.mubr.bf16.mxu0 %v12076_v52 }
0x1316   : > { %7063 = vmatprep.subr.bf16.mxu0 %v11502_v13  ;;  %v11603_v13 = vld [vmem:[%s13535_s11 + $0x350] ss:$8 sps:$4 sm:$0xff]  }
0x131c   : > { %9908 = vmatmul.mubr.msk.bf16.vlgmr.msra.gmra.mxu0 %vm6424_vm2, %v13046_v29 }
0x131d   : > { %7064 = vmatpush1.bf16.msra.mxu0 %v11500_v58  ;;  %7095 = vmatprep.mubr.bf16.mxu0 %v6416_v43  ;;  %v11605_v43 = vld [vmem:[%s13535_s11 + $0x354] ss:$8 sps:$4 sm:$0xff]  }
0x131e   : > { %7065 = vmatprep.subr.bf16.mxu0 %v11506_v25  ;;  %v11608_v25 = vld [vmem:[%s13535_s11 + $0x344] ss:$8 sps:$4 sm:$0xff]  }
0x1321   : > { %7066 = vmatpush1.bf16.msra.mxu0 %v11504_v10  ;;  %v11606_v10 = vld [vmem:[%s13535_s11 + $0x340] ss:$8 sps:$4 sm:$0xff]  }
0x1322   : > { %7067 = vmatprep.subr.bf16.mxu0 %v11509_v3  ;;  %v11611_v3 = vld [vmem:[%s13535_s11 + $0x334] ss:$8 sps:$4 sm:$0xff]  }
0x1325   : > { %7068 = vmatpush1.bf16.msra.mxu0 %v11507_v7  ;;  %v11609_v7 = vld [vmem:[%s13535_s11 + $0x330] ss:$8 sps:$4 sm:$0xff]  }
0x1326   : > { %7069 = vmatprep.subr.bf16.mxu0 %v11512_v4  ;;  %v11614_v4 = vld [vmem:[%s13535_s11 + $0x324] ss:$8 sps:$4 sm:$0xff]  }
0x1329   : > { %7070 = vmatpush1.bf16.msra.mxu0 %v11510_v15  ;;  %v11612_v15 = vld [vmem:[%s13535_s11 + $0x320] ss:$8 sps:$4 sm:$0xff]  }
0x132a   : > { %7071 = vmatprep.subr.bf16.mxu0 %v11515_v16  ;;  %v11617_v16 = vld [vmem:[%s13535_s11 + $0x314] ss:$8 sps:$4 sm:$0xff]  }
0x132d   : > { %7072 = vmatpush1.bf16.msra.mxu0 %v11513_v47  ;;  %v11615_v47 = vld [vmem:[%s13535_s11 + $0x310] ss:$8 sps:$4 sm:$0xff]  }
0x132e   : > { %7073 = vmatprep.subr.bf16.mxu0 %v11518_v49  ;;  %v11620_v49 = vld [vmem:[%s13535_s11 + $0x304] ss:$8 sps:$4 sm:$0xff]  }
0x1331   : > { %7074 = vmatpush1.bf16.msra.mxu0 %v11516_v51  ;;  %v11618_v51 = vld [vmem:[%s13535_s11 + $0x300] ss:$8 sps:$4 sm:$0xff]  }
0x1332   : > { %7075 = vmatprep.subr.bf16.mxu0 %v11521_v54  ;;  %v11623_v54 = vld [vmem:[%s13535_s11 + $0x3f4] ss:$8 sps:$4 sm:$0xff]  }
0x1335   : > { %7076 = vmatpush1.bf16.msra.mxu0 %v11519_v17  ;;  %v11621_v17 = vld [vmem:[%s13535_s11 + $0x3f0] ss:$8 sps:$4 sm:$0xff]  }
0x1336   : > { %7077 = vmatprep.subr.bf16.mxu0 %v11524_v18  ;;  %v11626_v18 = vld [vmem:[%s13535_s11 + $0x3e4] ss:$8 sps:$4 sm:$0xff]  }
0x1339   : > { %7078 = vmatpush1.bf16.msra.mxu0 %v11522_v21  ;;  %v11624_v21 = vld [vmem:[%s13535_s11 + $0x3e0] ss:$8 sps:$4 sm:$0xff]  }
0x133a   : > { %7079 = vmatprep.subr.bf16.mxu0 %v11527_v24  ;;  %v11629_v24 = vld [vmem:[%s13535_s11 + $0x3d4] ss:$8 sps:$4 sm:$0xff]  }
0x133d   : > { %7080 = vmatpush2.bf16.msra.mxu0 %v11525_v30  ;;  %v11627_v30 = vld [vmem:[%s13535_s11 + $0x3d0] ss:$8 sps:$4 sm:$0xff]  }
0x133e   : > { %7081 = vmatprep.subr.bf16.mxu0 %v11530_v31  ;;  %v11632_v31 = vld [vmem:[%s13535_s11 + $0x3c4] ss:$8 sps:$4 sm:$0xff]  }
0x1341   : > { %7082 = vmatpush2.bf16.msra.mxu0 %v11528_v33  ;;  %v11630_v33 = vld [vmem:[%s13535_s11 + $0x3c0] ss:$8 sps:$4 sm:$0xff]  }
0x1342   : > { %7083 = vmatprep.subr.bf16.mxu0 %v11533_v32  ;;  %v11635_v32 = vld [vmem:[%s13535_s11 + $0x3b4] ss:$8 sps:$4 sm:$0xff]  }
0x1345   : > { %7084 = vmatpush2.bf16.msra.mxu0 %v11531_v34  ;;  %v11633_v34 = vld [vmem:[%s13535_s11 + $0x3b0] ss:$8 sps:$4 sm:$0xff]  }
0x1346   : > { %7085 = vmatprep.subr.bf16.mxu0 %v11536_v35  ;;  %v11638_v35 = vld [vmem:[%s13535_s11 + $0x3a4] ss:$8 sps:$4 sm:$0xff]  }
0x1349   : > { %7086 = vmatpush2.bf16.msra.mxu0 %v11534_v36  ;;  %v11636_v36 = vld [vmem:[%s13535_s11 + $0x3a0] ss:$8 sps:$4 sm:$0xff]  }
0x134a   : > { %7087 = vmatprep.subr.bf16.mxu0 %v11539_v37  ;;  %v11641_v37 = vld [vmem:[%s13535_s11 + $0x394] ss:$8 sps:$4 sm:$0xff]  }
0x134d   : > { %7088 = vmatpush2.bf16.msra.mxu0 %v11537_v19  ;;  %v11639_v19 = vld [vmem:[%s13535_s11 + $0x390] ss:$8 sps:$4 sm:$0xff]  }
0x134e   : > { %7089 = vmatprep.subr.bf16.mxu0 %v11542_v48  ;;  %v11644_v48 = vld [vmem:[%s13535_s11 + $0x384] ss:$8 sps:$4 sm:$0xff]  }
0x1351   : > { %7090 = vmatpush2.bf16.msra.mxu0 %v11540_v62  ;;  %v11642_v62 = vld [vmem:[%s13535_s11 + $0x380] ss:$8 sps:$4 sm:$0xff]  }
0x1352   : > { %7091 = vmatprep.subr.bf16.mxu0 %v11545_v20 }
0x1355   : > { %7092 = vmatpush2.bf16.msra.mxu0 %v11543_v1  ;;  %v11645_v1 = vld [vmem:[%s13537_s22 + $0x70] ss:$8 sps:$4 sm:$0xff]  }
0x1356   : > { %7093 = vmatprep.subr.bf16.mxu0 %v11548_v61  ;;  %v11647_v61 = vld [vmem:[%s13537_s22 + $0x74] ss:$8 sps:$4 sm:$0xff]  }
0x1359   : > { %7094 = vmatpush2.bf16.msra.mxu0 %v11546_v55  ;;  %v11653_v55 = vld [vmem:[%s13537_s22 + $0x54] ss:$8 sps:$4 sm:$0xff]  }
0x135a   : > { %7461 = vmatprep.subr.bf16.mxu0 %v11647_v61 }
0x135c   : > { %7096 = vmatmul.mubr.bf16.vlgmr.msra.gmra.mxu0 %v13033_v23 }
0x135d   : > { %7462 = vmatpush1.bf16.msra.mxu0 %v11645_v1 }
0x135e   : > { %7463 = vmatprep.subr.bf16.mxu0 %v11650_v63 }
0x1361   : > { %7464 = vmatpush1.bf16.msra.mxu0 %v11648_v12 }
0x1362   : > { %7465 = vmatprep.subr.bf16.mxu0 %v11653_v55 }
0x1365   : > { %7466 = vmatpush1.bf16.msra.mxu0 %v11651_v59 }
0x1366   : > { %7467 = vmatprep.subr.bf16.mxu0 %v11656_v38 }
0x1369   : > { %7468 = vmatpush1.bf16.msra.mxu0 %v11654_v42 }
0x13d4   : > { %v6462_v60 = vpop.f32.mrf.mxu0 }
0x13d6   : > { %v6464_v39 = vpop.f32.mrf.mxu0 }
0x13d8   : > { %v6466_v40 = vpop.f32.mrf.mxu0 }
0x13d9   : > { %v6471_v5 = vpack.c.bf16 %v6466_v40, %v6462_v60  ;;  %v11659_v60 = vld [vmem:[%s13537_s22 + $0x34] ss:$8 sps:$4 sm:$0xff]   ;;  %v11662_v40 = vld [vmem:[%s13537_s22 + $0x24] ss:$8 sps:$4 sm:$0xff]  }
0x13da   : > { %v6468_v41 = vpop.f32.mrf.mxu0  ;;  %7469 = vmatprep.subr.bf16.mxu0 %v11659_v60 }
0x13db   : > { %v6472_v44 = vpack.c.bf16 %v6468_v41, %v6464_v39  ;;  %v11657_v39 = vld [vmem:[%s13537_s22 + $0x30] ss:$8 sps:$4 sm:$0xff]   ;;  %v11660_v41 = vld [vmem:[%s13537_s22 + $0x20] ss:$8 sps:$4 sm:$0xff]  }
0x13dc   : > { %v13089_v50 = vpop.f32.mrf.mxu0  ;;  %7470 = vmatpush1.bf16.msra.mxu0 %v11657_v39 }
0x13dd   : > { %7052 = vmatprep.mubr.bf16.mxu1 %v6472_v44  ;;  %7471 = vmatprep.subr.bf16.mxu0 %v11662_v40  ;;  %v11665_v44 = vld [vmem:[%s13537_s22 + $0x14] ss:$8 sps:$4 sm:$0xff]  }
0x13de   : > { %7053 = vmatmul.mubr.bf16.vlgmr.msra.gmra.mxu1 %v6471_v5  ;;  %v6520_v56 = vpop.f32.mrf.mxu0  ;;  %v11668_v5 = vld [vmem:[%s13537_s22 + $0x4] ss:$8 sps:$4 sm:$0xff]  }
0x13df   : > { %7107 = vmatpush1.bf16.msra.mxu1 %v11597_v53  ;;  %v11663_v53 = vld [vmem:[%s13537_s22 + $0x10] ss:$8 sps:$4 sm:$0xff]  }
0x13e0   : > { %7108 = vmatprep.subr.bf16.mxu1 %v11602_v45  ;;  %v6522_v23 = vpop.f32.mrf.mxu0  ;;  %7472 = vmatpush1.bf16.msra.mxu0 %v11660_v41  ;;  %v11666_v45 = vld [vmem:[%s13537_s22] ss:$8 sps:$4 sm:$0xff]  }
0x13e1   : > { %v6527_v20 = vpack.c.bf16 %v6522_v23, %v13089_v50  ;;  %7473 = vmatprep.subr.bf16.mxu0 %v11665_v44  ;;  %v11671_v50 = vld [vmem:[%s13537_s22 + $0xf4] ss:$8 sps:$4 sm:$0xff]  }
0x13e2   : > { %v6524_v46 = vpop.f32.mrf.mxu0  ;;  %v11677_v23 = vld [vmem:[%s13537_s22 + $0xd4] ss:$8 sps:$4 sm:$0xff]  }
0x13e3   : > { %7109 = vmatpush1.bf16.msra.mxu1 %v11600_v57  ;;  %v6528_v58 = vpack.c.bf16 %v6524_v46, %v6520_v56  ;;  %v11669_v56 = vld [vmem:[%s13537_s22 + $0xf0] ss:$8 sps:$4 sm:$0xff]   ;;  %v11674_v57 = vld [vmem:[%s13537_s22 + $0xe4] ss:$8 sps:$4 sm:$0xff]  }
0x13e4   : > { %7110 = vmatprep.subr.bf16.mxu1 %v11605_v43  ;;  %7474 = vmatpush1.bf16.msra.mxu0 %v11663_v53  ;;  %v11672_v43 = vld [vmem:[%s13537_s22 + $0xe0] ss:$8 sps:$4 sm:$0xff]   ;;  %v11675_v46 = vld [vmem:[%s13537_s22 + $0xd0] ss:$8 sps:$4 sm:$0xff]  }
0x13e5   : > { %7138 = vmatprep.mubr.bf16.mxu1 %v6528_v58  ;;  %7475 = vmatprep.subr.bf16.mxu0 %v11668_v5  ;;  %v11678_v58 = vld [vmem:[%s13537_s22 + $0xc0] ss:$8 sps:$4 sm:$0xff]  }
0x13e7   : > { %7111 = vmatpush1.bf16.msra.mxu1 %v11603_v13  ;;  %v11680_v13 = vld [vmem:[%s13537_s22 + $0xc4] ss:$8 sps:$4 sm:$0xff]  }
0x13e8   : > { %7112 = vmatprep.subr.bf16.mxu1 %v11608_v25  ;;  %7476 = vmatpush1.bf16.msra.mxu0 %v11666_v45  ;;  %v11683_v25 = vld [vmem:[%s13537_s22 + $0xb4] ss:$8 sps:$4 sm:$0xff]  }
0x13e9   : > { %7477 = vmatprep.subr.bf16.mxu0 %v11671_v50 }
0x13eb   : > { %7113 = vmatpush1.bf16.msra.mxu1 %v11606_v10  ;;  %v11681_v10 = vld [vmem:[%s13537_s22 + $0xb0] ss:$8 sps:$4 sm:$0xff]  }
0x13ec   : > { %7114 = vmatprep.subr.bf16.mxu1 %v11611_v3  ;;  %7478 = vmatpush2.bf16.msra.mxu0 %v11669_v56  ;;  %v11686_v3 = vld [vmem:[%s13537_s22 + $0xa4] ss:$8 sps:$4 sm:$0xff]  }
0x13ed   : > { %7479 = vmatprep.subr.bf16.mxu0 %v11674_v57 }
0x13ef   : > { %7115 = vmatpush1.bf16.msra.mxu1 %v11609_v7  ;;  %v11684_v7 = vld [vmem:[%s13537_s22 + $0xa0] ss:$8 sps:$4 sm:$0xff]  }
0x13f0   : > { %7116 = vmatprep.subr.bf16.mxu1 %v11614_v4  ;;  %7480 = vmatpush2.bf16.msra.mxu0 %v11672_v43  ;;  %v11689_v4 = vld [vmem:[%s13537_s22 + $0x94] ss:$8 sps:$4 sm:$0xff]  }
0x13f1   : > { %7481 = vmatprep.subr.bf16.mxu0 %v11677_v23 }
0x13f3   : > { %7117 = vmatpush1.bf16.msra.mxu1 %v11612_v15  ;;  %v11687_v15 = vld [vmem:[%s13537_s22 + $0x90] ss:$8 sps:$4 sm:$0xff]  }
0x13f4   : > { %7118 = vmatprep.subr.bf16.mxu1 %v11617_v16  ;;  %7482 = vmatpush2.bf16.msra.mxu0 %v11675_v46  ;;  %v11692_v16 = vld [vmem:[%s13537_s22 + $0x84] ss:$8 sps:$4 sm:$0xff]  }
0x13f5   : > { %7483 = vmatprep.subr.bf16.mxu0 %v11680_v13 }
0x13f7   : > { %7119 = vmatpush1.bf16.msra.mxu1 %v11615_v47  ;;  %v11690_v47 = vld [vmem:[%s13537_s22 + $0x80] ss:$8 sps:$4 sm:$0xff]  }
0x13f8   : > { %7120 = vmatprep.subr.bf16.mxu1 %v11620_v49  ;;  %7484 = vmatpush2.bf16.msra.mxu0 %v11678_v58 }
0x13f9   : > { %7485 = vmatprep.subr.bf16.mxu0 %v11683_v25 }
0x13fb   : > { %7121 = vmatpush1.bf16.msra.mxu1 %v11618_v51 }
0x13fc   : > { %7122 = vmatprep.subr.bf16.mxu1 %v11623_v54  ;;  %7486 = vmatpush2.bf16.msra.mxu0 %v11681_v10  ;;  %v9870_v54 = vld [vmem:[%s13536_s15 + $0x1] ss:$4 sm:$0x3] }
0x13fd   : > { %7487 = vmatprep.subr.bf16.mxu0 %v11686_v3  ;;  %v11695_v3 = vld [vmem:[%s13537_s22 + $0x274] ss:$8 sps:$4 sm:$0xff]  }
0x13ff   : > { %7123 = vmatpush2.bf16.msra.mxu1 %v11621_v17 }
0x1400   : > { %7124 = vmatprep.subr.bf16.mxu1 %v11626_v18  ;;  %7488 = vmatpush2.bf16.msra.mxu0 %v11684_v7  ;;  %v6537_v18 = vrot.slane %v9870_v54, %v12801_v9  ;;  %v11743_v7 = vld [vmem:[%s13537_s22 + $0x174] ss:$8 sps:$4 sm:$0xff]  }
0x1401   : > { %7489 = vmatprep.subr.bf16.mxu0 %v11689_v4 }
0x1403   : > { %7125 = vmatpush2.bf16.msra.mxu1 %v11624_v21  ;;  %v6533_v21 = vrot.slane %v9870_v54, %v12799_v26  ;;  %v11701_v54 = vld [vmem:[%s13537_s22 + $0x254] ss:$8 sps:$4 sm:$0xff]  }
0x1404   : > { %7126 = vmatprep.subr.bf16.mxu1 %v11629_v24  ;;  %7490 = vmatpush2.bf16.msra.mxu0 %v11687_v15  ;;  %v11693_v15 = vld [vmem:[%s13537_s22 + $0x270] ss:$8 sps:$4 sm:$0xff]  }
0x1405   : > { %7491 = vmatprep.subr.bf16.mxu0 %v11692_v16  ;;  %v11698_v16 = vld [vmem:[%s13537_s22 + $0x264] ss:$8 sps:$4 sm:$0xff]  }
0x1407   : > { %7127 = vmatpush2.bf16.msra.mxu1 %v11627_v30 }
0x1408   : > { %7128 = vmatprep.subr.bf16.mxu1 %v11632_v31  ;;  %7492 = vmatpush2.bf16.msra.mxu0 %v11690_v47  ;;  %v11741_v47 = vld [vmem:[%s13537_s22 + $0x170] ss:$8 sps:$4 sm:$0xff]  }
0x140b   : > { %7129 = vmatpush2.bf16.msra.mxu1 %v11630_v33 }
0x140c   : > { %7130 = vmatprep.subr.bf16.mxu1 %v11635_v32 }
0x140f   : > { %7131 = vmatpush2.bf16.msra.mxu1 %v11633_v34 }
0x1410   : > { %7132 = vmatprep.subr.bf16.mxu1 %v11638_v35 }
0x1413   : > { %7133 = vmatpush2.bf16.msra.mxu1 %v11636_v36 }
0x1414   : > { %7134 = vmatprep.subr.bf16.mxu1 %v11641_v37 }
0x1417   : > { %7135 = vmatpush2.bf16.msra.mxu1 %v11639_v19 }
0x1418   : > { %7136 = vmatprep.subr.bf16.mxu1 %v11644_v48 }
0x141b   : > { %7137 = vmatpush2.bf16.msra.mxu1 %v11642_v62 }
0x141c   : > { %v7097_v17 = vpop.f32.mrf.mxu0 }
0x141e   : > { %7139 = vmatmul.mubr.bf16.vlgmr.msra.gmra.mxu1 %v6527_v20  ;;  %v7099_v30 = vpop.f32.mrf.mxu0 }
0x141f   : > { %7542 = vmatprep.mubr.bf16.mxu1 %v12076_v52 }
0x1420   : > { %v7101_v35 = vpop.f32.mrf.mxu0 }
0x1422   : > { %v7103_v61 = vpop.f32.mrf.mxu0 }
0x149e   : > { %v7054_v49 = vpop.f32.mrf.mxu1 }
0x149f   : > { %v7055_v33 = vadd.f32 %v7054_v49, %v6533_v21  ;;  %v11746_v49 = vld [vmem:[%s13537_s22 + $0x164] ss:$8 sps:$4 sm:$0xff]  }
0x14a0   : > { %v7056_v51 = vpop.f32.mrf.mxu1 }
0x14a1   : > { %v7057_v31 = vadd.f32 %v7056_v51, %v6537_v18  ;;  %v7098_v48 = vadd.f32 %v7097_v17, %v7055_v33  ;;  %v11696_v51 = vld [vmem:[%s13537_s22 + $0x260] ss:$8 sps:$4 sm:$0xff]  }
0x14a2   : > { %v7058_v24 = vpop.f32.mrf.mxu1  ;;  %v11744_v17 = vld [vmem:[%s13537_s22 + $0x160] ss:$8 sps:$4 sm:$0xff]  }
0x14a3   : > { %v7059_v34 = vadd.f32 %v7058_v24, %v6533_v21  ;;  %v7100_v19 = vadd.f32 %v7099_v30, %v7057_v31  ;;  %v11704_v21 = vld [vmem:[%s13537_s22 + $0x244] ss:$8 sps:$4 sm:$0xff]   ;;  %v11702_v30 = vld [vmem:[%s13537_s22 + $0x240] ss:$8 sps:$4 sm:$0xff]   ;;  %v11707_v31 = vld [vmem:[%s13537_s22 + $0x234] ss:$8 sps:$4 sm:$0xff]  }
0x14a4   : > { %v7060_v32 = vpop.f32.mrf.mxu1  ;;  %v11752_v24 = vld [vmem:[%s13537_s22 + $0x144] ss:$8 sps:$4 sm:$0xff]   ;;  %v11750_v33 = vld [vmem:[%s13537_s22 + $0x140] ss:$8 sps:$4 sm:$0xff]  }
0x14a5   : > { %v7061_v37 = vadd.f32 %v7060_v32, %v6537_v18  ;;  %v7102_v1 = vadd.f32 %v7101_v35, %v7059_v34  ;;  %v11749_v18 = vld [vmem:[%s13537_s22 + $0x154] ss:$8 sps:$4 sm:$0xff]   ;;  %v11705_v34 = vld [vmem:[%s13537_s22 + $0x230] ss:$8 sps:$4 sm:$0xff]   ;;  %v11710_v35 = vld [vmem:[%s13537_s22 + $0x224] ss:$8 sps:$4 sm:$0xff]  }
0x14a6   : > { %v11755_v32 = vld [vmem:[%s13537_s22 + $0x134] ss:$8 sps:$4 sm:$0xff]  }
0x14a7   : > { %v7104_v59 = vadd.f32 %v7103_v61, %v7061_v37  ;;  %v11758_v37 = vld [vmem:[%s13537_s22 + $0x124] ss:$8 sps:$4 sm:$0xff]  }
0x14a8   : > { %v11716_v61 = vld [vmem:[%s13537_s22 + $0x204] ss:$8 sps:$4 sm:$0xff]  }
0x14de   : > { %v7140_v36 = vpop.f32.mrf.mxu1 }
0x14df   : > { %v7141_v63 = vadd.f32 %v7140_v36, %v7098_v48  ;;  %v11753_v36 = vld [vmem:[%s13537_s22 + $0x130] ss:$8 sps:$4 sm:$0xff]   ;;  %v11713_v48 = vld [vmem:[%s13537_s22 + $0x214] ss:$8 sps:$4 sm:$0xff]  }
0x14e0   : > { %v7142_v62 = vpop.f32.mrf.mxu1 }
0x14e1   : > { %v7143_v20 = vadd.f32 %v7142_v62, %v7100_v19  ;;  %v13167_v40 = vadd.f32 %v7141_v63, %v6060_v6  ;;  %v7294_v6 = vrot.slane %v7285_v28, %v12799_v26  ;;  %v11708_v19 = vld [vmem:[%s13537_s22 + $0x220] ss:$8 sps:$4 sm:$0xff]   ;;  %v11759_v63 = vld [vmem:[%s13537_s22 + $0x110] ss:$8 sps:$4 sm:$0xff]  }
0x14e2   : > { %v7144_v12 = vpop.f32.mrf.mxu1  ;;  %v11756_v62 = vld [vmem:[%s13537_s22 + $0x120] ss:$8 sps:$4 sm:$0xff]  }
0x14e3   : > { %v7145_v55 = vadd.f32 %v7144_v12, %v7102_v1  ;;  %v13159_v42 = vadd.f32 %v7143_v20, %v6061_v2  ;;  %v7153_v2 = vmax.f32 %v13167_v40, 0.0  ;;  %v11761_v20 = vld [vmem:[%s13537_s22 + $0x114] ss:$8 sps:$4 sm:$0xff]   ;;  %v11711_v1 = vld [vmem:[%s13537_s22 + $0x210] ss:$8 sps:$4 sm:$0xff]  }
0x14e4   : > { %v7146_v38 = vpop.f32.mrf.mxu1  ;;  %v11764_v12 = vld [vmem:[%s13537_s22 + $0x104] ss:$8 sps:$4 sm:$0xff]  }
0x14e5   : > { %v13163_v60 = vadd.f32 %v7145_v55, %v6062_v0  ;;  %v7147_v39 = vadd.f32 %v7146_v38, %v7104_v59  ;;  %v7154_v53 = vmax.f32 %v13159_v42, 0.0  ;;  %v11714_v55 = vld [vmem:[%s13537_s22 + $0x200] ss:$8 sps:$4 sm:$0xff]   ;;  %v11719_v59 = vld [vmem:[%s13537_s22 + $0x2f4] ss:$8 sps:$4 sm:$0xff]  }
0x14e6   : > { %v11762_v38 = vld [vmem:[%s13537_s22 + $0x100] ss:$8 sps:$4 sm:$0xff]  }
0x14e7   : > { %v13171_v41 = vadd.f32 %v7147_v39, %v6063_v14  ;;  %v7155_v44 = vmax.f32 %v13163_v60, 0.0  ;;  %v7298_v14 = vrot.slane %v7285_v28, %v12801_v9  ;;  %v11767_v39 = vld [vmem:[%s13537_s22 + $0x1f4] ss:$8 sps:$4 sm:$0xff]   ;;  %v11765_v28 = vld [vmem:[%s13537_s22 + $0x1f0] ss:$8 sps:$4 sm:$0xff]  }
0x14e9   : > { %v7156_v8 = vmax.f32 %v13171_v41, 0.0  ;;  %v7288_v22 = vpack.c.bf16 %v7155_v44, %v7153_v2  ;;  %v8356_v41 = vld [vmem:[%s13540_s0] ss:$4 sm:$0x3] }
0x14eb   : > { %v7289_v27 = vpack.c.bf16 %v7156_v8, %v7154_v53 }
0x14ed   : > { %7493 = vmatprep.mubr.bf16.mxu0 %v7289_v27  ;;  %v11717_v27 = vld [vmem:[%s13537_s22 + $0x2f0] ss:$8 sps:$4 sm:$0xff]  }
0x14ee   : > { %7494 = vmatmul.mubr.bf16.vlgmr.msra.gmra.mxu0 %v7288_v22  ;;  %v11722_v22 = vld [vmem:[%s13537_s22 + $0x2e4] ss:$8 sps:$4 sm:$0xff]  }
0x14ef   : > { %7587 = vmatprep.mubr.bf16.mxu0 %v12076_v52 }
0x15ae   : > { %v7495_v0 = vpop.f32.mrf.mxu0 }
0x15af   : > { %v7496_v57 = vadd.f32 %v7495_v0, %v7294_v6  ;;  %v11770_v0 = vld [vmem:[%s13537_s22 + $0x1e4] ss:$8 sps:$4 sm:$0xff]  }
0x15b0   : > { %v7497_v5 = vpop.f32.mrf.mxu0 }
0x15b1   : > { %v7498_v50 = vadd.f32 %v7497_v5, %v7298_v14  ;;  %v7504_v25 = vmax.f32 %v7496_v57, 0.0  ;;  %v11768_v5 = vld [vmem:[%s13537_s22 + $0x1e0] ss:$8 sps:$4 sm:$0xff]   ;;  %v11771_v57 = vld [vmem:[%s13537_s22 + $0x1d0] ss:$8 sps:$4 sm:$0xff]  }
0x15b2   : > { %v7499_v45 = vpop.f32.mrf.mxu0 }
0x15b3   : > { %v7500_v56 = vadd.f32 %v7499_v45, %v7294_v6  ;;  %v7505_v13 = vmax.f32 %v7498_v50, 0.0  ;;  %v11725_v6 = vld [vmem:[%s13537_s22 + $0x2d4] ss:$8 sps:$4 sm:$0xff]   ;;  %v11723_v50 = vld [vmem:[%s13537_s22 + $0x2d0] ss:$8 sps:$4 sm:$0xff]  }
0x15b4   : > { %v7501_v43 = vpop.f32.mrf.mxu0  ;;  %v11773_v45 = vld [vmem:[%s13537_s22 + $0x1d4] ss:$8 sps:$4 sm:$0xff]  }
0x15b5   : > { %v7502_v23 = vadd.f32 %v7501_v43, %v7298_v14  ;;  %v7506_v46 = vmax.f32 %v7500_v56, 0.0  ;;  %v11720_v14 = vld [vmem:[%s13537_s22 + $0x2e0] ss:$8 sps:$4 sm:$0xff]   ;;  %v11728_v56 = vld [vmem:[%s13537_s22 + $0x2c4] ss:$8 sps:$4 sm:$0xff]  }
0x15b6   : > { %v11776_v43 = vld [vmem:[%s13537_s22 + $0x1c4] ss:$8 sps:$4 sm:$0xff]  }
0x15b7   : > { %v7507_v58 = vmax.f32 %v7502_v23, 0.0  ;;  %v13191_v4 = vpack.c.bf16 %v7506_v46, %v7504_v25  ;;  %v11726_v23 = vld [vmem:[%s13537_s22 + $0x2c0] ss:$8 sps:$4 sm:$0xff]   ;;  %v11731_v46 = vld [vmem:[%s13537_s22 + $0x2b4] ss:$8 sps:$4 sm:$0xff]  }
0x15b8   : > { %v11729_v25 = vld [vmem:[%s13537_s22 + $0x2b0] ss:$8 sps:$4 sm:$0xff]  }
0x15b9   : > { %v7509_v10 = vpack.c.bf16 %v7507_v58, %v7505_v13  ;;  %v11774_v13 = vld [vmem:[%s13537_s22 + $0x1c0] ss:$8 sps:$4 sm:$0xff]   ;;  %v11779_v58 = vld [vmem:[%s13537_s22 + $0x1b4] ss:$8 sps:$4 sm:$0xff]  }
0x15bb   : > { %7524 = vmatprep.subr.bf16.mxu1 %v7509_v10  ;;  %7569 = vmatprep.subr.bf16.mxu0 %v7509_v10 }
0x15bc   : > { %7525 = vmatpush1.bf16.msra.mxu1 %v13191_v4  ;;  %7570 = vmatpush1.bf16.msra.mxu0 %v13191_v4 }
0x15bd   : > { %8134 = vmatprep.subr.bf16.mxu0 %v11695_v3  ;;  %8091 = vmatprep.subr.bf16.mxu1 %v11743_v7  ;;  %v11777_v3 = vld [vmem:[%s13537_s22 + $0x1b0] ss:$8 sps:$4 sm:$0xff]   ;;  %v11782_v7 = vld [vmem:[%s13537_s22 + $0x1a4] ss:$8 sps:$4 sm:$0xff]  }
0x15bf   : > { %10038 = vmatmul.mubr.msk.bf16.vlgmr.msra.gmra.mxu1 %vm6424_vm2, %v13037_v11  ;;  %10039 = vmatmul.mubr.msk.bf16.vlgmr.msra.gmra.mxu0 %vm6424_vm2, %v13046_v29  ;;  %v11699_v11 = vld [vmem:[%s13537_s22 + $0x250] ss:$8 sps:$4 sm:$0xff]  }
0x15c0   : > { %8135 = vmatpush1.bf16.msra.mxu0 %v11693_v15  ;;  %8166 = vmatprep.mubr.bf16.mxu0 %v7509_v10  ;;  %v11747_v29 = vld [vmem:[%s13537_s22 + $0x150] ss:$8 sps:$4 sm:$0xff]   ;;  %v11734_v10 = vld [vmem:[%s13537_s22 + $0x2a4] ss:$8 sps:$4 sm:$0xff]   ;;  %v11732_v15 = vld [vmem:[%s13537_s22 + $0x2a0] ss:$8 sps:$4 sm:$0xff]  }
0x15c1   : > { %8136 = vmatprep.subr.bf16.mxu0 %v11698_v16  ;;  %8092 = vmatpush1.bf16.msra.mxu1 %v11741_v47  ;;  %v11737_v16 = vld [vmem:[%s13537_s22 + $0x294] ss:$8 sps:$4 sm:$0xff]   ;;  %v11780_v47 = vld [vmem:[%s13537_s22 + $0x1a0] ss:$8 sps:$4 sm:$0xff]  }
0x15c2   : > { %8093 = vmatprep.subr.bf16.mxu1 %v11746_v49  ;;  %v11735_v49 = vld [vmem:[%s13537_s22 + $0x290] ss:$8 sps:$4 sm:$0xff]  }
0x15c4   : > { %8137 = vmatpush1.bf16.msra.mxu0 %v11696_v51  ;;  %v11740_v51 = vld [vmem:[%s13537_s22 + $0x284] ss:$8 sps:$4 sm:$0xff]  }
0x15c5   : > { %8138 = vmatprep.subr.bf16.mxu0 %v11701_v54  ;;  %8094 = vmatpush1.bf16.msra.mxu1 %v11744_v17  ;;  %v11738_v54 = vld [vmem:[%s13537_s22 + $0x280] ss:$8 sps:$4 sm:$0xff]   ;;  %v11785_v17 = vld [vmem:[%s13537_s22 + $0x194] ss:$8 sps:$4 sm:$0xff]  }
0x15c6   : > { %8095 = vmatprep.subr.bf16.mxu1 %v11749_v18  ;;  %v11783_v18 = vld [vmem:[%s13537_s22 + $0x190] ss:$8 sps:$4 sm:$0xff]  }
0x15c8   : > { %8139 = vmatpush1.bf16.msra.mxu0 %v11699_v11  ;;  %v11788_v11 = vld [vmem:[%s13537_s22 + $0x184] ss:$8 sps:$4 sm:$0xff]  }
0x15c9   : > { %8140 = vmatprep.subr.bf16.mxu0 %v11704_v21  ;;  %8096 = vmatpush1.bf16.msra.mxu1 %v11747_v29  ;;  %v11786_v21 = vld [vmem:[%s13537_s22 + $0x180] ss:$8 sps:$4 sm:$0xff]   ;;  %v11791_v29 = vld [vmem:[%s13537_s22 + $0x374] ss:$8 sps:$4 sm:$0xff]  }
0x15ca   : > { %8097 = vmatprep.subr.bf16.mxu1 %v11752_v24 }
0x15cc   : > { %8141 = vmatpush1.bf16.msra.mxu0 %v11702_v30 }
0x15cd   : > { %8142 = vmatprep.subr.bf16.mxu0 %v11707_v31  ;;  %8098 = vmatpush1.bf16.msra.mxu1 %v11750_v33 }
0x15ce   : > { %8099 = vmatprep.subr.bf16.mxu1 %v11755_v32 }
0x15d0   : > { %8143 = vmatpush1.bf16.msra.mxu0 %v11705_v34 }
0x15d1   : > { %8144 = vmatprep.subr.bf16.mxu0 %v11710_v35  ;;  %8100 = vmatpush1.bf16.msra.mxu1 %v11753_v36 }
0x15d2   : > { %8101 = vmatprep.subr.bf16.mxu1 %v11758_v37 }
0x15d4   : > { %8145 = vmatpush1.bf16.msra.mxu0 %v11708_v19  ;;  %v11789_v19 = vld [vmem:[%s13537_s22 + $0x370] ss:$8 sps:$4 sm:$0xff]  }
0x15d5   : > { %8146 = vmatprep.subr.bf16.mxu0 %v11713_v48  ;;  %8102 = vmatpush1.bf16.msra.mxu1 %v11756_v62 }
0x15d6   : > { %8103 = vmatprep.subr.bf16.mxu1 %v11761_v20  ;;  %v11794_v20 = vld [vmem:[%s13537_s22 + $0x364] ss:$8 sps:$4 sm:$0xff]  }
0x15d8   : > { %8147 = vmatpush1.bf16.msra.mxu0 %v11711_v1  ;;  %v11792_v1 = vld [vmem:[%s13537_s22 + $0x360] ss:$8 sps:$4 sm:$0xff]  }
0x15d9   : > { %8148 = vmatprep.subr.bf16.mxu0 %v11716_v61  ;;  %8104 = vmatpush1.bf16.msra.mxu1 %v11759_v63  ;;  %v11797_v61 = vld [vmem:[%s13537_s22 + $0x354] ss:$8 sps:$4 sm:$0xff]   ;;  %v11795_v63 = vld [vmem:[%s13537_s22 + $0x350] ss:$8 sps:$4 sm:$0xff]  }
0x15da   : > { %8105 = vmatprep.subr.bf16.mxu1 %v11764_v12  ;;  %v11800_v12 = vld [vmem:[%s13537_s22 + $0x344] ss:$8 sps:$4 sm:$0xff]  }
0x15dc   : > { %8149 = vmatpush1.bf16.msra.mxu0 %v11714_v55  ;;  %v11798_v55 = vld [vmem:[%s13537_s22 + $0x340] ss:$8 sps:$4 sm:$0xff]  }
0x15dd   : > { %8150 = vmatprep.subr.bf16.mxu0 %v11719_v59  ;;  %8106 = vmatpush1.bf16.msra.mxu1 %v11762_v38  ;;  %v11803_v59 = vld [vmem:[%s13537_s22 + $0x334] ss:$8 sps:$4 sm:$0xff]   ;;  %v11801_v38 = vld [vmem:[%s13537_s22 + $0x330] ss:$8 sps:$4 sm:$0xff]  }
0x15de   : > { %8107 = vmatprep.subr.bf16.mxu1 %v11767_v39  ;;  %v11806_v39 = vld [vmem:[%s13537_s22 + $0x324] ss:$8 sps:$4 sm:$0xff]  }
0x15e0   : > { %8151 = vmatpush2.bf16.msra.mxu0 %v11717_v27  ;;  %v11804_v27 = vld [vmem:[%s13537_s22 + $0x320] ss:$8 sps:$4 sm:$0xff]  }
0x15e1   : > { %8152 = vmatprep.subr.bf16.mxu0 %v11722_v22  ;;  %8108 = vmatpush2.bf16.msra.mxu1 %v11765_v28  ;;  %v11809_v22 = vld [vmem:[%s13537_s22 + $0x314] ss:$8 sps:$4 sm:$0xff]   ;;  %v11807_v28 = vld [vmem:[%s13537_s22 + $0x310] ss:$8 sps:$4 sm:$0xff]  }
0x15e2   : > { %8109 = vmatprep.subr.bf16.mxu1 %v11770_v0  ;;  %v11812_v0 = vld [vmem:[%s13537_s22 + $0x304] ss:$8 sps:$4 sm:$0xff]  }
0x15e4   : > { %8153 = vmatpush2.bf16.msra.mxu0 %v11720_v14  ;;  %v11810_v14 = vld [vmem:[%s13537_s22 + $0x300] ss:$8 sps:$4 sm:$0xff]  }
0x15e5   : > { %8154 = vmatprep.subr.bf16.mxu0 %v11725_v6  ;;  %8110 = vmatpush2.bf16.msra.mxu1 %v11768_v5  ;;  %v11815_v6 = vld [vmem:[%s13537_s22 + $0x3f4] ss:$8 sps:$4 sm:$0xff]   ;;  %v11813_v5 = vld [vmem:[%s13537_s22 + $0x3f0] ss:$8 sps:$4 sm:$0xff]  }
0x15e6   : > { %8111 = vmatprep.subr.bf16.mxu1 %v11773_v45  ;;  %v11818_v45 = vld [vmem:[%s13537_s22 + $0x3e4] ss:$8 sps:$4 sm:$0xff]  }
0x15e8   : > { %8155 = vmatpush2.bf16.msra.mxu0 %v11723_v50  ;;  %v11816_v50 = vld [vmem:[%s13537_s22 + $0x3e0] ss:$8 sps:$4 sm:$0xff]  }
0x15e9   : > { %8156 = vmatprep.subr.bf16.mxu0 %v11728_v56  ;;  %8112 = vmatpush2.bf16.msra.mxu1 %v11771_v57  ;;  %v11821_v56 = vld [vmem:[%s13537_s22 + $0x3d4] ss:$8 sps:$4 sm:$0xff]   ;;  %v11819_v57 = vld [vmem:[%s13537_s22 + $0x3d0] ss:$8 sps:$4 sm:$0xff]  }
0x15ea   : > { %8113 = vmatprep.subr.bf16.mxu1 %v11776_v43  ;;  %v11824_v43 = vld [vmem:[%s13537_s22 + $0x3c4] ss:$8 sps:$4 sm:$0xff]  }
0x15ec   : > { %8157 = vmatpush2.bf16.msra.mxu0 %v11726_v23  ;;  %v11822_v23 = vld [vmem:[%s13537_s22 + $0x3c0] ss:$8 sps:$4 sm:$0xff]  }
0x15ed   : > { %8158 = vmatprep.subr.bf16.mxu0 %v11731_v46  ;;  %8114 = vmatpush2.bf16.msra.mxu1 %v11774_v13  ;;  %v11827_v46 = vld [vmem:[%s13537_s22 + $0x3b4] ss:$8 sps:$4 sm:$0xff]   ;;  %v11825_v13 = vld [vmem:[%s13537_s22 + $0x3b0] ss:$8 sps:$4 sm:$0xff]  }
0x15ee   : > { %8115 = vmatprep.subr.bf16.mxu1 %v11779_v58  ;;  %v11830_v58 = vld [vmem:[%s13537_s22 + $0x3a4] ss:$8 sps:$4 sm:$0xff]  }
0x15f0   : > { %8159 = vmatpush2.bf16.msra.mxu0 %v11729_v25  ;;  %v11828_v25 = vld [vmem:[%s13537_s22 + $0x3a0] ss:$8 sps:$4 sm:$0xff]  }
0x15f1   : > { %8160 = vmatprep.subr.bf16.mxu0 %v11734_v10  ;;  %8116 = vmatpush2.bf16.msra.mxu1 %v11777_v3  ;;  %v11833_v10 = vld [vmem:[%s13537_s22 + $0x394] ss:$8 sps:$4 sm:$0xff]   ;;  %v11831_v3 = vld [vmem:[%s13537_s22 + $0x390] ss:$8 sps:$4 sm:$0xff]  }
0x15f2   : > { %8117 = vmatprep.subr.bf16.mxu1 %v11782_v7  ;;  %v11836_v7 = vld [vmem:[%s13537_s22 + $0x384] ss:$8 sps:$4 sm:$0xff]  }
0x15f4   : > { %8161 = vmatpush2.bf16.msra.mxu0 %v11732_v15  ;;  %v11834_v15 = vld [vmem:[%s13537_s22 + $0x380] ss:$8 sps:$4 sm:$0xff]  }
0x15f5   : > { %8162 = vmatprep.subr.bf16.mxu0 %v11737_v16  ;;  %8118 = vmatpush2.bf16.msra.mxu1 %v11780_v47  ;;  %v11837_v16 = vld [vmem:[%s13539_s26 + $0x70] ss:$8 sps:$4 sm:$0xff]   ;;  %v11839_v47 = vld [vmem:[%s13539_s26 + $0x74] ss:$8 sps:$4 sm:$0xff]  }
0x15f6   : > { %8119 = vmatprep.subr.bf16.mxu1 %v11785_v17  ;;  %v11843_v17 = vld [vmem:[%s13539_s26 + $0x50] ss:$8 sps:$4 sm:$0xff]  }
0x15f8   : > { %8163 = vmatpush2.bf16.msra.mxu0 %v11735_v49  ;;  %v11842_v49 = vld [vmem:[%s13539_s26 + $0x64] ss:$8 sps:$4 sm:$0xff]  }
0x15f9   : > { %8164 = vmatprep.subr.bf16.mxu0 %v11740_v51  ;;  %8120 = vmatpush2.bf16.msra.mxu1 %v11783_v18  ;;  %v11840_v51 = vld [vmem:[%s13539_s26 + $0x60] ss:$8 sps:$4 sm:$0xff]   ;;  %v11848_v18 = vld [vmem:[%s13539_s26 + $0x44] ss:$8 sps:$4 sm:$0xff]  }
0x15fa   : > { %8121 = vmatprep.subr.bf16.mxu1 %v11788_v11  ;;  %v11846_v11 = vld [vmem:[%s13539_s26 + $0x40] ss:$8 sps:$4 sm:$0xff]  }
0x15fc   : > { %8165 = vmatpush2.bf16.msra.mxu0 %v11738_v54  ;;  %v11845_v54 = vld [vmem:[%s13539_s26 + $0x54] ss:$8 sps:$4 sm:$0xff]  }
0x15fd   : > { %8122 = vmatpush2.bf16.msra.mxu1 %v11786_v21  ;;  %8532 = vmatprep.subr.bf16.mxu0 %v11839_v47  ;;  %v11851_v21 = vld [vmem:[%s13539_s26 + $0x34] ss:$8 sps:$4 sm:$0xff]  }
0x15fe   : > { %8177 = vmatprep.subr.bf16.mxu1 %v11791_v29  ;;  %v11849_v29 = vld [vmem:[%s13539_s26 + $0x30] ss:$8 sps:$4 sm:$0xff]  }
0x15ff   : > { %8167 = vmatmul.mubr.bf16.vlgmr.msra.gmra.mxu0 %v13191_v4 }
0x1600   : > { %8533 = vmatpush1.bf16.msra.mxu0 %v11837_v16 }
0x1601   : > { %8534 = vmatprep.subr.bf16.mxu0 %v11842_v49 }
0x1604   : > { %8535 = vmatpush1.bf16.msra.mxu0 %v11840_v51 }
0x1605   : > { %8536 = vmatprep.subr.bf16.mxu0 %v11845_v54 }
0x1608   : > { %8537 = vmatpush1.bf16.msra.mxu0 %v11843_v17 }
0x1609   : > { %8538 = vmatprep.subr.bf16.mxu0 %v11848_v18 }
0x160c   : > { %8539 = vmatpush1.bf16.msra.mxu0 %v11846_v11 }
0x160d   : > { %8540 = vmatprep.subr.bf16.mxu0 %v11851_v21 }
0x1610   : > { %8541 = vmatpush1.bf16.msra.mxu0 %v11849_v29 }
0x167f   : > { %v7544_v24 = vpop.f32.mrf.mxu1  ;;  %v13263_v30 = vpop.f32.mrf.mxu0 }
0x1681   : > { %v7546_v31 = vpop.f32.mrf.mxu1  ;;  %v7591_v33 = vpop.f32.mrf.mxu0 }
0x1683   : > { %v7548_v32 = vpop.f32.mrf.mxu1  ;;  %v13265_v4 = vpop.f32.mrf.mxu0 }
0x1684   : > { %v7598_v34 = vpack.c.bf16 %v13265_v4, %v13263_v30  ;;  %v7553_v62 = vpack.c.bf16 %v7548_v32, %v7544_v24  ;;  %v11854_v24 = vld [vmem:[%s13539_s26 + $0x24] ss:$8 sps:$4 sm:$0xff]   ;;  %v11852_v30 = vld [vmem:[%s13539_s26 + $0x20] ss:$8 sps:$4 sm:$0xff]  }
0x1685   : > { %v7550_v35 = vpop.f32.mrf.mxu1  ;;  %v7595_v36 = vpop.f32.mrf.mxu0  ;;  %8542 = vmatprep.subr.bf16.mxu0 %v11854_v24  ;;  %v11860_v32 = vld [vmem:[%s13539_s26 + $0x4] ss:$8 sps:$4 sm:$0xff]   ;;  %v11858_v4 = vld [vmem:[%s13539_s26] ss:$8 sps:$4 sm:$0xff]  }
0x1686   : > { %v7554_v37 = vpack.c.bf16 %v7550_v35, %v7546_v31  ;;  %v7599_v48 = vpack.c.bf16 %v7595_v36, %v7591_v33  ;;  %v11857_v31 = vld [vmem:[%s13539_s26 + $0x14] ss:$8 sps:$4 sm:$0xff]   ;;  %8543 = vmatpush1.bf16.msra.mxu0 %v11852_v30  ;;  %v11855_v33 = vld [vmem:[%s13539_s26 + $0x10] ss:$8 sps:$4 sm:$0xff]   ;;  %v11866_v36 = vld [vmem:[%s13539_s26 + $0xe4] ss:$8 sps:$4 sm:$0xff]  }
0x1687   : > { %8544 = vmatprep.subr.bf16.mxu0 %v11857_v31  ;;  %v11861_v35 = vld [vmem:[%s13539_s26 + $0xf0] ss:$8 sps:$4 sm:$0xff]  }
0x1688   : > { %8123 = vmatprep.mubr.bf16.mxu1 %v7554_v37  ;;  %v11864_v37 = vld [vmem:[%s13539_s26 + $0xe0] ss:$8 sps:$4 sm:$0xff]  }
0x1689   : > { %8124 = vmatmul.mubr.bf16.vlgmr.msra.gmra.mxu1 %v7553_v62  ;;  %v11872_v62 = vld [vmem:[%s13539_s26 + $0xc4] ss:$8 sps:$4 sm:$0xff]  }
0x168a   : > { %8178 = vmatpush1.bf16.msra.mxu1 %v11789_v19  ;;  %8209 = vmatprep.mubr.bf16.mxu1 %v7599_v48  ;;  %v11869_v19 = vld [vmem:[%s13539_s26 + $0xd4] ss:$8 sps:$4 sm:$0xff]   ;;  %v11867_v48 = vld [vmem:[%s13539_s26 + $0xd0] ss:$8 sps:$4 sm:$0xff]  }
0x168b   : > { %8179 = vmatprep.subr.bf16.mxu1 %v11794_v20  ;;  %8545 = vmatpush1.bf16.msra.mxu0 %v11855_v33  ;;  %v11870_v20 = vld [vmem:[%s13539_s26 + $0xc0] ss:$8 sps:$4 sm:$0xff]  }
0x168c   : > { %8546 = vmatprep.subr.bf16.mxu0 %v11860_v32 }
0x168e   : > { %8180 = vmatpush1.bf16.msra.mxu1 %v11792_v1  ;;  %v11875_v1 = vld [vmem:[%s13539_s26 + $0xb4] ss:$8 sps:$4 sm:$0xff]  }
0x168f   : > { %8181 = vmatprep.subr.bf16.mxu1 %v11797_v61  ;;  %8547 = vmatpush1.bf16.msra.mxu0 %v11858_v4  ;;  %v11873_v61 = vld [vmem:[%s13539_s26 + $0xb0] ss:$8 sps:$4 sm:$0xff]  }
0x1692   : > { %8182 = vmatpush1.bf16.msra.mxu1 %v11795_v63  ;;  %v11878_v63 = vld [vmem:[%s13539_s26 + $0xa4] ss:$8 sps:$4 sm:$0xff]  }
0x1693   : > { %8183 = vmatprep.subr.bf16.mxu1 %v11800_v12  ;;  %v11876_v12 = vld [vmem:[%s13539_s26 + $0xa0] ss:$8 sps:$4 sm:$0xff]  }
0x1696   : > { %8184 = vmatpush1.bf16.msra.mxu1 %v11798_v55  ;;  %v11881_v55 = vld [vmem:[%s13539_s26 + $0x94] ss:$8 sps:$4 sm:$0xff]  }
0x1697   : > { %8185 = vmatprep.subr.bf16.mxu1 %v11803_v59  ;;  %v11879_v59 = vld [vmem:[%s13539_s26 + $0x90] ss:$8 sps:$4 sm:$0xff]  }
0x169a   : > { %8186 = vmatpush1.bf16.msra.mxu1 %v11801_v38  ;;  %v11884_v38 = vld [vmem:[%s13539_s26 + $0x84] ss:$8 sps:$4 sm:$0xff]  }
0x169b   : > { %8187 = vmatprep.subr.bf16.mxu1 %v11806_v39  ;;  %v11882_v39 = vld [vmem:[%s13539_s26 + $0x80] ss:$8 sps:$4 sm:$0xff]  }
0x169e   : > { %8188 = vmatpush1.bf16.msra.mxu1 %v11804_v27 }
0x169f   : > { %8189 = vmatprep.subr.bf16.mxu1 %v11809_v22 }
0x16a2   : > { %8190 = vmatpush1.bf16.msra.mxu1 %v11807_v28  ;;  %v10005_v28 = vld [vmem:[%s13538_s23 + $0x1] ss:$4 sm:$0x3] }
0x16a3   : > { %8191 = vmatprep.subr.bf16.mxu1 %v11812_v0 }
0x16a6   : > { %8192 = vmatpush1.bf16.msra.mxu1 %v11810_v14  ;;  %v7608_v14 = vrot.slane %v10005_v28, %v12801_v9 }
0x16a7   : > { %8193 = vmatprep.subr.bf16.mxu1 %v11815_v6  ;;  %v7604_v6 = vrot.slane %v10005_v28, %v12799_v26  ;;  %v11936_v28 = vld [vmem:[%s13539_s26 + $0x160] ss:$8 sps:$4 sm:$0xff]  }
0x16aa   : > { %8194 = vmatpush2.bf16.msra.mxu1 %v11813_v5 }
0x16ab   : > { %8195 = vmatprep.subr.bf16.mxu1 %v11818_v45 }
0x16ae   : > { %8196 = vmatpush2.bf16.msra.mxu1 %v11816_v50 }
0x16af   : > { %8197 = vmatprep.subr.bf16.mxu1 %v11821_v56 }
0x16b2   : > { %8198 = vmatpush2.bf16.msra.mxu1 %v11819_v57 }
0x16b3   : > { %8199 = vmatprep.subr.bf16.mxu1 %v11824_v43 }
0x16b6   : > { %8200 = vmatpush2.bf16.msra.mxu1 %v11822_v23 }
0x16b7   : > { %8201 = vmatprep.subr.bf16.mxu1 %v11827_v46 }
0x16ba   : > { %8202 = vmatpush2.bf16.msra.mxu1 %v11825_v13 }
0x16bb   : > { %8203 = vmatprep.subr.bf16.mxu1 %v11830_v58 }
0x16be   : > { %8204 = vmatpush2.bf16.msra.mxu1 %v11828_v25 }
0x16bf   : > { %8205 = vmatprep.subr.bf16.mxu1 %v11833_v10  ;;  %v8168_v0 = vpop.f32.mrf.mxu0 }
0x16c1   : > { %v8170_v45 = vpop.f32.mrf.mxu0 }
0x16c2   : > { %8206 = vmatpush2.bf16.msra.mxu1 %v11831_v3 }
0x16c3   : > { %8207 = vmatprep.subr.bf16.mxu1 %v11836_v7  ;;  %v8172_v23 = vpop.f32.mrf.mxu0 }
0x16c6   : > { %8208 = vmatpush2.bf16.msra.mxu1 %v11834_v15  ;;  %v8174_v15 = vpop.f32.mrf.mxu0 }
0x16c9   : > { %8210 = vmatmul.mubr.bf16.vlgmr.msra.gmra.mxu1 %v7598_v34  ;;  %v11863_v34 = vld [vmem:[%s13539_s26 + $0xf4] ss:$8 sps:$4 sm:$0xff]  }
0x16ca   : > { %8613 = vmatprep.mubr.bf16.mxu1 %v12076_v52  ;;  %8548 = vmatprep.subr.bf16.mxu0 %v11863_v34 }
0x16cb   : > { %8549 = vmatpush2.bf16.msra.mxu0 %v11861_v35 }
0x16cc   : > { %8550 = vmatprep.subr.bf16.mxu0 %v11866_v36 }
0x16cf   : > { %8551 = vmatpush2.bf16.msra.mxu0 %v11864_v37 }
0x16d0   : > { %8552 = vmatprep.subr.bf16.mxu0 %v11869_v19 }
0x16d3   : > { %8553 = vmatpush2.bf16.msra.mxu0 %v11867_v48 }
0x16d4   : > { %8554 = vmatprep.subr.bf16.mxu0 %v11872_v62 }
0x16d7   : > { %8555 = vmatpush2.bf16.msra.mxu0 %v11870_v20  ;;  %v11887_v20 = vld [vmem:[%s13539_s26 + $0x274] ss:$8 sps:$4 sm:$0xff]  }
0x16d8   : > { %8556 = vmatprep.subr.bf16.mxu0 %v11875_v1  ;;  %v11935_v1 = vld [vmem:[%s13539_s26 + $0x174] ss:$8 sps:$4 sm:$0xff]  }
0x16db   : > { %8557 = vmatpush2.bf16.msra.mxu0 %v11873_v61 }
0x16dc   : > { %8558 = vmatprep.subr.bf16.mxu0 %v11878_v63  ;;  %v11885_v63 = vld [vmem:[%s13539_s26 + $0x270] ss:$8 sps:$4 sm:$0xff]  }
0x16df   : > { %8559 = vmatpush2.bf16.msra.mxu0 %v11876_v12  ;;  %v11890_v12 = vld [vmem:[%s13539_s26 + $0x264] ss:$8 sps:$4 sm:$0xff]  }
0x16e0   : > { %8560 = vmatprep.subr.bf16.mxu0 %v11881_v55  ;;  %v11933_v55 = vld [vmem:[%s13539_s26 + $0x170] ss:$8 sps:$4 sm:$0xff]  }
0x16e3   : > { %8561 = vmatpush2.bf16.msra.mxu0 %v11879_v59  ;;  %v11938_v59 = vld [vmem:[%s13539_s26 + $0x164] ss:$8 sps:$4 sm:$0xff]  }
0x16e4   : > { %8562 = vmatprep.subr.bf16.mxu0 %v11884_v38  ;;  %v12037_v38 = vld [vmem:[%s12220_s6] sm:$0xff]  }
0x16e7   : > { %8563 = vmatpush2.bf16.msra.mxu0 %v11882_v39  ;;  %v12038_v39 = vld [vmem:[%s12220_s6 + $0x10] sm:$0xff]  }
0x1749   : > { %v8125_v27 = vpop.f32.mrf.mxu1 }
0x174a   : > { %v8126_v56 = vadd.f32 %v8125_v27, %v7604_v6  ;;  %v11888_v27 = vld [vmem:[%s13539_s26 + $0x260] ss:$8 sps:$4 sm:$0xff]  }
0x174b   : > { %v8127_v22 = vpop.f32.mrf.mxu1 }
0x174c   : > { %v8128_v50 = vadd.f32 %v8127_v22, %v7608_v14  ;;  %v8169_v25 = vadd.f32 %v8168_v0, %v8126_v56  ;;  %v11893_v22 = vld [vmem:[%s13539_s26 + $0x254] ss:$8 sps:$4 sm:$0xff]  }
0x174d   : > { %v8129_v5 = vpop.f32.mrf.mxu1  ;;  %v11941_v0 = vld [vmem:[%s13539_s26 + $0x154] ss:$8 sps:$4 sm:$0xff]  }
0x174e   : > { %v8130_v43 = vadd.f32 %v8129_v5, %v7604_v6  ;;  %v8171_v58 = vadd.f32 %v8170_v45, %v8128_v50  ;;  %v11896_v6 = vld [vmem:[%s13539_s26 + $0x244] ss:$8 sps:$4 sm:$0xff]   ;;  %v11939_v5 = vld [vmem:[%s13539_s26 + $0x150] ss:$8 sps:$4 sm:$0xff]   ;;  %v11894_v50 = vld [vmem:[%s13539_s26 + $0x240] ss:$8 sps:$4 sm:$0xff]  }
0x174f   : > { %v8131_v57 = vpop.f32.mrf.mxu1  ;;  %v11944_v45 = vld [vmem:[%s13539_s26 + $0x144] ss:$8 sps:$4 sm:$0xff]   ;;  %v11899_v56 = vld [vmem:[%s13539_s26 + $0x234] ss:$8 sps:$4 sm:$0xff]  }
0x1750   : > { %v8132_v13 = vadd.f32 %v8131_v57, %v7608_v14  ;;  %v8173_v7 = vadd.f32 %v8172_v23, %v8130_v43  ;;  %v11891_v14 = vld [vmem:[%s13539_s26 + $0x250] ss:$8 sps:$4 sm:$0xff]   ;;  %v11942_v57 = vld [vmem:[%s13539_s26 + $0x140] ss:$8 sps:$4 sm:$0xff]   ;;  %v11947_v43 = vld [vmem:[%s13539_s26 + $0x134] ss:$8 sps:$4 sm:$0xff]  }
0x1751   : > { %v11897_v23 = vld [vmem:[%s13539_s26 + $0x230] ss:$8 sps:$4 sm:$0xff]  }
0x1752   : > { %v8175_v51 = vadd.f32 %v8174_v15, %v8132_v13  ;;  %v11945_v13 = vld [vmem:[%s13539_s26 + $0x130] ss:$8 sps:$4 sm:$0xff]  }
0x1753   : > { %v11903_v15 = vld [vmem:[%s13539_s26 + $0x210] ss:$8 sps:$4 sm:$0xff]  }
0x1789   : > { %v8211_v46 = vpop.f32.mrf.mxu1 }
0x178a   : > { %v8212_v16 = vadd.f32 %v8211_v46, %v8169_v25  ;;  %v11902_v46 = vld [vmem:[%s13539_s26 + $0x224] ss:$8 sps:$4 sm:$0xff]   ;;  %v11900_v25 = vld [vmem:[%s13539_s26 + $0x220] ss:$8 sps:$4 sm:$0xff]  }
0x178b   : > { %v8213_v10 = vpop.f32.mrf.mxu1 }
0x178c   : > { %v8214_v3 = vadd.f32 %v8213_v10, %v8171_v58  ;;  %v13349_v21 = vadd.f32 %v8212_v16, %v7153_v2  ;;  %v8365_v2 = vrot.slane %v8356_v41, %v12799_v26  ;;  %v11950_v58 = vld [vmem:[%s13539_s26 + $0x124] ss:$8 sps:$4 sm:$0xff]   ;;  %v11905_v10 = vld [vmem:[%s13539_s26 + $0x214] ss:$8 sps:$4 sm:$0xff]  }
0x178d   : > { %v8215_v47 = vpop.f32.mrf.mxu1  ;;  %v11908_v16 = vld [vmem:[%s13539_s26 + $0x204] ss:$8 sps:$4 sm:$0xff]  }
0x178e   : > { %v8216_v49 = vadd.f32 %v8215_v47, %v8173_v7  ;;  %v13341_v17 = vadd.f32 %v8214_v3, %v7154_v53  ;;  %v8224_v53 = vmax.f32 %v13349_v21, 0.0  ;;  %v11948_v3 = vld [vmem:[%s13539_s26 + $0x120] ss:$8 sps:$4 sm:$0xff]   ;;  %v11953_v7 = vld [vmem:[%s13539_s26 + $0x114] ss:$8 sps:$4 sm:$0xff]  }
0x178f   : > { %v8217_v54 = vpop.f32.mrf.mxu1  ;;  %v11951_v47 = vld [vmem:[%s13539_s26 + $0x110] ss:$8 sps:$4 sm:$0xff]  }
0x1790   : > { %v13345_v18 = vadd.f32 %v8216_v49, %v7155_v44  ;;  %v8218_v11 = vadd.f32 %v8217_v54, %v8175_v51  ;;  %v8225_v30 = vmax.f32 %v13341_v17, 0.0  ;;  %v11956_v49 = vld [vmem:[%s13539_s26 + $0x104] ss:$8 sps:$4 sm:$0xff]   ;;  %v11906_v51 = vld [vmem:[%s13539_s26 + $0x200] ss:$8 sps:$4 sm:$0xff]  }
0x1791   : > { %v11911_v54 = vld [vmem:[%s13539_s26 + $0x2f4] ss:$8 sps:$4 sm:$0xff]  }
0x1792   : > { %v13353_v29 = vadd.f32 %v8218_v11, %v7156_v8  ;;  %v8226_v24 = vmax.f32 %v13345_v18, 0.0  ;;  %v8369_v8 = vrot.slane %v8356_v41, %v12801_v9  ;;  %v11954_v11 = vld [vmem:[%s13539_s26 + $0x100] ss:$8 sps:$4 sm:$0xff]   ;;  %v11914_v41 = vld [vmem:[%s13539_s26 + $0x2e4] ss:$8 sps:$4 sm:$0xff]  }
0x1794   : > { %v8227_v42 = vmax.f32 %v13353_v29, 0.0  ;;  %v8359_v40 = vpack.c.bf16 %v8226_v24, %v8224_v53 }
0x1796   : > { %v8360_v60 = vpack.c.bf16 %v8227_v42, %v8225_v30 }
0x1798   : > { %8564 = vmatprep.mubr.bf16.mxu0 %v8360_v60  ;;  %v11959_v60 = vld [vmem:[%s13539_s26 + $0x1f4] ss:$8 sps:$4 sm:$0xff]  }
0x1799   : > { %8565 = vmatmul.mubr.bf16.vlgmr.msra.gmra.mxu0 %v8359_v40  ;;  %v11909_v40 = vld [vmem:[%s13539_s26 + $0x2f0] ss:$8 sps:$4 sm:$0xff]  }
0x179a   : > { %8658 = vmatprep.mubr.bf16.mxu0 %v12076_v52 }
0x1859   : > { %v8566_v44 = vpop.f32.mrf.mxu0 }
0x185a   : > { %v8567_v34 = vadd.f32 %v8566_v44, %v8365_v2  ;;  %v11957_v44 = vld [vmem:[%s13539_s26 + $0x1f0] ss:$8 sps:$4 sm:$0xff]  }
0x185b   : > { %v8568_v31 = vpop.f32.mrf.mxu0 }
0x185c   : > { %v8569_v32 = vadd.f32 %v8568_v31, %v8369_v8  ;;  %v8575_v48 = vmax.f32 %v8567_v34, 0.0  ;;  %v11917_v31 = vld [vmem:[%s13539_s26 + $0x2d4] ss:$8 sps:$4 sm:$0xff]   ;;  %v11920_v34 = vld [vmem:[%s13539_s26 + $0x2c4] ss:$8 sps:$4 sm:$0xff]  }
0x185d   : > { %v8570_v33 = vpop.f32.mrf.mxu0 }
0x185e   : > { %v8571_v4 = vadd.f32 %v8570_v33, %v8365_v2  ;;  %v8576_v52 = vmax.f32 %v8569_v32, 0.0  ;;  %v11912_v2 = vld [vmem:[%s13539_s26 + $0x2e0] ss:$8 sps:$4 sm:$0xff]   ;;  %v11965_v32 = vld [vmem:[%s13539_s26 + $0x1d4] ss:$8 sps:$4 sm:$0xff]  }
0x185f   : > { %v8572_v35 = vpop.f32.mrf.mxu0  ;;  %v11960_v33 = vld [vmem:[%s13539_s26 + $0x1e0] ss:$8 sps:$4 sm:$0xff]  }
0x1860   : > { %v8573_v36 = vadd.f32 %v8572_v35, %v8369_v8  ;;  %v8577_v37 = vmax.f32 %v8571_v4, 0.0  ;;  %v11962_v8 = vld [vmem:[%s13539_s26 + $0x1e4] ss:$8 sps:$4 sm:$0xff]   ;;  %v11915_v4 = vld [vmem:[%s13539_s26 + $0x2d0] ss:$8 sps:$4 sm:$0xff]  }
0x1861   : > { %v11963_v35 = vld [vmem:[%s13539_s26 + $0x1d0] ss:$8 sps:$4 sm:$0xff]  }
0x1862   : > { %v8578_v19 = vmax.f32 %v8573_v36, 0.0  ;;  %v13373_v61 = vpack.c.bf16 %v8577_v37, %v8575_v48  ;;  %v11968_v36 = vld [vmem:[%s13539_s26 + $0x1c4] ss:$8 sps:$4 sm:$0xff]   ;;  %v11918_v37 = vld [vmem:[%s13539_s26 + $0x2c0] ss:$8 sps:$4 sm:$0xff]  }
0x1863   : > { %v11971_v48 = vld [vmem:[%s13539_s26 + $0x1b4] ss:$8 sps:$4 sm:$0xff]  }
0x1864   : > { %v8580_v62 = vpack.c.bf16 %v8578_v19, %v8576_v52  ;;  %v11923_v52 = vld [vmem:[%s13539_s26 + $0x2b4] ss:$8 sps:$4 sm:$0xff]   ;;  %v11966_v19 = vld [vmem:[%s13539_s26 + $0x1c0] ss:$8 sps:$4 sm:$0xff]  }
0x1866   : > { %8595 = vmatprep.subr.bf16.mxu1 %v8580_v62  ;;  %8640 = vmatprep.subr.bf16.mxu0 %v8580_v62 }
0x1867   : > { %8596 = vmatpush1.bf16.msra.mxu1 %v13373_v61  ;;  %8641 = vmatpush1.bf16.msra.mxu0 %v13373_v61 }
0x1868   : > { %9205 = vmatprep.subr.bf16.mxu0 %v11887_v20  ;;  %9162 = vmatprep.subr.bf16.mxu1 %v11935_v1  ;;  %v11926_v20 = vld [vmem:[%s13539_s26 + $0x2a4] ss:$8 sps:$4 sm:$0xff]   ;;  %v11969_v1 = vld [vmem:[%s13539_s26 + $0x1b0] ss:$8 sps:$4 sm:$0xff]  }
0x186a   : > { %10169 = vmatmul.mubr.msk.bf16.vlgmr.msra.gmra.mxu1 %vm6424_vm2, %v12037_v38  ;;  %10170 = vmatmul.mubr.msk.bf16.vlgmr.msra.gmra.mxu0 %vm6424_vm2, %v12038_v39  ;;  %v11927_v38 = vld [vmem:[%s13539_s26 + $0x290] ss:$8 sps:$4 sm:$0xff]   ;;  %v11932_v39 = vld [vmem:[%s13539_s26 + $0x284] ss:$8 sps:$4 sm:$0xff]  }
0x186b   : > { %9206 = vmatpush1.bf16.msra.mxu0 %v11885_v63  ;;  %9237 = vmatprep.mubr.bf16.mxu0 %v8580_v62  ;;  %v11921_v62 = vld [vmem:[%s13539_s26 + $0x2b0] ss:$8 sps:$4 sm:$0xff]   ;;  %v11974_v63 = vld [vmem:[%s13539_s26 + $0x1a4] ss:$8 sps:$4 sm:$0xff]  }
0x186c   : > { %9207 = vmatprep.subr.bf16.mxu0 %v11890_v12  ;;  %9163 = vmatpush1.bf16.msra.mxu1 %v11933_v55  ;;  %v11924_v12 = vld [vmem:[%s13539_s26 + $0x2a0] ss:$8 sps:$4 sm:$0xff]   ;;  %v11929_v55 = vld [vmem:[%s13539_s26 + $0x294] ss:$8 sps:$4 sm:$0xff]  }
0x186d   : > { %9164 = vmatprep.subr.bf16.mxu1 %v11938_v59  ;;  %v11972_v59 = vld [vmem:[%s13539_s26 + $0x1a0] ss:$8 sps:$4 sm:$0xff]  }
0x186f   : > { %9208 = vmatpush1.bf16.msra.mxu0 %v11888_v27  ;;  %v11930_v27 = vld [vmem:[%s13539_s26 + $0x280] ss:$8 sps:$4 sm:$0xff]  }
0x1870   : > { %9209 = vmatprep.subr.bf16.mxu0 %v11893_v22  ;;  %9165 = vmatpush1.bf16.msra.mxu1 %v11936_v28  ;;  %v11977_v22 = vld [vmem:[%s13539_s26 + $0x194] ss:$8 sps:$4 sm:$0xff]   ;;  %v11975_v28 = vld [vmem:[%s13539_s26 + $0x190] ss:$8 sps:$4 sm:$0xff]  }
0x1871   : > { %9166 = vmatprep.subr.bf16.mxu1 %v11941_v0  ;;  %v11980_v0 = vld [vmem:[%s13539_s26 + $0x184] ss:$8 sps:$4 sm:$0xff]  }
0x1873   : > { %9210 = vmatpush1.bf16.msra.mxu0 %v11891_v14  ;;  %v11978_v14 = vld [vmem:[%s13539_s26 + $0x180] ss:$8 sps:$4 sm:$0xff]  }
0x1874   : > { %9211 = vmatprep.subr.bf16.mxu0 %v11896_v6  ;;  %9167 = vmatpush1.bf16.msra.mxu1 %v11939_v5  ;;  %v11983_v6 = vld [vmem:[%s13539_s26 + $0x374] ss:$8 sps:$4 sm:$0xff]  }
0x1875   : > { %9168 = vmatprep.subr.bf16.mxu1 %v11944_v45 }
0x1877   : > { %9212 = vmatpush1.bf16.msra.mxu0 %v11894_v50 }
0x1878   : > { %9213 = vmatprep.subr.bf16.mxu0 %v11899_v56  ;;  %9169 = vmatpush1.bf16.msra.mxu1 %v11942_v57 }
0x1879   : > { %9170 = vmatprep.subr.bf16.mxu1 %v11947_v43 }
0x187b   : > { %9214 = vmatpush1.bf16.msra.mxu0 %v11897_v23 }
0x187c   : > { %9215 = vmatprep.subr.bf16.mxu0 %v11902_v46  ;;  %9171 = vmatpush1.bf16.msra.mxu1 %v11945_v13 }
0x187d   : > { %9172 = vmatprep.subr.bf16.mxu1 %v11950_v58  ;;  %v11981_v58 = vld [vmem:[%s13539_s26 + $0x370] ss:$8 sps:$4 sm:$0xff]  }
0x187f   : > { %9216 = vmatpush1.bf16.msra.mxu0 %v11900_v25 }
0x1880   : > { %9217 = vmatprep.subr.bf16.mxu0 %v11905_v10  ;;  %9173 = vmatpush1.bf16.msra.mxu1 %v11948_v3  ;;  %v11986_v3 = vld [vmem:[%s13539_s26 + $0x364] ss:$8 sps:$4 sm:$0xff]  }
0x1881   : > { %9174 = vmatprep.subr.bf16.mxu1 %v11953_v7  ;;  %v11984_v7 = vld [vmem:[%s13539_s26 + $0x360] ss:$8 sps:$4 sm:$0xff]  }
0x1883   : > { %9218 = vmatpush1.bf16.msra.mxu0 %v11903_v15  ;;  %v11989_v15 = vld [vmem:[%s13539_s26 + $0x354] ss:$8 sps:$4 sm:$0xff]  }
0x1884   : > { %9219 = vmatprep.subr.bf16.mxu0 %v11908_v16  ;;  %9175 = vmatpush1.bf16.msra.mxu1 %v11951_v47  ;;  %v11987_v16 = vld [vmem:[%s13539_s26 + $0x350] ss:$8 sps:$4 sm:$0xff]   ;;  %v11992_v47 = vld [vmem:[%s13539_s26 + $0x344] ss:$8 sps:$4 sm:$0xff]  }
0x1885   : > { %9176 = vmatprep.subr.bf16.mxu1 %v11956_v49  ;;  %v11990_v49 = vld [vmem:[%s13539_s26 + $0x340] ss:$8 sps:$4 sm:$0xff]  }
0x1887   : > { %9220 = vmatpush1.bf16.msra.mxu0 %v11906_v51  ;;  %v11995_v51 = vld [vmem:[%s13539_s26 + $0x334] ss:$8 sps:$4 sm:$0xff]  }
0x1888   : > { %9221 = vmatprep.subr.bf16.mxu0 %v11911_v54  ;;  %9177 = vmatpush1.bf16.msra.mxu1 %v11954_v11  ;;  %v11993_v54 = vld [vmem:[%s13539_s26 + $0x330] ss:$8 sps:$4 sm:$0xff]   ;;  %v11998_v11 = vld [vmem:[%s13539_s26 + $0x324] ss:$8 sps:$4 sm:$0xff]  }
0x1889   : > { %9178 = vmatprep.subr.bf16.mxu1 %v11959_v60  ;;  %v11996_v60 = vld [vmem:[%s13539_s26 + $0x320] ss:$8 sps:$4 sm:$0xff]  }
0x188b   : > { %9222 = vmatpush2.bf16.msra.mxu0 %v11909_v40  ;;  %v12001_v40 = vld [vmem:[%s13539_s26 + $0x314] ss:$8 sps:$4 sm:$0xff]  }
0x188c   : > { %9223 = vmatprep.subr.bf16.mxu0 %v11914_v41  ;;  %9179 = vmatpush2.bf16.msra.mxu1 %v11957_v44  ;;  %v11999_v41 = vld [vmem:[%s13539_s26 + $0x310] ss:$8 sps:$4 sm:$0xff]   ;;  %v12004_v44 = vld [vmem:[%s13539_s26 + $0x304] ss:$8 sps:$4 sm:$0xff]  }
0x188d   : > { %9180 = vmatprep.subr.bf16.mxu1 %v11962_v8  ;;  %v12002_v8 = vld [vmem:[%s13539_s26 + $0x300] ss:$8 sps:$4 sm:$0xff]  }
0x188f   : > { %9224 = vmatpush2.bf16.msra.mxu0 %v11912_v2  ;;  %v12007_v2 = vld [vmem:[%s13539_s26 + $0x3f4] ss:$8 sps:$4 sm:$0xff]  }
0x1890   : > { %9225 = vmatprep.subr.bf16.mxu0 %v11917_v31  ;;  %9181 = vmatpush2.bf16.msra.mxu1 %v11960_v33  ;;  %v12005_v31 = vld [vmem:[%s13539_s26 + $0x3f0] ss:$8 sps:$4 sm:$0xff]   ;;  %v12010_v33 = vld [vmem:[%s13539_s26 + $0x3e4] ss:$8 sps:$4 sm:$0xff]  }
0x1891   : > { %9182 = vmatprep.subr.bf16.mxu1 %v11965_v32  ;;  %v12008_v32 = vld [vmem:[%s13539_s26 + $0x3e0] ss:$8 sps:$4 sm:$0xff]  }
0x1893   : > { %9226 = vmatpush2.bf16.msra.mxu0 %v11915_v4  ;;  %v12013_v4 = vld [vmem:[%s13539_s26 + $0x3d4] ss:$8 sps:$4 sm:$0xff]  }
0x1894   : > { %9227 = vmatprep.subr.bf16.mxu0 %v11920_v34  ;;  %9183 = vmatpush2.bf16.msra.mxu1 %v11963_v35  ;;  %v12011_v34 = vld [vmem:[%s13539_s26 + $0x3d0] ss:$8 sps:$4 sm:$0xff]   ;;  %v12016_v35 = vld [vmem:[%s13539_s26 + $0x3c4] ss:$8 sps:$4 sm:$0xff]  }
0x1895   : > { %9184 = vmatprep.subr.bf16.mxu1 %v11968_v36  ;;  %v12014_v36 = vld [vmem:[%s13539_s26 + $0x3c0] ss:$8 sps:$4 sm:$0xff]  }
0x1897   : > { %9228 = vmatpush2.bf16.msra.mxu0 %v11918_v37  ;;  %v12019_v37 = vld [vmem:[%s13539_s26 + $0x3b4] ss:$8 sps:$4 sm:$0xff]  }
0x1898   : > { %9229 = vmatprep.subr.bf16.mxu0 %v11923_v52  ;;  %9185 = vmatpush2.bf16.msra.mxu1 %v11966_v19  ;;  %v12017_v52 = vld [vmem:[%s13539_s26 + $0x3b0] ss:$8 sps:$4 sm:$0xff]   ;;  %v12022_v19 = vld [vmem:[%s13539_s26 + $0x3a4] ss:$8 sps:$4 sm:$0xff]  }
0x1899   : > { %9186 = vmatprep.subr.bf16.mxu1 %v11971_v48  ;;  %v12020_v48 = vld [vmem:[%s13539_s26 + $0x3a0] ss:$8 sps:$4 sm:$0xff]  }
0x189b   : > { %9230 = vmatpush2.bf16.msra.mxu0 %v11921_v62  ;;  %v12025_v62 = vld [vmem:[%s13539_s26 + $0x394] ss:$8 sps:$4 sm:$0xff]  }
0x189c   : > { %9231 = vmatprep.subr.bf16.mxu0 %v11926_v20  ;;  %9187 = vmatpush2.bf16.msra.mxu1 %v11969_v1  ;;  %v12023_v20 = vld [vmem:[%s13539_s26 + $0x390] ss:$8 sps:$4 sm:$0xff]   ;;  %v12028_v1 = vld [vmem:[%s13539_s26 + $0x384] ss:$8 sps:$4 sm:$0xff]  }
0x189d   : > { %9188 = vmatprep.subr.bf16.mxu1 %v11974_v63  ;;  %v12026_v63 = vld [vmem:[%s13539_s26 + $0x380] ss:$8 sps:$4 sm:$0xff]  }
0x189f   : > { %9232 = vmatpush2.bf16.msra.mxu0 %v11924_v12 }
0x18a0   : > { %9233 = vmatprep.subr.bf16.mxu0 %v11929_v55  ;;  %9189 = vmatpush2.bf16.msra.mxu1 %v11972_v59  ;;  %v10136_v55 = vld [vmem:[%s13540_s0 + $0x1] ss:$4 sm:$0x3]  ;;  %s10269_s0 = sshll.u32 %s13546_s1, 4 }
0x18a1   : > { %9190 = vmatprep.subr.bf16.mxu1 %v11977_v22  ;;  %s920_s10 = scalar_lea.vmem %s12230_s24, %s10269_s0 }
0x18a3   : > { %9234 = vmatpush2.bf16.msra.mxu0 %v11927_v38  ;;  %v8675_v38 = vrot.slane %v10136_v55, %v12799_v26 }
0x18a4   : > { %9235 = vmatprep.subr.bf16.mxu0 %v11932_v39  ;;  %9191 = vmatpush2.bf16.msra.mxu1 %v11975_v28 }
0x18a5   : > { %9192 = vmatprep.subr.bf16.mxu1 %v11980_v0 }
0x18a7   : > { %9236 = vmatpush2.bf16.msra.mxu0 %v11930_v27  ;;  %v8679_v27 = vrot.slane %v10136_v55, %v12801_v9 }
0x18a8   : > { %9193 = vmatpush2.bf16.msra.mxu1 %v11978_v14 }
0x18a9   : > { %9248 = vmatprep.subr.bf16.mxu1 %v11983_v6 }
0x18aa   : > { %9238 = vmatmul.mubr.bf16.vlgmr.msra.gmra.mxu0 %v13373_v61 }
0x192a   : > { %v8615_v5 = vpop.f32.mrf.mxu1  ;;  %v13445_v45 = vpop.f32.mrf.mxu0 }
0x192c   : > { %v8617_v50 = vpop.f32.mrf.mxu1  ;;  %v8662_v56 = vpop.f32.mrf.mxu0 }
0x192e   : > { %v8619_v57 = vpop.f32.mrf.mxu1  ;;  %v13447_v61 = vpop.f32.mrf.mxu0 }
0x192f   : > { %v8669_v43 = vpack.c.bf16 %v13447_v61, %v13445_v45  ;;  %v8624_v10 = vpack.c.bf16 %v8619_v57, %v8615_v5 }
0x1930   : > { %v8621_v23 = vpop.f32.mrf.mxu1  ;;  %v8666_v46 = vpop.f32.mrf.mxu0 }
0x1931   : > { %v8625_v13 = vpack.c.bf16 %v8621_v23, %v8617_v50  ;;  %v8670_v25 = vpack.c.bf16 %v8666_v46, %v8662_v56 }
0x1933   : > { %9194 = vmatprep.mubr.bf16.mxu1 %v8625_v13 }
0x1934   : > { %9195 = vmatmul.mubr.bf16.vlgmr.msra.gmra.mxu1 %v8624_v10 }
0x1935   : > { %9249 = vmatpush1.bf16.msra.mxu1 %v11981_v58  ;;  %9280 = vmatprep.mubr.bf16.mxu1 %v8670_v25 }
0x1936   : > { %9250 = vmatprep.subr.bf16.mxu1 %v11986_v3 }
0x1939   : > { %9251 = vmatpush1.bf16.msra.mxu1 %v11984_v7 }
0x193a   : > { %9252 = vmatprep.subr.bf16.mxu1 %v11989_v15 }
0x193d   : > { %9253 = vmatpush1.bf16.msra.mxu1 %v11987_v16 }
0x193e   : > { %9254 = vmatprep.subr.bf16.mxu1 %v11992_v47 }
0x1941   : > { %9255 = vmatpush1.bf16.msra.mxu1 %v11990_v49 }
0x1942   : > { %9256 = vmatprep.subr.bf16.mxu1 %v11995_v51 }
0x1945   : > { %9257 = vmatpush1.bf16.msra.mxu1 %v11993_v54 }
0x1946   : > { %9258 = vmatprep.subr.bf16.mxu1 %v11998_v11 }
0x1949   : > { %9259 = vmatpush1.bf16.msra.mxu1 %v11996_v60 }
0x194a   : > { %9260 = vmatprep.subr.bf16.mxu1 %v12001_v40 }
0x194d   : > { %9261 = vmatpush1.bf16.msra.mxu1 %v11999_v41 }
0x194e   : > { %9262 = vmatprep.subr.bf16.mxu1 %v12004_v44 }
0x1951   : > { %9263 = vmatpush1.bf16.msra.mxu1 %v12002_v8 }
0x1952   : > { %9264 = vmatprep.subr.bf16.mxu1 %v12007_v2 }
0x1955   : > { %9265 = vmatpush2.bf16.msra.mxu1 %v12005_v31 }
0x1956   : > { %9266 = vmatprep.subr.bf16.mxu1 %v12010_v33 }
0x1959   : > { %9267 = vmatpush2.bf16.msra.mxu1 %v12008_v32 }
0x195a   : > { %9268 = vmatprep.subr.bf16.mxu1 %v12013_v4 }
0x195d   : > { %9269 = vmatpush2.bf16.msra.mxu1 %v12011_v34 }
0x195e   : > { %9270 = vmatprep.subr.bf16.mxu1 %v12016_v35 }
0x1961   : > { %9271 = vmatpush2.bf16.msra.mxu1 %v12014_v36 }
0x1962   : > { %9272 = vmatprep.subr.bf16.mxu1 %v12019_v37 }
0x1965   : > { %9273 = vmatpush2.bf16.msra.mxu1 %v12017_v52 }
0x1966   : > { %9274 = vmatprep.subr.bf16.mxu1 %v12022_v19 }
0x1969   : > { %9275 = vmatpush2.bf16.msra.mxu1 %v12020_v48 }
0x196a   : > { %9276 = vmatprep.subr.bf16.mxu1 %v12025_v62  ;;  %v9239_v39 = vpop.f32.mrf.mxu0 }
0x196c   : > { %v9241_v0 = vpop.f32.mrf.mxu0 }
0x196d   : > { %9277 = vmatpush2.bf16.msra.mxu1 %v12023_v20 }
0x196e   : > { %9278 = vmatprep.subr.bf16.mxu1 %v12028_v1  ;;  %v9243_v50 = vpop.f32.mrf.mxu0 }
0x1970   : > { %v9245_v13 = vpop.f32.mrf.mxu0 }
0x1971   : > { %9279 = vmatpush2.bf16.msra.mxu1 %v12026_v63 }
0x1974   : > { %9281 = vmatmul.mubr.bf16.vlgmr.msra.gmra.mxu1 %v8669_v43 }
0x19f4   : > { %v9196_v12 = vpop.f32.mrf.mxu1 }
0x19f5   : > { %v9197_v28 = vadd.f32 %v9196_v12, %v8675_v38 }
0x19f6   : > { %v9198_v59 = vpop.f32.mrf.mxu1 }
0x19f7   : > { %v9199_v14 = vadd.f32 %v9198_v59, %v8679_v27  ;;  %v9240_v45 = vadd.f32 %v9239_v39, %v9197_v28 }
0x19f8   : > { %v9200_v22 = vpop.f32.mrf.mxu1 }
0x19f9   : > { %v9201_v5 = vadd.f32 %v9200_v22, %v8675_v38  ;;  %v9242_v43 = vadd.f32 %v9241_v0, %v9199_v14 }
0x19fa   : > { %v9202_v6 = vpop.f32.mrf.mxu1 }
0x19fb   : > { %v9203_v57 = vadd.f32 %v9202_v6, %v8679_v27  ;;  %v9244_v46 = vadd.f32 %v9243_v50, %v9201_v5 }
0x19fd   : > { %v9246_v7 = vadd.f32 %v9245_v13, %v9203_v57 }
0x1a34   : > { %v9282_v56 = vpop.f32.mrf.mxu1 }
0x1a35   : > { %v9283_v61 = vadd.f32 %v9282_v56, %v9240_v45 }
0x1a36   : > { %v9284_v26 = vpop.f32.mrf.mxu1 }
0x1a37   : > { %v9291_v9 = vadd.f32 %v9283_v61, %v8224_v53  ;;  %v9285_v23 = vadd.f32 %v9284_v26, %v9242_v43 }
0x1a38   : > { %v9286_v58 = vpop.f32.mrf.mxu1 }
0x1a39   : > { %v9295_v25 = vmax.f32 %v9291_v9, 0.0  ;;  %v9292_v10 = vadd.f32 %v9285_v23, %v8225_v30  ;;  %v9287_v3 = vadd.f32 %v9286_v58, %v9244_v46 }
0x1a3a   : > { %v9288_v15 = vpop.f32.mrf.mxu1 }
0x1a3b   : > { %9299 = vst [vmem:[%s920_s10] sm:$0xff] %v9295_v25  ;;  %v9296_v16 = vmax.f32 %v9292_v10, 0.0  ;;  %v9293_v47 = vadd.f32 %v9287_v3, %v8226_v24  ;;  %v9289_v49 = vadd.f32 %v9288_v15, %v9246_v7 }
0x1a3d   : > { %9300 = vst [vmem:[%s920_s10 + $0x8] sm:$0xff] %v9296_v16  ;;  %v9297_v21 = vmax.f32 %v9293_v47, 0.0  ;;  %v9294_v53 = vadd.f32 %v9289_v49, %v8227_v42 }
0x1a3f   : > { %9301 = vst [vmem:[%s920_s10 + $0x10] sm:$0xff] %v9297_v21  ;;  %v9298_v51 = vmax.f32 %v9294_v53, 0.0 }
0x1a41   : > { %9302 = vst [vmem:[%s920_s10 + $0x18] sm:$0xff] %v9298_v51 }
0x1a42 PF: > { %s70_s7 = sadd.s32 1, %s12045_s7  }
0x1a43   : > { %p67_p6 = scmp.ge.s32.totalorder %s70_s7, 4  }
0x1a45   :  { %69 = sbr.rel (!%p67_p6) target bundleno = 45 (0x2d), region = 215 }

</bundles_post_ra>
